<compile_context>
chip_gen: v5e
topology: v5e:2x2
jax: 0.10.0
libtpu: 0.0.40
codegen_flags: <defaults>
</compile_context>

<pallas_src>
import numpy as np
import jax
import jax.numpy as jnp
from jax.experimental import pallas as pl
from jax.experimental.pallas import tpu as pltpu

# ----------------------- static configuration (CNNParams) -------------------
B = 2            # batch
C_IN = 4         # conv.in_channels
HW = 16          # conv.in_dimensions
C1 = 8           # conv layer 1 out channels
C2 = 16          # conv layer 2 out channels
K = 3            # kernel size (pad=1, stride=1)
FC_HID = 32
FC_OUT = 10
EPS = 1e-5       # torch BatchNorm default eps

# Flat-layout geometry: spatial index lives on the sublane (row) axis with a
# padded row stride, batch*channel lives on the lane (column) axis.
S1P = HW + 2            # 18 : padded row stride for conv1 (16x16 image, pad 1)
S2P = HW // 2 + 2       # 10 : padded row stride for conv2 ( 8x8  image, pad 1)
POOL1_HW = HW // 2      # 8  : spatial size after pool1
POOL2_HW = HW // 4      # 4  : spatial size after pool2
N1 = 288                # conv1 output rows computed (covers p = 18*i+j <= 285)
L1 = 268                # pool1 candidate rows       (covers p00 = 36*i2+2*j2 <= 266)
R1 = 38 + N1 + 2        # 328: padded conv1 input rows (max tap offset 38)
N2 = 80                 # conv2 output rows computed (covers p = 10*i+j <= 77)
R2 = 104                # padded conv2 input rows     (max tap offset 22, 22+80<=104)


# ------------------------------ fused kernel --------------------------------

def cnn_fused_kernel(x_ref, w1t_ref, sc1_ref, sh1_ref, sp1_ref,
                     w2t_ref, sc2_ref, sh2_ref,
                     w1e_ref, bmask_ref, fsc_ref, fsh_ref, w2fc_ref, b2fc_ref,
                     o_ref,
                     xpad1_ref, out1_ref, xpad2_ref, out2_ref):
    f32 = jnp.float32

    # -- stage 0: scatter the input rows into the zero-padded conv1 buffer ---
    xpad1_ref[...] = jnp.zeros((R1, B * C_IN), f32)
    for i in range(HW):
        xpad1_ref[pl.ds((i + 1) * S1P + 1, HW), :] = x_ref[pl.ds(i * HW, HW), :]

    # -- conv1: 9 sublane-shifted GEMMs (in-kernel im2col), then folded
    #    bias+BN scale/shift + ReLU (free VPU epilogue) ------------------------
    acc1 = jnp.zeros((N1, B * C1), f32)
    for t in range(K * K):
        off = (t // K) * S1P + (t % K)
        acc1 = acc1 + jnp.dot(xpad1_ref[pl.ds(off, N1), :], w1t_ref[t],
                              preferred_element_type=f32)
    out1_ref[...] = jnp.maximum(acc1 * sc1_ref[...] + sh1_ref[...], 0.0)

    # -- maxpool1 (2x2): 4 shifted maxes; downsample + relayout + zero-pad for
    #    conv2 is one selection GEMM against a host-built 0/1 matrix ----------
    m1 = jnp.maximum(
        jnp.maximum(out1_ref[pl.ds(0, L1), :], out1_ref[pl.ds(1, L1), :]),
        jnp.maximum(out1_ref[pl.ds(S1P, L1), :], out1_ref[pl.ds(S1P + 1, L1), :]))
    xpad2_ref[...] = jnp.dot(sp1_ref[...], m1, preferred_element_type=f32)

    # -- conv2: 9 sublane-shifted GEMMs + folded bias+BN + ReLU ---------------
    acc2 = jnp.zeros((N2, B * C2), f32)
    for t in range(K * K):
        off = (t // K) * S2P + (t % K)
        acc2 = acc2 + jnp.dot(xpad2_ref[pl.ds(off, N2), :], w2t_ref[t],
                              preferred_element_type=f32)
    out2_ref[...] = jnp.maximum(acc2 * sc2_ref[...] + sh2_ref[...], 0.0)

    # -- maxpool2 (2x2) fused with the fc1 contraction.  The torch NCHW
    #    flatten order is folded into the host-precomputed per-position
    #    effective fc1 weights w1e[s].  z[h, b*C2+c] holds per-(batch,channel)
    #    partial fc1 activations. ----------------------------------------------
    z = jnp.zeros((FC_HID, B * C2), f32)
    for s in range(POOL2_HW * POOL2_HW):            # s = i3*4 + j3
        p00 = (s // POOL2_HW) * 2 * S2P + (s % POOL2_HW) * 2
        pooled_row = jnp.maximum(
            jnp.maximum(out2_ref[pl.ds(p00, 1), :],
                        out2_ref[pl.ds(p00 + 1, 1), :]),
            jnp.maximum(out2_ref[pl.ds(p00 + S2P, 1), :],
                        out2_ref[pl.ds(p00 + S2P + 1, 1), :]))
        z = z + w1e_ref[s] * pooled_row             # [FC_HID, B*C2]

    # -- per-batch: reduce this batch's lanes, BN1d (folded) + ReLU, then fc2 -
    for b in range(B):
        y1 = jnp.sum(z * bmask_ref[pl.ds(b, 1), :], axis=1, keepdims=True)  # [32,1]
        y1 = jnp.maximum(y1 * fsc_ref[...] + fsh_ref[...], 0.0)
        row = jnp.sum(y1 * w2fc_ref[...], axis=0, keepdims=True)            # [1,10]
        o_ref[pl.ds(b, 1), :] = row + b2fc_ref[...]


# ------------------------------ host wrapper ---------------------------------

def _vmem():
    return pl.BlockSpec(memory_space=pltpu.MemorySpace.VMEM)


@jax.jit
def cnn_forward(x_nchw, packed):
    # quantize_input: Identity (in_bitwidth == 32).
    # Single tiny layout op (NCHW -> [spatial, batch*channel]) feeding the one
    # fused pallas_call.
    x_sp = jnp.transpose(x_nchw, (2, 3, 0, 1)).reshape(HW * HW, B * C_IN)
    ins = (x_sp, packed["w1t"], packed["sc1"], packed["sh1"], packed["sp1"],
           packed["w2t"], packed["sc2"], packed["sh2"],
           packed["w1e"], packed["bmask"], packed["fsc"], packed["fsh"],
           packed["w2fc"], packed["b2fc"])
    return pl.pallas_call(
        cnn_fused_kernel,
        out_shape=jax.ShapeDtypeStruct((B, FC_OUT), jnp.float32),
        in_specs=[_vmem() for _ in ins],
        out_specs=_vmem(),
        scratch_shapes=[
            pltpu.VMEM((R1, B * C_IN), jnp.float32),   # padded conv1 input
            pltpu.VMEM((N1, B * C1), jnp.float32),     # conv1 activations
            pltpu.VMEM((R2, B * C1), jnp.float32),     # padded conv2 input
            pltpu.VMEM((N2, B * C2), jnp.float32),     # conv2 activations
        ],
    )(*ins)


# --------------------- one-time parameter packing (host) ---------------------

def pack_params(p):
    f = lambda k: np.asarray(p[k], np.float32)

    # folded conv1 bias + BN (eval mode)
    sc1 = f("bn1_g") / np.sqrt(f("bn1_v") + EPS)
    sh1 = (f("b1") - f("bn1_m")) * sc1 + f("bn1_b")
    sc2 = f("bn2_g") / np.sqrt(f("bn2_v") + EPS)
    sh2 = (f("b2") - f("bn2_m")) * sc2 + f("bn2_b")

    # per-tap block-diagonal conv weights (block per batch element)
    w1, w2 = f("w1"), f("w2")
    w1t = np.zeros((K * K, B * C_IN, B * C1), np.float32)
    w2t = np.zeros((K * K, B * C1, B * C2), np.float32)
    for t in range(K * K):
        di, dj = t // K, t % K
        for bb in range(B):
            w1t[t, bb * C_IN:(bb + 1) * C_IN, bb * C1:(bb + 1) * C1] = w1[:, :, di, dj].T
            w2t[t, bb * C1:(bb + 1) * C1, bb * C2:(bb + 1) * C2] = w2[:, :, di, dj].T

    # pool1 selection matrix: picks pooled positions, relayouts to the
    # zero-padded conv2 flat layout in one GEMM
    sp1 = np.zeros((R2, L1), np.float32)
    for i2 in range(POOL1_HW):
        for j2 in range(POOL1_HW):
            sp1[(i2 + 1) * S2P + (j2 + 1), i2 * 2 * S1P + j2 * 2] = 1.0

    # effective fc1 weights: torch NCHW flatten order folded in, tiled per batch
    fc1_w = f("fc1_w")                                   # [32, 256] = [h, c*16+s]
    w1r = fc1_w.reshape(FC_HID, C2, POOL2_HW * POOL2_HW)  # [h, c, s]
    w1e = np.zeros((POOL2_HW * POOL2_HW, FC_HID, B * C2), np.float32)
    for s in range(POOL2_HW * POOL2_HW):
        w1e[s] = np.tile(w1r[:, :, s], (1, B))

    bmask = np.zeros((B, B * C2), np.float32)
    for bb in range(B):
        bmask[bb, bb * C2:(bb + 1) * C2] = 1.0

    # folded fc1 bias + BN1d (eval mode)
    fsc = f("fcbn1_g") / np.sqrt(f("fcbn1_v") + EPS)
    fsh = (f("fc1_b") - f("fcbn1_m")) * fsc + f("fcbn1_b")

    packed = {
        "w1t": w1t, "sc1": np.tile(sc1, B).reshape(1, B * C1),
        "sh1": np.tile(sh1, B).reshape(1, B * C1),
        "sp1": sp1,
        "w2t": w2t, "sc2": np.tile(sc2, B).reshape(1, B * C2),
        "sh2": np.tile(sh2, B).reshape(1, B * C2),
        "w1e": w1e, "bmask": bmask,
        "fsc": fsc.reshape(FC_HID, 1), "fsh": fsh.reshape(FC_HID, 1),
        "w2fc": f("fc2_w").T, "b2fc": f("fc2_b").reshape(1, FC_OUT),
    }
    return {k: jnp.asarray(v) for k, v in packed.items()}


# ----------------------- reference (numpy, float64) --------------------------

def np_reference(x_nchw, p):
    g = lambda k: np.asarray(p[k], np.float64)
    x = np.asarray(x_nchw, np.float64)

    def conv3x3_p1(x, w, b):
        Bn, C, H, W = x.shape
        O = w.shape[0]
        xp = np.zeros((Bn, C, H + 2, W + 2), np.float64)
        xp[:, :, 1:H + 1, 1:W + 1] = x
        y = np.zeros((Bn, O, H, W), np.float64)
        for di in range(3):
            for dj in range(3):
                y += np.einsum("oc,bchw->bohw", w[:, :, di, dj],
                               xp[:, :, di:di + H, dj:dj + W])
        return y + b[None, :, None, None]

    def bn4(y, gk, bk, mk, vk):
        return ((y - g(mk)[None, :, None, None])
                / np.sqrt(g(vk)[None, :, None, None] + EPS)
                * g(gk)[None, :, None, None] + g(bk)[None, :, None, None])

    def pool2(y):
        Bn, C, H, W = y.shape
        return y.reshape(Bn, C, H // 2, 2, W // 2, 2).max(axis=(3, 5))

    y = conv3x3_p1(x, g("w1"), g("b1"))
    y = pool2(np.maximum(bn4(y, "bn1_g", "bn1_b", "bn1_m", "bn1_v"), 0.0))
    y = conv3x3_p1(y, g("w2"), g("b2"))
    y = pool2(np.maximum(bn4(y, "bn2_g", "bn2_b", "bn2_m", "bn2_v"), 0.0))
    y = y.reshape(y.shape[0], -1)
    y = y @ g("fc1_w").T + g("fc1_b")
    y = (y - g("fcbn1_m")) / np.sqrt(g("fcbn1_v") + EPS) * g("fcbn1_g") + g("fcbn1_b")
    y = np.maximum(y, 0.0)
    return y @ g("fc2_w").T + g("fc2_b")


# --------------------------------- params ------------------------------------

def make_params(key):
    ks = jax.random.split(key, 20)
    n = lambda k, shp, s=0.1: s * jax.random.normal(k, shp, jnp.float32)
    u = lambda k, shp: 1.0 + 0.1 * jax.random.uniform(k, shp, jnp.float32)
    return {
        "w1": n(ks[0], (C1, C_IN, K, K)), "b1": n(ks[1], (C1,)),
        "bn1_g": u(ks[2], (C1,)), "bn1_b": n(ks[3], (C1,)),
        "bn1_m": n(ks[4], (C1,)), "bn1_v": u(ks[5], (C1,)),
        "w2": n(ks[6], (C2, C1, K, K)), "b2": n(ks[7], (C2,)),
        "bn2_g": u(ks[8], (C2,)), "bn2_b": n(ks[9], (C2,)),
        "bn2_m": n(ks[10], (C2,)), "bn2_v": u(ks[11], (C2,)),
        "fc1_w": n(ks[12], (FC_HID, C2 * POOL2_HW * POOL2_HW), 0.05),
        "fc1_b": n(ks[13], (FC_HID,)),
        "fcbn1_g": u(ks[14], (FC_HID,)), "fcbn1_b": n(ks[15], (FC_HID,)),
        "fcbn1_m": n(ks[16], (FC_HID,)), "fcbn1_v": u(ks[17], (FC_HID,)),
        "fc2_w": n(ks[18], (FC_OUT, FC_HID), 0.05), "fc2_b": n(ks[19], (FC_OUT,)),
    }


if __name__ == "__main__":
    key = jax.random.PRNGKey(0)
    kx, kp = jax.random.split(key)
    x = jax.random.normal(kx, (B, C_IN, HW, HW), jnp.float32)   # NCHW, like PyTorch
    params = make_params(kp)
    packed = pack_params(params)                                # one-time weight prep

    out = jax.block_until_ready(cnn_forward(x, packed))
    assert out.shape == (B, FC_OUT) and out.dtype == jnp.float32
    assert bool(jnp.all(jnp.isfinite(out)))

    ref = np_reference(x, params)
    assert np.allclose(np.asarray(out), ref, rtol=2e-2, atol=2e-2), (
        np.asarray(out), ref)
    print("KERNEL_OK")
</pallas_src>

<mosaic_0001>
module attributes {stable_mosaic.version = 11 : i64} {
  func.func @cnn_fused_kernel(%arg0: memref<256x8xf32, #tpu.memory_space<vmem>>, %arg1: memref<9x8x16xf32, #tpu.memory_space<vmem>>, %arg2: memref<1x16xf32, #tpu.memory_space<vmem>>, %arg3: memref<1x16xf32, #tpu.memory_space<vmem>>, %arg4: memref<104x268xf32, #tpu.memory_space<vmem>>, %arg5: memref<9x16x32xf32, #tpu.memory_space<vmem>>, %arg6: memref<1x32xf32, #tpu.memory_space<vmem>>, %arg7: memref<1x32xf32, #tpu.memory_space<vmem>>, %arg8: memref<16x32x32xf32, #tpu.memory_space<vmem>>, %arg9: memref<2x32xf32, #tpu.memory_space<vmem>>, %arg10: memref<32x1xf32, #tpu.memory_space<vmem>>, %arg11: memref<32x1xf32, #tpu.memory_space<vmem>>, %arg12: memref<32x10xf32, #tpu.memory_space<vmem>>, %arg13: memref<1x10xf32, #tpu.memory_space<vmem>>, %arg14: memref<2x10xf32, #tpu.memory_space<vmem>>, %arg15: memref<328x8xf32, #tpu.memory_space<vmem>>, %arg16: memref<288x16xf32, #tpu.memory_space<vmem>>, %arg17: memref<104x16xf32, #tpu.memory_space<vmem>>, %arg18: memref<80x32xf32, #tpu.memory_space<vmem>>) attributes {dimension_semantics = [], scalar_prefetch = 0 : i64, scratch_operands = 4 : i64, tpu.core_type = #tpu.core_type<tc>} {
    %cst = arith.constant 0.000000e+00 : f32
    %0 = vector.broadcast %cst : f32 to vector<328x8xf32>
    %c0 = arith.constant 0 : index
    %c0_0 = arith.constant 0 : index
    %1 = vector.load %arg15[%c0, %c0_0] : memref<328x8xf32, #tpu.memory_space<vmem>>, vector<328x8xf32>
    tpu.vector_store %arg15[%c0, %c0_0], %0 {strides = array<i32>} : memref<328x8xf32, #tpu.memory_space<vmem>>, vector<328x8xf32>,
    %c0_1 = arith.constant 0 : index
    %c0_2 = arith.constant 0 : index
    %2 = vector.load %arg0[%c0_1, %c0_2] : memref<256x8xf32, #tpu.memory_space<vmem>>, vector<16x8xf32>
    %c19 = arith.constant 19 : index
    %c0_3 = arith.constant 0 : index
    %3 = vector.load %arg15[%c19, %c0_3] : memref<328x8xf32, #tpu.memory_space<vmem>>, vector<16x8xf32>
    tpu.vector_store %arg15[%c19, %c0_3], %2 {strides = array<i32>} : memref<328x8xf32, #tpu.memory_space<vmem>>, vector<16x8xf32>,
    %c16 = arith.constant 16 : index
    %c0_4 = arith.constant 0 : index
    %4 = vector.load %arg0[%c16, %c0_4] : memref<256x8xf32, #tpu.memory_space<vmem>>, vector<16x8xf32>
    %c37 = arith.constant 37 : index
    %c0_5 = arith.constant 0 : index
    %5 = vector.load %arg15[%c37, %c0_5] : memref<328x8xf32, #tpu.memory_space<vmem>>, vector<16x8xf32>
    tpu.vector_store %arg15[%c37, %c0_5], %4 {strides = array<i32>} : memref<328x8xf32, #tpu.memory_space<vmem>>, vector<16x8xf32>,
    %c32 = arith.constant 32 : index
    %c0_6 = arith.constant 0 : index
    %6 = vector.load %arg0[%c32, %c0_6] : memref<256x8xf32, #tpu.memory_space<vmem>>, vector<16x8xf32>
    %c55 = arith.constant 55 : index
    %c0_7 = arith.constant 0 : index
    %7 = vector.load %arg15[%c55, %c0_7] : memref<328x8xf32, #tpu.memory_space<vmem>>, vector<16x8xf32>
    tpu.vector_store %arg15[%c55, %c0_7], %6 {strides = array<i32>} : memref<328x8xf32, #tpu.memory_space<vmem>>, vector<16x8xf32>,
    %c48 = arith.constant 48 : index
    %c0_8 = arith.constant 0 : index
    %8 = vector.load %arg0[%c48, %c0_8] : memref<256x8xf32, #tpu.memory_space<vmem>>, vector<16x8xf32>
    %c73 = arith.constant 73 : index
    %c0_9 = arith.constant 0 : index
    %9 = vector.load %arg15[%c73, %c0_9] : memref<328x8xf32, #tpu.memory_space<vmem>>, vector<16x8xf32>
    tpu.vector_store %arg15[%c73, %c0_9], %8 {strides = array<i32>} : memref<328x8xf32, #tpu.memory_space<vmem>>, vector<16x8xf32>,
    %c64 = arith.constant 64 : index
    %c0_10 = arith.constant 0 : index
    %10 = vector.load %arg0[%c64, %c0_10] : memref<256x8xf32, #tpu.memory_space<vmem>>, vector<16x8xf32>
    %c91 = arith.constant 91 : index
    %c0_11 = arith.constant 0 : index
    %11 = vector.load %arg15[%c91, %c0_11] : memref<328x8xf32, #tpu.memory_space<vmem>>, vector<16x8xf32>
    tpu.vector_store %arg15[%c91, %c0_11], %10 {strides = array<i32>} : memref<328x8xf32, #tpu.memory_space<vmem>>, vector<16x8xf32>,
    %c80 = arith.constant 80 : index
    %c0_12 = arith.constant 0 : index
    %12 = vector.load %arg0[%c80, %c0_12] : memref<256x8xf32, #tpu.memory_space<vmem>>, vector<16x8xf32>
    %c109 = arith.constant 109 : index
    %c0_13 = arith.constant 0 : index
    %13 = vector.load %arg15[%c109, %c0_13] : memref<328x8xf32, #tpu.memory_space<vmem>>, vector<16x8xf32>
    tpu.vector_store %arg15[%c109, %c0_13], %12 {strides = array<i32>} : memref<328x8xf32, #tpu.memory_space<vmem>>, vector<16x8xf32>,
    %c96 = arith.constant 96 : index
    %c0_14 = arith.constant 0 : index
    %14 = vector.load %arg0[%c96, %c0_14] : memref<256x8xf32, #tpu.memory_space<vmem>>, vector<16x8xf32>
    %c127 = arith.constant 127 : index
    %c0_15 = arith.constant 0 : index
    %15 = vector.load %arg15[%c127, %c0_15] : memref<328x8xf32, #tpu.memory_space<vmem>>, vector<16x8xf32>
    tpu.vector_store %arg15[%c127, %c0_15], %14 {strides = array<i32>} : memref<328x8xf32, #tpu.memory_space<vmem>>, vector<16x8xf32>,
    %c112 = arith.constant 112 : index
    %c0_16 = arith.constant 0 : index
    %16 = vector.load %arg0[%c112, %c0_16] : memref<256x8xf32, #tpu.memory_space<vmem>>, vector<16x8xf32>
    %c145 = arith.constant 145 : index
    %c0_17 = arith.constant 0 : index
    %17 = vector.load %arg15[%c145, %c0_17] : memref<328x8xf32, #tpu.memory_space<vmem>>, vector<16x8xf32>
    tpu.vector_store %arg15[%c145, %c0_17], %16 {strides = array<i32>} : memref<328x8xf32, #tpu.memory_space<vmem>>, vector<16x8xf32>,
    %c128 = arith.constant 128 : index
    %c0_18 = arith.constant 0 : index
    %18 = vector.load %arg0[%c128, %c0_18] : memref<256x8xf32, #tpu.memory_space<vmem>>, vector<16x8xf32>
    %c163 = arith.constant 163 : index
    %c0_19 = arith.constant 0 : index
    %19 = vector.load %arg15[%c163, %c0_19] : memref<328x8xf32, #tpu.memory_space<vmem>>, vector<16x8xf32>
    tpu.vector_store %arg15[%c163, %c0_19], %18 {strides = array<i32>} : memref<328x8xf32, #tpu.memory_space<vmem>>, vector<16x8xf32>,
    %c144 = arith.constant 144 : index
    %c0_20 = arith.constant 0 : index
    %20 = vector.load %arg0[%c144, %c0_20] : memref<256x8xf32, #tpu.memory_space<vmem>>, vector<16x8xf32>
    %c181 = arith.constant 181 : index
    %c0_21 = arith.constant 0 : index
    %21 = vector.load %arg15[%c181, %c0_21] : memref<328x8xf32, #tpu.memory_space<vmem>>, vector<16x8xf32>
    tpu.vector_store %arg15[%c181, %c0_21], %20 {strides = array<i32>} : memref<328x8xf32, #tpu.memory_space<vmem>>, vector<16x8xf32>,
    %c160 = arith.constant 160 : index
    %c0_22 = arith.constant 0 : index
    %22 = vector.load %arg0[%c160, %c0_22] : memref<256x8xf32, #tpu.memory_space<vmem>>, vector<16x8xf32>
    %c199 = arith.constant 199 : index
    %c0_23 = arith.constant 0 : index
    %23 = vector.load %arg15[%c199, %c0_23] : memref<328x8xf32, #tpu.memory_space<vmem>>, vector<16x8xf32>
    tpu.vector_store %arg15[%c199, %c0_23], %22 {strides = array<i32>} : memref<328x8xf32, #tpu.memory_space<vmem>>, vector<16x8xf32>,
    %c176 = arith.constant 176 : index
    %c0_24 = arith.constant 0 : index
    %24 = vector.load %arg0[%c176, %c0_24] : memref<256x8xf32, #tpu.memory_space<vmem>>, vector<16x8xf32>
    %c217 = arith.constant 217 : index
    %c0_25 = arith.constant 0 : index
    %25 = vector.load %arg15[%c217, %c0_25] : memref<328x8xf32, #tpu.memory_space<vmem>>, vector<16x8xf32>
    tpu.vector_store %arg15[%c217, %c0_25], %24 {strides = array<i32>} : memref<328x8xf32, #tpu.memory_space<vmem>>, vector<16x8xf32>,
    %c192 = arith.constant 192 : index
    %c0_26 = arith.constant 0 : index
    %26 = vector.load %arg0[%c192, %c0_26] : memref<256x8xf32, #tpu.memory_space<vmem>>, vector<16x8xf32>
    %c235 = arith.constant 235 : index
    %c0_27 = arith.constant 0 : index
    %27 = vector.load %arg15[%c235, %c0_27] : memref<328x8xf32, #tpu.memory_space<vmem>>, vector<16x8xf32>
    tpu.vector_store %arg15[%c235, %c0_27], %26 {strides = array<i32>} : memref<328x8xf32, #tpu.memory_space<vmem>>, vector<16x8xf32>,
    %c208 = arith.constant 208 : index
    %c0_28 = arith.constant 0 : index
    %28 = vector.load %arg0[%c208, %c0_28] : memref<256x8xf32, #tpu.memory_space<vmem>>, vector<16x8xf32>
    %c253 = arith.constant 253 : index
    %c0_29 = arith.constant 0 : index
    %29 = vector.load %arg15[%c253, %c0_29] : memref<328x8xf32, #tpu.memory_space<vmem>>, vector<16x8xf32>
    tpu.vector_store %arg15[%c253, %c0_29], %28 {strides = array<i32>} : memref<328x8xf32, #tpu.memory_space<vmem>>, vector<16x8xf32>,
    %c224 = arith.constant 224 : index
    %c0_30 = arith.constant 0 : index
    %30 = vector.load %arg0[%c224, %c0_30] : memref<256x8xf32, #tpu.memory_space<vmem>>, vector<16x8xf32>
    %c271 = arith.constant 271 : index
    %c0_31 = arith.constant 0 : index
    %31 = vector.load %arg15[%c271, %c0_31] : memref<328x8xf32, #tpu.memory_space<vmem>>, vector<16x8xf32>
    tpu.vector_store %arg15[%c271, %c0_31], %30 {strides = array<i32>} : memref<328x8xf32, #tpu.memory_space<vmem>>, vector<16x8xf32>,
    %c240 = arith.constant 240 : index
    %c0_32 = arith.constant 0 : index
    %32 = vector.load %arg0[%c240, %c0_32] : memref<256x8xf32, #tpu.memory_space<vmem>>, vector<16x8xf32>
    %c289 = arith.constant 289 : index
    %c0_33 = arith.constant 0 : index
    %33 = vector.load %arg15[%c289, %c0_33] : memref<328x8xf32, #tpu.memory_space<vmem>>, vector<16x8xf32>
    tpu.vector_store %arg15[%c289, %c0_33], %32 {strides = array<i32>} : memref<328x8xf32, #tpu.memory_space<vmem>>, vector<16x8xf32>,
    %cst_34 = arith.constant 0.000000e+00 : f32
    %34 = vector.broadcast %cst_34 : f32 to vector<288x16xf32>
    %c0_35 = arith.constant 0 : index
    %c0_36 = arith.constant 0 : index
    %35 = vector.load %arg15[%c0_35, %c0_36] : memref<328x8xf32, #tpu.memory_space<vmem>>, vector<288x8xf32>
    %c0_37 = arith.constant 0 : index
    %c0_38 = arith.constant 0 : index
    %c0_39 = arith.constant 0 : index
    %36 = vector.load %arg1[%c0_37, %c0_38, %c0_39] : memref<9x8x16xf32, #tpu.memory_space<vmem>>, vector<1x8x16xf32>
    %37 = vector.shape_cast %36 : vector<1x8x16xf32> to vector<8x16xf32>
    %cst_40 = arith.constant dense<0.000000e+00> : vector<288x16xf32>
    %38 = tpu.matmul %35, %37, %cst_40 {dimension_numbers = #tpu.dot_dimension_numbers<[1], [0], [0], [1], [0, 0, 1, 1], [], []>} : vector<288x8xf32>, vector<8x16xf32>, vector<288x16xf32> -> vector<288x16xf32>
    %39 = arith.addf %34, %38 : vector<288x16xf32>
    %c1 = arith.constant 1 : index
    %c0_41 = arith.constant 0 : index
    %40 = vector.load %arg15[%c1, %c0_41] : memref<328x8xf32, #tpu.memory_space<vmem>>, vector<288x8xf32>
    %c1_42 = arith.constant 1 : index
    %c0_43 = arith.constant 0 : index
    %c0_44 = arith.constant 0 : index
    %41 = vector.load %arg1[%c1_42, %c0_43, %c0_44] : memref<9x8x16xf32, #tpu.memory_space<vmem>>, vector<1x8x16xf32>
    %42 = vector.shape_cast %41 : vector<1x8x16xf32> to vector<8x16xf32>
    %cst_45 = arith.constant dense<0.000000e+00> : vector<288x16xf32>
    %43 = tpu.matmul %40, %42, %cst_45 {dimension_numbers = #tpu.dot_dimension_numbers<[1], [0], [0], [1], [0, 0, 1, 1], [], []>} : vector<288x8xf32>, vector<8x16xf32>, vector<288x16xf32> -> vector<288x16xf32>
    %44 = arith.addf %39, %43 : vector<288x16xf32>
    %c2 = arith.constant 2 : index
    %c0_46 = arith.constant 0 : index
    %45 = vector.load %arg15[%c2, %c0_46] : memref<328x8xf32, #tpu.memory_space<vmem>>, vector<288x8xf32>
    %c2_47 = arith.constant 2 : index
    %c0_48 = arith.constant 0 : index
    %c0_49 = arith.constant 0 : index
    %46 = vector.load %arg1[%c2_47, %c0_48, %c0_49] : memref<9x8x16xf32, #tpu.memory_space<vmem>>, vector<1x8x16xf32>
    %47 = vector.shape_cast %46 : vector<1x8x16xf32> to vector<8x16xf32>
    %cst_50 = arith.constant dense<0.000000e+00> : vector<288x16xf32>
    %48 = tpu.matmul %45, %47, %cst_50 {dimension_numbers = #tpu.dot_dimension_numbers<[1], [0], [0], [1], [0, 0, 1, 1], [], []>} : vector<288x8xf32>, vector<8x16xf32>, vector<288x16xf32> -> vector<288x16xf32>
    %49 = arith.addf %44, %48 : vector<288x16xf32>
    %c18 = arith.constant 18 : index
    %c0_51 = arith.constant 0 : index
    %50 = vector.load %arg15[%c18, %c0_51] : memref<328x8xf32, #tpu.memory_space<vmem>>, vector<288x8xf32>
    %c3 = arith.constant 3 : index
    %c0_52 = arith.constant 0 : index
    %c0_53 = arith.constant 0 : index
    %51 = vector.load %arg1[%c3, %c0_52, %c0_53] : memref<9x8x16xf32, #tpu.memory_space<vmem>>, vector<1x8x16xf32>
    %52 = vector.shape_cast %51 : vector<1x8x16xf32> to vector<8x16xf32>
    %cst_54 = arith.constant dense<0.000000e+00> : vector<288x16xf32>
    %53 = tpu.matmul %50, %52, %cst_54 {dimension_numbers = #tpu.dot_dimension_numbers<[1], [0], [0], [1], [0, 0, 1, 1], [], []>} : vector<288x8xf32>, vector<8x16xf32>, vector<288x16xf32> -> vector<288x16xf32>
    %54 = arith.addf %49, %53 : vector<288x16xf32>
    %c19_55 = arith.constant 19 : index
    %c0_56 = arith.constant 0 : index
    %55 = vector.load %arg15[%c19_55, %c0_56] : memref<328x8xf32, #tpu.memory_space<vmem>>, vector<288x8xf32>
    %c4 = arith.constant 4 : index
    %c0_57 = arith.constant 0 : index
    %c0_58 = arith.constant 0 : index
    %56 = vector.load %arg1[%c4, %c0_57, %c0_58] : memref<9x8x16xf32, #tpu.memory_space<vmem>>, vector<1x8x16xf32>
    %57 = vector.shape_cast %56 : vector<1x8x16xf32> to vector<8x16xf32>
    %cst_59 = arith.constant dense<0.000000e+00> : vector<288x16xf32>
    %58 = tpu.matmul %55, %57, %cst_59 {dimension_numbers = #tpu.dot_dimension_numbers<[1], [0], [0], [1], [0, 0, 1, 1], [], []>} : vector<288x8xf32>, vector<8x16xf32>, vector<288x16xf32> -> vector<288x16xf32>
    %59 = arith.addf %54, %58 : vector<288x16xf32>
    %c20 = arith.constant 20 : index
    %c0_60 = arith.constant 0 : index
    %60 = vector.load %arg15[%c20, %c0_60] : memref<328x8xf32, #tpu.memory_space<vmem>>, vector<288x8xf32>
    %c5 = arith.constant 5 : index
    %c0_61 = arith.constant 0 : index
    %c0_62 = arith.constant 0 : index
    %61 = vector.load %arg1[%c5, %c0_61, %c0_62] : memref<9x8x16xf32, #tpu.memory_space<vmem>>, vector<1x8x16xf32>
    %62 = vector.shape_cast %61 : vector<1x8x16xf32> to vector<8x16xf32>
    %cst_63 = arith.constant dense<0.000000e+00> : vector<288x16xf32>
    %63 = tpu.matmul %60, %62, %cst_63 {dimension_numbers = #tpu.dot_dimension_numbers<[1], [0], [0], [1], [0, 0, 1, 1], [], []>} : vector<288x8xf32>, vector<8x16xf32>, vector<288x16xf32> -> vector<288x16xf32>
    %64 = arith.addf %59, %63 : vector<288x16xf32>
    %c36 = arith.constant 36 : index
    %c0_64 = arith.constant 0 : index
    %65 = vector.load %arg15[%c36, %c0_64] : memref<328x8xf32, #tpu.memory_space<vmem>>, vector<288x8xf32>
    %c6 = arith.constant 6 : index
    %c0_65 = arith.constant 0 : index
    %c0_66 = arith.constant 0 : index
    %66 = vector.load %arg1[%c6, %c0_65, %c0_66] : memref<9x8x16xf32, #tpu.memory_space<vmem>>, vector<1x8x16xf32>
    %67 = vector.shape_cast %66 : vector<1x8x16xf32> to vector<8x16xf32>
    %cst_67 = arith.constant dense<0.000000e+00> : vector<288x16xf32>
    %68 = tpu.matmul %65, %67, %cst_67 {dimension_numbers = #tpu.dot_dimension_numbers<[1], [0], [0], [1], [0, 0, 1, 1], [], []>} : vector<288x8xf32>, vector<8x16xf32>, vector<288x16xf32> -> vector<288x16xf32>
    %69 = arith.addf %64, %68 : vector<288x16xf32>
    %c37_68 = arith.constant 37 : index
    %c0_69 = arith.constant 0 : index
    %70 = vector.load %arg15[%c37_68, %c0_69] : memref<328x8xf32, #tpu.memory_space<vmem>>, vector<288x8xf32>
    %c7 = arith.constant 7 : index
    %c0_70 = arith.constant 0 : index
    %c0_71 = arith.constant 0 : index
    %71 = vector.load %arg1[%c7, %c0_70, %c0_71] : memref<9x8x16xf32, #tpu.memory_space<vmem>>, vector<1x8x16xf32>
    %72 = vector.shape_cast %71 : vector<1x8x16xf32> to vector<8x16xf32>
    %cst_72 = arith.constant dense<0.000000e+00> : vector<288x16xf32>
    %73 = tpu.matmul %70, %72, %cst_72 {dimension_numbers = #tpu.dot_dimension_numbers<[1], [0], [0], [1], [0, 0, 1, 1], [], []>} : vector<288x8xf32>, vector<8x16xf32>, vector<288x16xf32> -> vector<288x16xf32>
    %74 = arith.addf %69, %73 : vector<288x16xf32>
    %c38 = arith.constant 38 : index
    %c0_73 = arith.constant 0 : index
    %75 = vector.load %arg15[%c38, %c0_73] : memref<328x8xf32, #tpu.memory_space<vmem>>, vector<288x8xf32>
    %c8 = arith.constant 8 : index
    %c0_74 = arith.constant 0 : index
    %c0_75 = arith.constant 0 : index
    %76 = vector.load %arg1[%c8, %c0_74, %c0_75] : memref<9x8x16xf32, #tpu.memory_space<vmem>>, vector<1x8x16xf32>
    %77 = vector.shape_cast %76 : vector<1x8x16xf32> to vector<8x16xf32>
    %cst_76 = arith.constant dense<0.000000e+00> : vector<288x16xf32>
    %78 = tpu.matmul %75, %77, %cst_76 {dimension_numbers = #tpu.dot_dimension_numbers<[1], [0], [0], [1], [0, 0, 1, 1], [], []>} : vector<288x8xf32>, vector<8x16xf32>, vector<288x16xf32> -> vector<288x16xf32>
    %79 = arith.addf %74, %78 : vector<288x16xf32>
    %c0_77 = arith.constant 0 : index
    %c0_78 = arith.constant 0 : index
    %80 = vector.load %arg2[%c0_77, %c0_78] : memref<1x16xf32, #tpu.memory_space<vmem>>, vector<1x16xf32>
    %81 = vector.broadcast %80 : vector<1x16xf32> to vector<288x16xf32>
    %82 = arith.mulf %79, %81 : vector<288x16xf32>
    %c0_79 = arith.constant 0 : index
    %c0_80 = arith.constant 0 : index
    %83 = vector.load %arg3[%c0_79, %c0_80] : memref<1x16xf32, #tpu.memory_space<vmem>>, vector<1x16xf32>
    %84 = vector.broadcast %83 : vector<1x16xf32> to vector<288x16xf32>
    %85 = arith.addf %82, %84 : vector<288x16xf32>
    %cst_81 = arith.constant 0.000000e+00 : f32
    %86 = vector.broadcast %cst_81 : f32 to vector<288x16xf32>
    %87 = arith.maximumf %85, %86 : vector<288x16xf32>
    %c0_82 = arith.constant 0 : index
    %c0_83 = arith.constant 0 : index
    %88 = vector.load %arg16[%c0_82, %c0_83] : memref<288x16xf32, #tpu.memory_space<vmem>>, vector<288x16xf32>
    tpu.vector_store %arg16[%c0_82, %c0_83], %87 {strides = array<i32>} : memref<288x16xf32, #tpu.memory_space<vmem>>, vector<288x16xf32>,
    %c0_84 = arith.constant 0 : index
    %c0_85 = arith.constant 0 : index
    %89 = vector.load %arg16[%c0_84, %c0_85] : memref<288x16xf32, #tpu.memory_space<vmem>>, vector<268x16xf32>
    %c1_86 = arith.constant 1 : index
    %c0_87 = arith.constant 0 : index
    %90 = vector.load %arg16[%c1_86, %c0_87] : memref<288x16xf32, #tpu.memory_space<vmem>>, vector<268x16xf32>
    %91 = arith.maximumf %89, %90 : vector<268x16xf32>
    %c18_88 = arith.constant 18 : index
    %c0_89 = arith.constant 0 : index
    %92 = vector.load %arg16[%c18_88, %c0_89] : memref<288x16xf32, #tpu.memory_space<vmem>>, vector<268x16xf32>
    %c19_90 = arith.constant 19 : index
    %c0_91 = arith.constant 0 : index
    %93 = vector.load %arg16[%c19_90, %c0_91] : memref<288x16xf32, #tpu.memory_space<vmem>>, vector<268x16xf32>
    %94 = arith.maximumf %92, %93 : vector<268x16xf32>
    %95 = arith.maximumf %91, %94 : vector<268x16xf32>
    %c0_92 = arith.constant 0 : index
    %c0_93 = arith.constant 0 : index
    %96 = vector.load %arg4[%c0_92, %c0_93] : memref<104x268xf32, #tpu.memory_space<vmem>>, vector<104x268xf32>
    %cst_94 = arith.constant dense<0.000000e+00> : vector<104x16xf32>
    %97 = tpu.matmul %96, %95, %cst_94 {dimension_numbers = #tpu.dot_dimension_numbers<[1], [0], [0], [1], [0, 0, 1, 1], [], []>} : vector<104x268xf32>, vector<268x16xf32>, vector<104x16xf32> -> vector<104x16xf32>
    %c0_95 = arith.constant 0 : index
    %c0_96 = arith.constant 0 : index
    %98 = vector.load %arg17[%c0_95, %c0_96] : memref<104x16xf32, #tpu.memory_space<vmem>>, vector<104x16xf32>
    tpu.vector_store %arg17[%c0_95, %c0_96], %97 {strides = array<i32>} : memref<104x16xf32, #tpu.memory_space<vmem>>, vector<104x16xf32>,
    %cst_97 = arith.constant 0.000000e+00 : f32
    %99 = vector.broadcast %cst_97 : f32 to vector<80x32xf32>
    %c0_98 = arith.constant 0 : index
    %c0_99 = arith.constant 0 : index
    %100 = vector.load %arg17[%c0_98, %c0_99] : memref<104x16xf32, #tpu.memory_space<vmem>>, vector<80x16xf32>
    %c0_100 = arith.constant 0 : index
    %c0_101 = arith.constant 0 : index
    %c0_102 = arith.constant 0 : index
    %101 = vector.load %arg5[%c0_100, %c0_101, %c0_102] : memref<9x16x32xf32, #tpu.memory_space<vmem>>, vector<1x16x32xf32>
    %102 = vector.shape_cast %101 : vector<1x16x32xf32> to vector<16x32xf32>
    %cst_103 = arith.constant dense<0.000000e+00> : vector<80x32xf32>
    %103 = tpu.matmul %100, %102, %cst_103 {dimension_numbers = #tpu.dot_dimension_numbers<[1], [0], [0], [1], [0, 0, 1, 1], [], []>} : vector<80x16xf32>, vector<16x32xf32>, vector<80x32xf32> -> vector<80x32xf32>
    %104 = arith.addf %99, %103 : vector<80x32xf32>
    %c1_104 = arith.constant 1 : index
    %c0_105 = arith.constant 0 : index
    %105 = vector.load %arg17[%c1_104, %c0_105] : memref<104x16xf32, #tpu.memory_space<vmem>>, vector<80x16xf32>
    %c1_106 = arith.constant 1 : index
    %c0_107 = arith.constant 0 : index
    %c0_108 = arith.constant 0 : index
    %106 = vector.load %arg5[%c1_106, %c0_107, %c0_108] : memref<9x16x32xf32, #tpu.memory_space<vmem>>, vector<1x16x32xf32>
    %107 = vector.shape_cast %106 : vector<1x16x32xf32> to vector<16x32xf32>
    %cst_109 = arith.constant dense<0.000000e+00> : vector<80x32xf32>
    %108 = tpu.matmul %105, %107, %cst_109 {dimension_numbers = #tpu.dot_dimension_numbers<[1], [0], [0], [1], [0, 0, 1, 1], [], []>} : vector<80x16xf32>, vector<16x32xf32>, vector<80x32xf32> -> vector<80x32xf32>
    %109 = arith.addf %104, %108 : vector<80x32xf32>
    %c2_110 = arith.constant 2 : index
    %c0_111 = arith.constant 0 : index
    %110 = vector.load %arg17[%c2_110, %c0_111] : memref<104x16xf32, #tpu.memory_space<vmem>>, vector<80x16xf32>
    %c2_112 = arith.constant 2 : index
    %c0_113 = arith.constant 0 : index
    %c0_114 = arith.constant 0 : index
    %111 = vector.load %arg5[%c2_112, %c0_113, %c0_114] : memref<9x16x32xf32, #tpu.memory_space<vmem>>, vector<1x16x32xf32>
    %112 = vector.shape_cast %111 : vector<1x16x32xf32> to vector<16x32xf32>
    %cst_115 = arith.constant dense<0.000000e+00> : vector<80x32xf32>
    %113 = tpu.matmul %110, %112, %cst_115 {dimension_numbers = #tpu.dot_dimension_numbers<[1], [0], [0], [1], [0, 0, 1, 1], [], []>} : vector<80x16xf32>, vector<16x32xf32>, vector<80x32xf32> -> vector<80x32xf32>
    %114 = arith.addf %109, %113 : vector<80x32xf32>
    %c10 = arith.constant 10 : index
    %c0_116 = arith.constant 0 : index
    %115 = vector.load %arg17[%c10, %c0_116] : memref<104x16xf32, #tpu.memory_space<vmem>>, vector<80x16xf32>
    %c3_117 = arith.constant 3 : index
    %c0_118 = arith.constant 0 : index
    %c0_119 = arith.constant 0 : index
    %116 = vector.load %arg5[%c3_117, %c0_118, %c0_119] : memref<9x16x32xf32, #tpu.memory_space<vmem>>, vector<1x16x32xf32>
    %117 = vector.shape_cast %116 : vector<1x16x32xf32> to vector<16x32xf32>
    %cst_120 = arith.constant dense<0.000000e+00> : vector<80x32xf32>
    %118 = tpu.matmul %115, %117, %cst_120 {dimension_numbers = #tpu.dot_dimension_numbers<[1], [0], [0], [1], [0, 0, 1, 1], [], []>} : vector<80x16xf32>, vector<16x32xf32>, vector<80x32xf32> -> vector<80x32xf32>
    %119 = arith.addf %114, %118 : vector<80x32xf32>
    %c11 = arith.constant 11 : index
    %c0_121 = arith.constant 0 : index
    %120 = vector.load %arg17[%c11, %c0_121] : memref<104x16xf32, #tpu.memory_space<vmem>>, vector<80x16xf32>
    %c4_122 = arith.constant 4 : index
    %c0_123 = arith.constant 0 : index
    %c0_124 = arith.constant 0 : index
    %121 = vector.load %arg5[%c4_122, %c0_123, %c0_124] : memref<9x16x32xf32, #tpu.memory_space<vmem>>, vector<1x16x32xf32>
    %122 = vector.shape_cast %121 : vector<1x16x32xf32> to vector<16x32xf32>
    %cst_125 = arith.constant dense<0.000000e+00> : vector<80x32xf32>
    %123 = tpu.matmul %120, %122, %cst_125 {dimension_numbers = #tpu.dot_dimension_numbers<[1], [0], [0], [1], [0, 0, 1, 1], [], []>} : vector<80x16xf32>, vector<16x32xf32>, vector<80x32xf32> -> vector<80x32xf32>
    %124 = arith.addf %119, %123 : vector<80x32xf32>
    %c12 = arith.constant 12 : index
    %c0_126 = arith.constant 0 : index
    %125 = vector.load %arg17[%c12, %c0_126] : memref<104x16xf32, #tpu.memory_space<vmem>>, vector<80x16xf32>
    %c5_127 = arith.constant 5 : index
    %c0_128 = arith.constant 0 : index
    %c0_129 = arith.constant 0 : index
    %126 = vector.load %arg5[%c5_127, %c0_128, %c0_129] : memref<9x16x32xf32, #tpu.memory_space<vmem>>, vector<1x16x32xf32>
    %127 = vector.shape_cast %126 : vector<1x16x32xf32> to vector<16x32xf32>
    %cst_130 = arith.constant dense<0.000000e+00> : vector<80x32xf32>
    %128 = tpu.matmul %125, %127, %cst_130 {dimension_numbers = #tpu.dot_dimension_numbers<[1], [0], [0], [1], [0, 0, 1, 1], [], []>} : vector<80x16xf32>, vector<16x32xf32>, vector<80x32xf32> -> vector<80x32xf32>
    %129 = arith.addf %124, %128 : vector<80x32xf32>
    %c20_131 = arith.constant 20 : index
    %c0_132 = arith.constant 0 : index
    %130 = vector.load %arg17[%c20_131, %c0_132] : memref<104x16xf32, #tpu.memory_space<vmem>>, vector<80x16xf32>
    %c6_133 = arith.constant 6 : index
    %c0_134 = arith.constant 0 : index
    %c0_135 = arith.constant 0 : index
    %131 = vector.load %arg5[%c6_133, %c0_134, %c0_135] : memref<9x16x32xf32, #tpu.memory_space<vmem>>, vector<1x16x32xf32>
    %132 = vector.shape_cast %131 : vector<1x16x32xf32> to vector<16x32xf32>
    %cst_136 = arith.constant dense<0.000000e+00> : vector<80x32xf32>
    %133 = tpu.matmul %130, %132, %cst_136 {dimension_numbers = #tpu.dot_dimension_numbers<[1], [0], [0], [1], [0, 0, 1, 1], [], []>} : vector<80x16xf32>, vector<16x32xf32>, vector<80x32xf32> -> vector<80x32xf32>
    %134 = arith.addf %129, %133 : vector<80x32xf32>
    %c21 = arith.constant 21 : index
    %c0_137 = arith.constant 0 : index
    %135 = vector.load %arg17[%c21, %c0_137] : memref<104x16xf32, #tpu.memory_space<vmem>>, vector<80x16xf32>
    %c7_138 = arith.constant 7 : index
    %c0_139 = arith.constant 0 : index
    %c0_140 = arith.constant 0 : index
    %136 = vector.load %arg5[%c7_138, %c0_139, %c0_140] : memref<9x16x32xf32, #tpu.memory_space<vmem>>, vector<1x16x32xf32>
    %137 = vector.shape_cast %136 : vector<1x16x32xf32> to vector<16x32xf32>
    %cst_141 = arith.constant dense<0.000000e+00> : vector<80x32xf32>
    %138 = tpu.matmul %135, %137, %cst_141 {dimension_numbers = #tpu.dot_dimension_numbers<[1], [0], [0], [1], [0, 0, 1, 1], [], []>} : vector<80x16xf32>, vector<16x32xf32>, vector<80x32xf32> -> vector<80x32xf32>
    %139 = arith.addf %134, %138 : vector<80x32xf32>
    %c22 = arith.constant 22 : index
    %c0_142 = arith.constant 0 : index
    %140 = vector.load %arg17[%c22, %c0_142] : memref<104x16xf32, #tpu.memory_space<vmem>>, vector<80x16xf32>
    %c8_143 = arith.constant 8 : index
    %c0_144 = arith.constant 0 : index
    %c0_145 = arith.constant 0 : index
    %141 = vector.load %arg5[%c8_143, %c0_144, %c0_145] : memref<9x16x32xf32, #tpu.memory_space<vmem>>, vector<1x16x32xf32>
    %142 = vector.shape_cast %141 : vector<1x16x32xf32> to vector<16x32xf32>
    %cst_146 = arith.constant dense<0.000000e+00> : vector<80x32xf32>
    %143 = tpu.matmul %140, %142, %cst_146 {dimension_numbers = #tpu.dot_dimension_numbers<[1], [0], [0], [1], [0, 0, 1, 1], [], []>} : vector<80x16xf32>, vector<16x32xf32>, vector<80x32xf32> -> vector<80x32xf32>
    %144 = arith.addf %139, %143 : vector<80x32xf32>
    %c0_147 = arith.constant 0 : index
    %c0_148 = arith.constant 0 : index
    %145 = vector.load %arg6[%c0_147, %c0_148] : memref<1x32xf32, #tpu.memory_space<vmem>>, vector<1x32xf32>
    %146 = vector.broadcast %145 : vector<1x32xf32> to vector<80x32xf32>
    %147 = arith.mulf %144, %146 : vector<80x32xf32>
    %c0_149 = arith.constant 0 : index
    %c0_150 = arith.constant 0 : index
    %148 = vector.load %arg7[%c0_149, %c0_150] : memref<1x32xf32, #tpu.memory_space<vmem>>, vector<1x32xf32>
    %149 = vector.broadcast %148 : vector<1x32xf32> to vector<80x32xf32>
    %150 = arith.addf %147, %149 : vector<80x32xf32>
    %cst_151 = arith.constant 0.000000e+00 : f32
    %151 = vector.broadcast %cst_151 : f32 to vector<80x32xf32>
    %152 = arith.maximumf %150, %151 : vector<80x32xf32>
    %c0_152 = arith.constant 0 : index
    %c0_153 = arith.constant 0 : index
    %153 = vector.load %arg18[%c0_152, %c0_153] : memref<80x32xf32, #tpu.memory_space<vmem>>, vector<80x32xf32>
    tpu.vector_store %arg18[%c0_152, %c0_153], %152 {strides = array<i32>} : memref<80x32xf32, #tpu.memory_space<vmem>>, vector<80x32xf32>,
    %cst_154 = arith.constant 0.000000e+00 : f32
    %154 = vector.broadcast %cst_154 : f32 to vector<32x32xf32>
    %c0_155 = arith.constant 0 : index
    %c0_156 = arith.constant 0 : index
    %155 = vector.load %arg18[%c0_155, %c0_156] : memref<80x32xf32, #tpu.memory_space<vmem>>, vector<1x32xf32>
    %c1_157 = arith.constant 1 : index
    %c0_158 = arith.constant 0 : index
    %156 = vector.load %arg18[%c1_157, %c0_158] : memref<80x32xf32, #tpu.memory_space<vmem>>, vector<1x32xf32>
    %157 = arith.maximumf %155, %156 : vector<1x32xf32>
    %c10_159 = arith.constant 10 : index
    %c0_160 = arith.constant 0 : index
    %158 = vector.load %arg18[%c10_159, %c0_160] : memref<80x32xf32, #tpu.memory_space<vmem>>, vector<1x32xf32>
    %c11_161 = arith.constant 11 : index
    %c0_162 = arith.constant 0 : index
    %159 = vector.load %arg18[%c11_161, %c0_162] : memref<80x32xf32, #tpu.memory_space<vmem>>, vector<1x32xf32>
    %160 = arith.maximumf %158, %159 : vector<1x32xf32>
    %161 = arith.maximumf %157, %160 : vector<1x32xf32>
    %c0_163 = arith.constant 0 : index
    %c0_164 = arith.constant 0 : index
    %c0_165 = arith.constant 0 : index
    %162 = vector.load %arg8[%c0_163, %c0_164, %c0_165] : memref<16x32x32xf32, #tpu.memory_space<vmem>>, vector<1x32x32xf32>
    %163 = vector.shape_cast %162 : vector<1x32x32xf32> to vector<32x32xf32>
    %164 = vector.broadcast %161 : vector<1x32xf32> to vector<32x32xf32>
    %165 = arith.mulf %163, %164 : vector<32x32xf32>
    %166 = arith.addf %154, %165 : vector<32x32xf32>
    %c2_166 = arith.constant 2 : index
    %c0_167 = arith.constant 0 : index
    %167 = vector.load %arg18[%c2_166, %c0_167] : memref<80x32xf32, #tpu.memory_space<vmem>>, vector<1x32xf32>
    %c3_168 = arith.constant 3 : index
    %c0_169 = arith.constant 0 : index
    %168 = vector.load %arg18[%c3_168, %c0_169] : memref<80x32xf32, #tpu.memory_space<vmem>>, vector<1x32xf32>
    %169 = arith.maximumf %167, %168 : vector<1x32xf32>
    %c12_170 = arith.constant 12 : index
    %c0_171 = arith.constant 0 : index
    %170 = vector.load %arg18[%c12_170, %c0_171] : memref<80x32xf32, #tpu.memory_space<vmem>>, vector<1x32xf32>
    %c13 = arith.constant 13 : index
    %c0_172 = arith.constant 0 : index
    %171 = vector.load %arg18[%c13, %c0_172] : memref<80x32xf32, #tpu.memory_space<vmem>>, vector<1x32xf32>
    %172 = arith.maximumf %170, %171 : vector<1x32xf32>
    %173 = arith.maximumf %169, %172 : vector<1x32xf32>
    %c1_173 = arith.constant 1 : index
    %c0_174 = arith.constant 0 : index
    %c0_175 = arith.constant 0 : index
    %174 = vector.load %arg8[%c1_173, %c0_174, %c0_175] : memref<16x32x32xf32, #tpu.memory_space<vmem>>, vector<1x32x32xf32>
    %175 = vector.shape_cast %174 : vector<1x32x32xf32> to vector<32x32xf32>
    %176 = vector.broadcast %173 : vector<1x32xf32> to vector<32x32xf32>
    %177 = arith.mulf %175, %176 : vector<32x32xf32>
    %178 = arith.addf %166, %177 : vector<32x32xf32>
    %c4_176 = arith.constant 4 : index
    %c0_177 = arith.constant 0 : index
    %179 = vector.load %arg18[%c4_176, %c0_177] : memref<80x32xf32, #tpu.memory_space<vmem>>, vector<1x32xf32>
    %c5_178 = arith.constant 5 : index
    %c0_179 = arith.constant 0 : index
    %180 = vector.load %arg18[%c5_178, %c0_179] : memref<80x32xf32, #tpu.memory_space<vmem>>, vector<1x32xf32>
    %181 = arith.maximumf %179, %180 : vector<1x32xf32>
    %c14 = arith.constant 14 : index
    %c0_180 = arith.constant 0 : index
    %182 = vector.load %arg18[%c14, %c0_180] : memref<80x32xf32, #tpu.memory_space<vmem>>, vector<1x32xf32>
    %c15 = arith.constant 15 : index
    %c0_181 = arith.constant 0 : index
    %183 = vector.load %arg18[%c15, %c0_181] : memref<80x32xf32, #tpu.memory_space<vmem>>, vector<1x32xf32>
    %184 = arith.maximumf %182, %183 : vector<1x32xf32>
    %185 = arith.maximumf %181, %184 : vector<1x32xf32>
    %c2_182 = arith.constant 2 : index
    %c0_183 = arith.constant 0 : index
    %c0_184 = arith.constant 0 : index
    %186 = vector.load %arg8[%c2_182, %c0_183, %c0_184] : memref<16x32x32xf32, #tpu.memory_space<vmem>>, vector<1x32x32xf32>
    %187 = vector.shape_cast %186 : vector<1x32x32xf32> to vector<32x32xf32>
    %188 = vector.broadcast %185 : vector<1x32xf32> to vector<32x32xf32>
    %189 = arith.mulf %187, %188 : vector<32x32xf32>
    %190 = arith.addf %178, %189 : vector<32x32xf32>
    %c6_185 = arith.constant 6 : index
    %c0_186 = arith.constant 0 : index
    %191 = vector.load %arg18[%c6_185, %c0_186] : memref<80x32xf32, #tpu.memory_space<vmem>>, vector<1x32xf32>
    %c7_187 = arith.constant 7 : index
    %c0_188 = arith.constant 0 : index
    %192 = vector.load %arg18[%c7_187, %c0_188] : memref<80x32xf32, #tpu.memory_space<vmem>>, vector<1x32xf32>
    %193 = arith.maximumf %191, %192 : vector<1x32xf32>
    %c16_189 = arith.constant 16 : index
    %c0_190 = arith.constant 0 : index
    %194 = vector.load %arg18[%c16_189, %c0_190] : memref<80x32xf32, #tpu.memory_space<vmem>>, vector<1x32xf32>
    %c17 = arith.constant 17 : index
    %c0_191 = arith.constant 0 : index
    %195 = vector.load %arg18[%c17, %c0_191] : memref<80x32xf32, #tpu.memory_space<vmem>>, vector<1x32xf32>
    %196 = arith.maximumf %194, %195 : vector<1x32xf32>
    %197 = arith.maximumf %193, %196 : vector<1x32xf32>
    %c3_192 = arith.constant 3 : index
    %c0_193 = arith.constant 0 : index
    %c0_194 = arith.constant 0 : index
    %198 = vector.load %arg8[%c3_192, %c0_193, %c0_194] : memref<16x32x32xf32, #tpu.memory_space<vmem>>, vector<1x32x32xf32>
    %199 = vector.shape_cast %198 : vector<1x32x32xf32> to vector<32x32xf32>
    %200 = vector.broadcast %197 : vector<1x32xf32> to vector<32x32xf32>
    %201 = arith.mulf %199, %200 : vector<32x32xf32>
    %202 = arith.addf %190, %201 : vector<32x32xf32>
    %c20_195 = arith.constant 20 : index
    %c0_196 = arith.constant 0 : index
    %203 = vector.load %arg18[%c20_195, %c0_196] : memref<80x32xf32, #tpu.memory_space<vmem>>, vector<1x32xf32>
    %c21_197 = arith.constant 21 : index
    %c0_198 = arith.constant 0 : index
    %204 = vector.load %arg18[%c21_197, %c0_198] : memref<80x32xf32, #tpu.memory_space<vmem>>, vector<1x32xf32>
    %205 = arith.maximumf %203, %204 : vector<1x32xf32>
    %c30 = arith.constant 30 : index
    %c0_199 = arith.constant 0 : index
    %206 = vector.load %arg18[%c30, %c0_199] : memref<80x32xf32, #tpu.memory_space<vmem>>, vector<1x32xf32>
    %c31 = arith.constant 31 : index
    %c0_200 = arith.constant 0 : index
    %207 = vector.load %arg18[%c31, %c0_200] : memref<80x32xf32, #tpu.memory_space<vmem>>, vector<1x32xf32>
    %208 = arith.maximumf %206, %207 : vector<1x32xf32>
    %209 = arith.maximumf %205, %208 : vector<1x32xf32>
    %c4_201 = arith.constant 4 : index
    %c0_202 = arith.constant 0 : index
    %c0_203 = arith.constant 0 : index
    %210 = vector.load %arg8[%c4_201, %c0_202, %c0_203] : memref<16x32x32xf32, #tpu.memory_space<vmem>>, vector<1x32x32xf32>
    %211 = vector.shape_cast %210 : vector<1x32x32xf32> to vector<32x32xf32>
    %212 = vector.broadcast %209 : vector<1x32xf32> to vector<32x32xf32>
    %213 = arith.mulf %211, %212 : vector<32x32xf32>
    %214 = arith.addf %202, %213 : vector<32x32xf32>
    %c22_204 = arith.constant 22 : index
    %c0_205 = arith.constant 0 : index
    %215 = vector.load %arg18[%c22_204, %c0_205] : memref<80x32xf32, #tpu.memory_space<vmem>>, vector<1x32xf32>
    %c23 = arith.constant 23 : index
    %c0_206 = arith.constant 0 : index
    %216 = vector.load %arg18[%c23, %c0_206] : memref<80x32xf32, #tpu.memory_space<vmem>>, vector<1x32xf32>
    %217 = arith.maximumf %215, %216 : vector<1x32xf32>
    %c32_207 = arith.constant 32 : index
    %c0_208 = arith.constant 0 : index
    %218 = vector.load %arg18[%c32_207, %c0_208] : memref<80x32xf32, #tpu.memory_space<vmem>>, vector<1x32xf32>
    %c33 = arith.constant 33 : index
    %c0_209 = arith.constant 0 : index
    %219 = vector.load %arg18[%c33, %c0_209] : memref<80x32xf32, #tpu.memory_space<vmem>>, vector<1x32xf32>
    %220 = arith.maximumf %218, %219 : vector<1x32xf32>
    %221 = arith.maximumf %217, %220 : vector<1x32xf32>
    %c5_210 = arith.constant 5 : index
    %c0_211 = arith.constant 0 : index
    %c0_212 = arith.constant 0 : index
    %222 = vector.load %arg8[%c5_210, %c0_211, %c0_212] : memref<16x32x32xf32, #tpu.memory_space<vmem>>, vector<1x32x32xf32>
    %223 = vector.shape_cast %222 : vector<1x32x32xf32> to vector<32x32xf32>
    %224 = vector.broadcast %221 : vector<1x32xf32> to vector<32x32xf32>
    %225 = arith.mulf %223, %224 : vector<32x32xf32>
    %226 = arith.addf %214, %225 : vector<32x32xf32>
    %c24 = arith.constant 24 : index
    %c0_213 = arith.constant 0 : index
    %227 = vector.load %arg18[%c24, %c0_213] : memref<80x32xf32, #tpu.memory_space<vmem>>, vector<1x32xf32>
    %c25 = arith.constant 25 : index
    %c0_214 = arith.constant 0 : index
    %228 = vector.load %arg18[%c25, %c0_214] : memref<80x32xf32, #tpu.memory_space<vmem>>, vector<1x32xf32>
    %229 = arith.maximumf %227, %228 : vector<1x32xf32>
    %c34 = arith.constant 34 : index
    %c0_215 = arith.constant 0 : index
    %230 = vector.load %arg18[%c34, %c0_215] : memref<80x32xf32, #tpu.memory_space<vmem>>, vector<1x32xf32>
    %c35 = arith.constant 35 : index
    %c0_216 = arith.constant 0 : index
    %231 = vector.load %arg18[%c35, %c0_216] : memref<80x32xf32, #tpu.memory_space<vmem>>, vector<1x32xf32>
    %232 = arith.maximumf %230, %231 : vector<1x32xf32>
    %233 = arith.maximumf %229, %232 : vector<1x32xf32>
    %c6_217 = arith.constant 6 : index
    %c0_218 = arith.constant 0 : index
    %c0_219 = arith.constant 0 : index
    %234 = vector.load %arg8[%c6_217, %c0_218, %c0_219] : memref<16x32x32xf32, #tpu.memory_space<vmem>>, vector<1x32x32xf32>
    %235 = vector.shape_cast %234 : vector<1x32x32xf32> to vector<32x32xf32>
    %236 = vector.broadcast %233 : vector<1x32xf32> to vector<32x32xf32>
    %237 = arith.mulf %235, %236 : vector<32x32xf32>
    %238 = arith.addf %226, %237 : vector<32x32xf32>
    %c26 = arith.constant 26 : index
    %c0_220 = arith.constant 0 : index
    %239 = vector.load %arg18[%c26, %c0_220] : memref<80x32xf32, #tpu.memory_space<vmem>>, vector<1x32xf32>
    %c27 = arith.constant 27 : index
    %c0_221 = arith.constant 0 : index
    %240 = vector.load %arg18[%c27, %c0_221] : memref<80x32xf32, #tpu.memory_space<vmem>>, vector<1x32xf32>
    %241 = arith.maximumf %239, %240 : vector<1x32xf32>
    %c36_222 = arith.constant 36 : index
    %c0_223 = arith.constant 0 : index
    %242 = vector.load %arg18[%c36_222, %c0_223] : memref<80x32xf32, #tpu.memory_space<vmem>>, vector<1x32xf32>
    %c37_224 = arith.constant 37 : index
    %c0_225 = arith.constant 0 : index
    %243 = vector.load %arg18[%c37_224, %c0_225] : memref<80x32xf32, #tpu.memory_space<vmem>>, vector<1x32xf32>
    %244 = arith.maximumf %242, %243 : vector<1x32xf32>
    %245 = arith.maximumf %241, %244 : vector<1x32xf32>
    %c7_226 = arith.constant 7 : index
    %c0_227 = arith.constant 0 : index
    %c0_228 = arith.constant 0 : index
    %246 = vector.load %arg8[%c7_226, %c0_227, %c0_228] : memref<16x32x32xf32, #tpu.memory_space<vmem>>, vector<1x32x32xf32>
    %247 = vector.shape_cast %246 : vector<1x32x32xf32> to vector<32x32xf32>
    %248 = vector.broadcast %245 : vector<1x32xf32> to vector<32x32xf32>
    %249 = arith.mulf %247, %248 : vector<32x32xf32>
    %250 = arith.addf %238, %249 : vector<32x32xf32>
    %c40 = arith.constant 40 : index
    %c0_229 = arith.constant 0 : index
    %251 = vector.load %arg18[%c40, %c0_229] : memref<80x32xf32, #tpu.memory_space<vmem>>, vector<1x32xf32>
    %c41 = arith.constant 41 : index
    %c0_230 = arith.constant 0 : index
    %252 = vector.load %arg18[%c41, %c0_230] : memref<80x32xf32, #tpu.memory_space<vmem>>, vector<1x32xf32>
    %253 = arith.maximumf %251, %252 : vector<1x32xf32>
    %c50 = arith.constant 50 : index
    %c0_231 = arith.constant 0 : index
    %254 = vector.load %arg18[%c50, %c0_231] : memref<80x32xf32, #tpu.memory_space<vmem>>, vector<1x32xf32>
    %c51 = arith.constant 51 : index
    %c0_232 = arith.constant 0 : index
    %255 = vector.load %arg18[%c51, %c0_232] : memref<80x32xf32, #tpu.memory_space<vmem>>, vector<1x32xf32>
    %256 = arith.maximumf %254, %255 : vector<1x32xf32>
    %257 = arith.maximumf %253, %256 : vector<1x32xf32>
    %c8_233 = arith.constant 8 : index
    %c0_234 = arith.constant 0 : index
    %c0_235 = arith.constant 0 : index
    %258 = vector.load %arg8[%c8_233, %c0_234, %c0_235] : memref<16x32x32xf32, #tpu.memory_space<vmem>>, vector<1x32x32xf32>
    %259 = vector.shape_cast %258 : vector<1x32x32xf32> to vector<32x32xf32>
    %260 = vector.broadcast %257 : vector<1x32xf32> to vector<32x32xf32>
    %261 = arith.mulf %259, %260 : vector<32x32xf32>
    %262 = arith.addf %250, %261 : vector<32x32xf32>
    %c42 = arith.constant 42 : index
    %c0_236 = arith.constant 0 : index
    %263 = vector.load %arg18[%c42, %c0_236] : memref<80x32xf32, #tpu.memory_space<vmem>>, vector<1x32xf32>
    %c43 = arith.constant 43 : index
    %c0_237 = arith.constant 0 : index
    %264 = vector.load %arg18[%c43, %c0_237] : memref<80x32xf32, #tpu.memory_space<vmem>>, vector<1x32xf32>
    %265 = arith.maximumf %263, %264 : vector<1x32xf32>
    %c52 = arith.constant 52 : index
    %c0_238 = arith.constant 0 : index
    %266 = vector.load %arg18[%c52, %c0_238] : memref<80x32xf32, #tpu.memory_space<vmem>>, vector<1x32xf32>
    %c53 = arith.constant 53 : index
    %c0_239 = arith.constant 0 : index
    %267 = vector.load %arg18[%c53, %c0_239] : memref<80x32xf32, #tpu.memory_space<vmem>>, vector<1x32xf32>
    %268 = arith.maximumf %266, %267 : vector<1x32xf32>
    %269 = arith.maximumf %265, %268 : vector<1x32xf32>
    %c9 = arith.constant 9 : index
    %c0_240 = arith.constant 0 : index
    %c0_241 = arith.constant 0 : index
    %270 = vector.load %arg8[%c9, %c0_240, %c0_241] : memref<16x32x32xf32, #tpu.memory_space<vmem>>, vector<1x32x32xf32>
    %271 = vector.shape_cast %270 : vector<1x32x32xf32> to vector<32x32xf32>
    %272 = vector.broadcast %269 : vector<1x32xf32> to vector<32x32xf32>
    %273 = arith.mulf %271, %272 : vector<32x32xf32>
    %274 = arith.addf %262, %273 : vector<32x32xf32>
    %c44 = arith.constant 44 : index
    %c0_242 = arith.constant 0 : index
    %275 = vector.load %arg18[%c44, %c0_242] : memref<80x32xf32, #tpu.memory_space<vmem>>, vector<1x32xf32>
    %c45 = arith.constant 45 : index
    %c0_243 = arith.constant 0 : index
    %276 = vector.load %arg18[%c45, %c0_243] : memref<80x32xf32, #tpu.memory_space<vmem>>, vector<1x32xf32>
    %277 = arith.maximumf %275, %276 : vector<1x32xf32>
    %c54 = arith.constant 54 : index
    %c0_244 = arith.constant 0 : index
    %278 = vector.load %arg18[%c54, %c0_244] : memref<80x32xf32, #tpu.memory_space<vmem>>, vector<1x32xf32>
    %c55_245 = arith.constant 55 : index
    %c0_246 = arith.constant 0 : index
    %279 = vector.load %arg18[%c55_245, %c0_246] : memref<80x32xf32, #tpu.memory_space<vmem>>, vector<1x32xf32>
    %280 = arith.maximumf %278, %279 : vector<1x32xf32>
    %281 = arith.maximumf %277, %280 : vector<1x32xf32>
    %c10_247 = arith.constant 10 : index
    %c0_248 = arith.constant 0 : index
    %c0_249 = arith.constant 0 : index
    %282 = vector.load %arg8[%c10_247, %c0_248, %c0_249] : memref<16x32x32xf32, #tpu.memory_space<vmem>>, vector<1x32x32xf32>
    %283 = vector.shape_cast %282 : vector<1x32x32xf32> to vector<32x32xf32>
    %284 = vector.broadcast %281 : vector<1x32xf32> to vector<32x32xf32>
    %285 = arith.mulf %283, %284 : vector<32x32xf32>
    %286 = arith.addf %274, %285 : vector<32x32xf32>
    %c46 = arith.constant 46 : index
    %c0_250 = arith.constant 0 : index
    %287 = vector.load %arg18[%c46, %c0_250] : memref<80x32xf32, #tpu.memory_space<vmem>>, vector<1x32xf32>
    %c47 = arith.constant 47 : index
    %c0_251 = arith.constant 0 : index
    %288 = vector.load %arg18[%c47, %c0_251] : memref<80x32xf32, #tpu.memory_space<vmem>>, vector<1x32xf32>
    %289 = arith.maximumf %287, %288 : vector<1x32xf32>
    %c56 = arith.constant 56 : index
    %c0_252 = arith.constant 0 : index
    %290 = vector.load %arg18[%c56, %c0_252] : memref<80x32xf32, #tpu.memory_space<vmem>>, vector<1x32xf32>
    %c57 = arith.constant 57 : index
    %c0_253 = arith.constant 0 : index
    %291 = vector.load %arg18[%c57, %c0_253] : memref<80x32xf32, #tpu.memory_space<vmem>>, vector<1x32xf32>
    %292 = arith.maximumf %290, %291 : vector<1x32xf32>
    %293 = arith.maximumf %289, %292 : vector<1x32xf32>
    %c11_254 = arith.constant 11 : index
    %c0_255 = arith.constant 0 : index
    %c0_256 = arith.constant 0 : index
    %294 = vector.load %arg8[%c11_254, %c0_255, %c0_256] : memref<16x32x32xf32, #tpu.memory_space<vmem>>, vector<1x32x32xf32>
    %295 = vector.shape_cast %294 : vector<1x32x32xf32> to vector<32x32xf32>
    %296 = vector.broadcast %293 : vector<1x32xf32> to vector<32x32xf32>
    %297 = arith.mulf %295, %296 : vector<32x32xf32>
    %298 = arith.addf %286, %297 : vector<32x32xf32>
    %c60 = arith.constant 60 : index
    %c0_257 = arith.constant 0 : index
    %299 = vector.load %arg18[%c60, %c0_257] : memref<80x32xf32, #tpu.memory_space<vmem>>, vector<1x32xf32>
    %c61 = arith.constant 61 : index
    %c0_258 = arith.constant 0 : index
    %300 = vector.load %arg18[%c61, %c0_258] : memref<80x32xf32, #tpu.memory_space<vmem>>, vector<1x32xf32>
    %301 = arith.maximumf %299, %300 : vector<1x32xf32>
    %c70 = arith.constant 70 : index
    %c0_259 = arith.constant 0 : index
    %302 = vector.load %arg18[%c70, %c0_259] : memref<80x32xf32, #tpu.memory_space<vmem>>, vector<1x32xf32>
    %c71 = arith.constant 71 : index
    %c0_260 = arith.constant 0 : index
    %303 = vector.load %arg18[%c71, %c0_260] : memref<80x32xf32, #tpu.memory_space<vmem>>, vector<1x32xf32>
    %304 = arith.maximumf %302, %303 : vector<1x32xf32>
    %305 = arith.maximumf %301, %304 : vector<1x32xf32>
    %c12_261 = arith.constant 12 : index
    %c0_262 = arith.constant 0 : index
    %c0_263 = arith.constant 0 : index
    %306 = vector.load %arg8[%c12_261, %c0_262, %c0_263] : memref<16x32x32xf32, #tpu.memory_space<vmem>>, vector<1x32x32xf32>
    %307 = vector.shape_cast %306 : vector<1x32x32xf32> to vector<32x32xf32>
    %308 = vector.broadcast %305 : vector<1x32xf32> to vector<32x32xf32>
    %309 = arith.mulf %307, %308 : vector<32x32xf32>
    %310 = arith.addf %298, %309 : vector<32x32xf32>
    %c62 = arith.constant 62 : index
    %c0_264 = arith.constant 0 : index
    %311 = vector.load %arg18[%c62, %c0_264] : memref<80x32xf32, #tpu.memory_space<vmem>>, vector<1x32xf32>
    %c63 = arith.constant 63 : index
    %c0_265 = arith.constant 0 : index
    %312 = vector.load %arg18[%c63, %c0_265] : memref<80x32xf32, #tpu.memory_space<vmem>>, vector<1x32xf32>
    %313 = arith.maximumf %311, %312 : vector<1x32xf32>
    %c72 = arith.constant 72 : index
    %c0_266 = arith.constant 0 : index
    %314 = vector.load %arg18[%c72, %c0_266] : memref<80x32xf32, #tpu.memory_space<vmem>>, vector<1x32xf32>
    %c73_267 = arith.constant 73 : index
    %c0_268 = arith.constant 0 : index
    %315 = vector.load %arg18[%c73_267, %c0_268] : memref<80x32xf32, #tpu.memory_space<vmem>>, vector<1x32xf32>
    %316 = arith.maximumf %314, %315 : vector<1x32xf32>
    %317 = arith.maximumf %313, %316 : vector<1x32xf32>
    %c13_269 = arith.constant 13 : index
    %c0_270 = arith.constant 0 : index
    %c0_271 = arith.constant 0 : index
    %318 = vector.load %arg8[%c13_269, %c0_270, %c0_271] : memref<16x32x32xf32, #tpu.memory_space<vmem>>, vector<1x32x32xf32>
    %319 = vector.shape_cast %318 : vector<1x32x32xf32> to vector<32x32xf32>
    %320 = vector.broadcast %317 : vector<1x32xf32> to vector<32x32xf32>
    %321 = arith.mulf %319, %320 : vector<32x32xf32>
    %322 = arith.addf %310, %321 : vector<32x32xf32>
    %c64_272 = arith.constant 64 : index
    %c0_273 = arith.constant 0 : index
    %323 = vector.load %arg18[%c64_272, %c0_273] : memref<80x32xf32, #tpu.memory_space<vmem>>, vector<1x32xf32>
    %c65 = arith.constant 65 : index
    %c0_274 = arith.constant 0 : index
    %324 = vector.load %arg18[%c65, %c0_274] : memref<80x32xf32, #tpu.memory_space<vmem>>, vector<1x32xf32>
    %325 = arith.maximumf %323, %324 : vector<1x32xf32>
    %c74 = arith.constant 74 : index
    %c0_275 = arith.constant 0 : index
    %326 = vector.load %arg18[%c74, %c0_275] : memref<80x32xf32, #tpu.memory_space<vmem>>, vector<1x32xf32>
    %c75 = arith.constant 75 : index
    %c0_276 = arith.constant 0 : index
    %327 = vector.load %arg18[%c75, %c0_276] : memref<80x32xf32, #tpu.memory_space<vmem>>, vector<1x32xf32>
    %328 = arith.maximumf %326, %327 : vector<1x32xf32>
    %329 = arith.maximumf %325, %328 : vector<1x32xf32>
    %c14_277 = arith.constant 14 : index
    %c0_278 = arith.constant 0 : index
    %c0_279 = arith.constant 0 : index
    %330 = vector.load %arg8[%c14_277, %c0_278, %c0_279] : memref<16x32x32xf32, #tpu.memory_space<vmem>>, vector<1x32x32xf32>
    %331 = vector.shape_cast %330 : vector<1x32x32xf32> to vector<32x32xf32>
    %332 = vector.broadcast %329 : vector<1x32xf32> to vector<32x32xf32>
    %333 = arith.mulf %331, %332 : vector<32x32xf32>
    %334 = arith.addf %322, %333 : vector<32x32xf32>
    %c66 = arith.constant 66 : index
    %c0_280 = arith.constant 0 : index
    %335 = vector.load %arg18[%c66, %c0_280] : memref<80x32xf32, #tpu.memory_space<vmem>>, vector<1x32xf32>
    %c67 = arith.constant 67 : index
    %c0_281 = arith.constant 0 : index
    %336 = vector.load %arg18[%c67, %c0_281] : memref<80x32xf32, #tpu.memory_space<vmem>>, vector<1x32xf32>
    %337 = arith.maximumf %335, %336 : vector<1x32xf32>
    %c76 = arith.constant 76 : index
    %c0_282 = arith.constant 0 : index
    %338 = vector.load %arg18[%c76, %c0_282] : memref<80x32xf32, #tpu.memory_space<vmem>>, vector<1x32xf32>
    %c77 = arith.constant 77 : index
    %c0_283 = arith.constant 0 : index
    %339 = vector.load %arg18[%c77, %c0_283] : memref<80x32xf32, #tpu.memory_space<vmem>>, vector<1x32xf32>
    %340 = arith.maximumf %338, %339 : vector<1x32xf32>
    %341 = arith.maximumf %337, %340 : vector<1x32xf32>
    %c15_284 = arith.constant 15 : index
    %c0_285 = arith.constant 0 : index
    %c0_286 = arith.constant 0 : index
    %342 = vector.load %arg8[%c15_284, %c0_285, %c0_286] : memref<16x32x32xf32, #tpu.memory_space<vmem>>, vector<1x32x32xf32>
    %343 = vector.shape_cast %342 : vector<1x32x32xf32> to vector<32x32xf32>
    %344 = vector.broadcast %341 : vector<1x32xf32> to vector<32x32xf32>
    %345 = arith.mulf %343, %344 : vector<32x32xf32>
    %346 = arith.addf %334, %345 : vector<32x32xf32>
    %c0_287 = arith.constant 0 : index
    %c0_288 = arith.constant 0 : index
    %347 = vector.load %arg9[%c0_287, %c0_288] : memref<2x32xf32, #tpu.memory_space<vmem>>, vector<1x32xf32>
    %348 = vector.broadcast %347 : vector<1x32xf32> to vector<32x32xf32>
    %349 = arith.mulf %346, %348 : vector<32x32xf32>
    %cst_289 = arith.constant dense<0.000000e+00> : vector<32xf32>
    %350 = vector.multi_reduction <add>, %349, %cst_289 [1] : vector<32x32xf32> to vector<32xf32>
    %351 = vector.shape_cast %350 : vector<32xf32> to vector<32x1xf32>
    %c0_290 = arith.constant 0 : index
    %c0_291 = arith.constant 0 : index
    %352 = vector.load %arg10[%c0_290, %c0_291] : memref<32x1xf32, #tpu.memory_space<vmem>>, vector<32x1xf32>
    %353 = arith.mulf %351, %352 : vector<32x1xf32>
    %c0_292 = arith.constant 0 : index
    %c0_293 = arith.constant 0 : index
    %354 = vector.load %arg11[%c0_292, %c0_293] : memref<32x1xf32, #tpu.memory_space<vmem>>, vector<32x1xf32>
    %355 = arith.addf %353, %354 : vector<32x1xf32>
    %cst_294 = arith.constant 0.000000e+00 : f32
    %356 = vector.broadcast %cst_294 : f32 to vector<32x1xf32>
    %357 = arith.maximumf %355, %356 : vector<32x1xf32>
    %c0_295 = arith.constant 0 : index
    %c0_296 = arith.constant 0 : index
    %358 = vector.load %arg12[%c0_295, %c0_296] : memref<32x10xf32, #tpu.memory_space<vmem>>, vector<32x10xf32>
    %359 = vector.broadcast %357 : vector<32x1xf32> to vector<32x10xf32>
    %360 = arith.mulf %359, %358 : vector<32x10xf32>
    %cst_297 = arith.constant dense<0.000000e+00> : vector<10xf32>
    %361 = vector.multi_reduction <add>, %360, %cst_297 [0] : vector<32x10xf32> to vector<10xf32>
    %362 = vector.shape_cast %361 : vector<10xf32> to vector<1x10xf32>
    %c0_298 = arith.constant 0 : index
    %c0_299 = arith.constant 0 : index
    %363 = vector.load %arg13[%c0_298, %c0_299] : memref<1x10xf32, #tpu.memory_space<vmem>>, vector<1x10xf32>
    %364 = arith.addf %362, %363 : vector<1x10xf32>
    %c0_300 = arith.constant 0 : index
    %c0_301 = arith.constant 0 : index
    %365 = vector.load %arg14[%c0_300, %c0_301] : memref<2x10xf32, #tpu.memory_space<vmem>>, vector<1x10xf32>
    tpu.vector_store %arg14[%c0_300, %c0_301], %364 {strides = array<i32>} : memref<2x10xf32, #tpu.memory_space<vmem>>, vector<1x10xf32>,
    %c1_302 = arith.constant 1 : index
    %c0_303 = arith.constant 0 : index
    %366 = vector.load %arg9[%c1_302, %c0_303] : memref<2x32xf32, #tpu.memory_space<vmem>>, vector<1x32xf32>
    %367 = vector.broadcast %366 : vector<1x32xf32> to vector<32x32xf32>
    %368 = arith.mulf %346, %367 : vector<32x32xf32>
    %cst_304 = arith.constant dense<0.000000e+00> : vector<32xf32>
    %369 = vector.multi_reduction <add>, %368, %cst_304 [1] : vector<32x32xf32> to vector<32xf32>
    %370 = vector.shape_cast %369 : vector<32xf32> to vector<32x1xf32>
    %c0_305 = arith.constant 0 : index
    %c0_306 = arith.constant 0 : index
    %371 = vector.load %arg10[%c0_305, %c0_306] : memref<32x1xf32, #tpu.memory_space<vmem>>, vector<32x1xf32>
    %372 = arith.mulf %370, %371 : vector<32x1xf32>
    %c0_307 = arith.constant 0 : index
    %c0_308 = arith.constant 0 : index
    %373 = vector.load %arg11[%c0_307, %c0_308] : memref<32x1xf32, #tpu.memory_space<vmem>>, vector<32x1xf32>
    %374 = arith.addf %372, %373 : vector<32x1xf32>
    %cst_309 = arith.constant 0.000000e+00 : f32
    %375 = vector.broadcast %cst_309 : f32 to vector<32x1xf32>
    %376 = arith.maximumf %374, %375 : vector<32x1xf32>
    %c0_310 = arith.constant 0 : index
    %c0_311 = arith.constant 0 : index
    %377 = vector.load %arg12[%c0_310, %c0_311] : memref<32x10xf32, #tpu.memory_space<vmem>>, vector<32x10xf32>
    %378 = vector.broadcast %376 : vector<32x1xf32> to vector<32x10xf32>
    %379 = arith.mulf %378, %377 : vector<32x10xf32>
    %cst_312 = arith.constant dense<0.000000e+00> : vector<10xf32>
    %380 = vector.multi_reduction <add>, %379, %cst_312 [0] : vector<32x10xf32> to vector<10xf32>
    %381 = vector.shape_cast %380 : vector<10xf32> to vector<1x10xf32>
    %c0_313 = arith.constant 0 : index
    %c0_314 = arith.constant 0 : index
    %382 = vector.load %arg13[%c0_313, %c0_314] : memref<1x10xf32, #tpu.memory_space<vmem>>, vector<1x10xf32>
    %383 = arith.addf %381, %382 : vector<1x10xf32>
    %c1_315 = arith.constant 1 : index
    %c0_316 = arith.constant 0 : index
    %384 = vector.load %arg14[%c1_315, %c0_316] : memref<2x10xf32, #tpu.memory_space<vmem>>, vector<1x10xf32>
    tpu.vector_store %arg14[%c1_315, %c0_316], %383 {strides = array<i32>} : memref<2x10xf32, #tpu.memory_space<vmem>>, vector<1x10xf32>,
    return
  }
}

</mosaic_0001>

<bundles_post_ra>
// kernel: cnn_forward.1
= control target key start
LH: loop header
LB: loop body
LE: loop exit
PB: predicated region body
PF: predicated region fallthrough
CT: control target
= control target key end

     0   :  { %vm48_vm0 = vcmask 64512   ;;  %v5499_v3 = vmov 0.0   ;;  %s7345_s0 = inlined_call_operand.vmem [shape: f32[256,8], index: 0, kind: input, shape index: {}]   ;;  %s7346_s1 = inlined_call_operand.vmem [shape: f32[9,8,16], index: 1, kind: input, shape index: {}]   ;;  %s7347_s2 = inlined_call_operand.vmem [shape: f32[1,16], index: 2, kind: input, shape index: {}]   ;;  %s7348_s3 = inlined_call_operand.vmem [shape: f32[1,16], index: 3, kind: input, shape index: {}]   ;;  %s7349_s4 = inlined_call_operand.vmem [shape: f32[104,268], index: 4, kind: input, shape index: {}]   ;;  %s7350_s5 = inlined_call_operand.vmem [shape: f32[9,16,32], index: 5, kind: input, shape index: {}]   ;;  %s7351_s6 = inlined_call_operand.vmem [shape: f32[1,32], index: 6, kind: input, shape index: {}]   ;;  %s7352_s7 = inlined_call_operand.vmem [shape: f32[1,32], index: 7, kind: input, shape index: {}]   ;;  %s7353_s8 = inlined_call_operand.vmem [shape: f32[16,32,32], index: 8, kind: input, shape index: {}]   ;;  %s7354_s9 = inlined_call_operand.vmem [shape: f32[2,32], index: 9, kind: input, shape index: {}]   ;;  %s7355_s10 = inlined_call_operand.vmem [shape: f32[32,1], index: 10, kind: input, shape index: {}]   ;;  %s7356_s11 = inlined_call_operand.vmem [shape: f32[32,1], index: 11, kind: input, shape index: {}]   ;;  %s7357_s12 = inlined_call_operand.vmem [shape: f32[32,10], index: 12, kind: input, shape index: {}]   ;;  %s7358_s13 = inlined_call_operand.vmem [shape: f32[1,10], index: 13, kind: input, shape index: {}]   ;;  %s7359_s14 = inlined_call_operand.hbm [shape: f32[2,10], index: 14, kind: output, shape index: {}]  }
   0x1   :  { %v4944_v0 = vld [vmem:[%s7346_s1 + $0x8] sm:$0xff]  ;;  %v5017_v1 = vld [vmem:[%s7346_s1 + $0x10] sm:$0xff]  ;;  %v5586_v2 = vld [vmem:[%s7346_s1 + $0x18] sm:$0xff]  ;;  %49 = vst.msk [vmem:[#allocation2] sm:$0xff] %vm48_vm0, %v5499_v3 }
   0x2   :  { %352 = vmatpush.msra.mxu0 %v4944_v0  ;;  %5457 = vmatpush.msra.mxu2 %v5017_v1  ;;  %50 = vst.msk [vmem:[#allocation2 + $0x8] sm:$0xff] %vm48_vm0, %v5499_v3 }
   0x3   :  { %5458 = vmatpush.msra.mxu3 %v5586_v2  ;;  %51 = vst.msk [vmem:[#allocation2 + $0x10] sm:$0xff] %vm48_vm0, %v5499_v3 }
   0x4   :  { %52 = vst.msk [vmem:[#allocation2 + $0x18] sm:$0xff] %vm48_vm0, %v5499_v3 }
   0x5   :  { %19 = vsyncpa [#allocation7], 0  ;;  %53 = vst.msk [vmem:[#allocation2 + $0x20] sm:$0xff] %vm48_vm0, %v5499_v3  ;;  %v190_v6 = vld [vmem:[%s7346_s1] sm:$0xff]  ;;  %v91_v10 = vld [vmem:[%s7345_s0 + $0x8] sm:$0xff]  ;;  %vm2960_vm1 = vcmask 130048  }
   0x6   :  { %54 = vst.msk [vmem:[#allocation2 + $0x28] sm:$0xff] %vm48_vm0, %v5499_v3  ;;  %5456 = vmatpush.msra.mxu1 %v190_v6  ;;  %585 = vmatpush.msrb.mxu0 %v190_v6  ;;  %v90_v9 = vld [vmem:[%s7345_s0] sm:$0xff]  ;;  %v94_v11 = vld [vmem:[%s7345_s0 + $0x10] sm:$0xff]  ;;  %v95_v12 = vld [vmem:[%s7345_s0 + $0x18] sm:$0xff]  ;;  %vm3314_vm2 = vcmask 1043456   ;;  %vm3274_vm3 = vcmask 97280  }
   0x7   :  { %55 = vst.msk [vmem:[#allocation2 + $0x30] sm:$0xff] %vm48_vm0, %v5499_v3  ;;  %v98_v13 = vld [vmem:[%s7345_s0 + $0x20] sm:$0xff]  ;;  %v99_v14 = vld [vmem:[%s7345_s0 + $0x28] sm:$0xff]  ;;  %v102_v19 = vld [vmem:[%s7345_s0 + $0x30] sm:$0xff]  ;;  %vm4416_vm4 = vcmask 261120   ;;  %vm4828_vm5 = vcmask 80896  }
   0x8   :  { %56 = vst.msk [vmem:[#allocation2 + $0x38] sm:$0xff] %vm48_vm0, %v5499_v3  ;;  %v103_v23 = vld [vmem:[%s7345_s0 + $0x38] sm:$0xff]  ;;  %v106_v30 = vld [vmem:[%s7345_s0 + $0x40] sm:$0xff]  ;;  %v107_v34 = vld [vmem:[%s7345_s0 + $0x48] sm:$0xff]  ;;  %vm4844_vm6 = vcmask 73728   ;;  %s5501_s21 = smov [#allocation6]  }
   0x9   :  { %v191_v4 = vld [vmem:[#allocation2 + $0x1] sm:$0xff]  ;;  %57 = vst.msk [vmem:[#allocation2 + $0x40] sm:$0xff] %vm48_vm0, %v5499_v3  ;;  %v110_v38 = vld [vmem:[%s7345_s0 + $0x50] sm:$0xff]  ;;  %v111_v42 = vld [vmem:[%s7345_s0 + $0x58] sm:$0xff]  ;;  %s4935_s23 = sshll.u32 %s7359_s14, 4  ;;  %s4936_s23 = int_to_ptr.hbm [resolvable:$true] %s4935_s23 }
   0xa   :  { %4945 = vmatmul.msk.f32.vlgmr.msra.gmra.mxu0 %vm48_vm0, %v191_v4  ;;  %58 = vst.msk [vmem:[#allocation2 + $0x48] sm:$0xff] %vm48_vm0, %v5499_v3  ;;  %v696_v5 = vld [vmem:[#allocation2 + $0xa] sm:$0xff]  ;;  %v114_v46 = vld [vmem:[%s7345_s0 + $0x60] sm:$0xff]  ;;  %v119_v58 = vld [vmem:[%s7345_s0 + $0x78] sm:$0xff] }
   0xb   :  { %59 = vst.msk [vmem:[#allocation2 + $0x50] sm:$0xff] %vm48_vm0, %v5499_v3  ;;  %5019 = vmatmul.msk.f32.vlgmr.msra.gmra.mxu2 %vm48_vm0, %v696_v5  ;;  %v192_v7 = vld [vmem:[#allocation2 + $0x9] sm:$0xff]  ;;  %856 = vmatpush.msra.mxu0 %v5017_v1  ;;  %v122_v1 = vld [vmem:[%s7345_s0 + $0x80] sm:$0xff] }
   0xc   :  { %60 = vst.msk [vmem:[#allocation2 + $0x58] sm:$0xff] %vm48_vm0, %v5499_v3  ;;  %v155_v8 = vld [vmem:[#allocation2 + $0x8] sm:$0xff]  ;;  %v118_v54 = vld [vmem:[%s7345_s0 + $0x70] sm:$0xff] }
   0xd   :  { %61 = vst.msk [vmem:[#allocation2 + $0x60] sm:$0xff] %vm48_vm0, %v5499_v3  ;;  %4982 = vmatmul.msk.f32.vlgmr.msra.gmra.mxu1 %vm48_vm0, %v155_v8  ;;  %v115_v50 = vld [vmem:[%s7345_s0 + $0x68] sm:$0xff] }
   0xe   :  { %62 = vst.msk [vmem:[#allocation2 + $0x68] sm:$0xff] %vm48_vm0, %v5499_v3  ;;  %v123_v6 = vld [vmem:[%s7345_s0 + $0x88] sm:$0xff] }
   0xf   :  { %63 = vst.msk [vmem:[#allocation2 + $0x70] sm:$0xff] %vm48_vm0, %v5499_v3 }
  0x10   :  { %64 = vst.msk [vmem:[#allocation2 + $0x78] sm:$0xff] %vm48_vm0, %v5499_v3 }
  0x11   :  { %65 = vst.msk [vmem:[#allocation2 + $0x80] sm:$0xff] %vm48_vm0, %v5499_v3 }
  0x12   :  { %66 = vst.msk [vmem:[#allocation2 + $0x88] sm:$0xff] %vm48_vm0, %v5499_v3  ;;  %4946 = vmatmul.msk.f32.gmra.mxu0 %vm48_vm0, %v192_v7 }
  0x13   :  { %67 = vst.msk [vmem:[#allocation2 + $0x90] sm:$0xff] %vm48_vm0, %v5499_v3 }
  0x14   :  { %68 = vst.msk [vmem:[#allocation2 + $0x98] sm:$0xff] %vm48_vm0, %v5499_v3 }
  0x15   :  { %69 = vst.msk [vmem:[#allocation2 + $0xa0] sm:$0xff] %vm48_vm0, %v5499_v3 }
  0x16   :  { %70 = vst.msk [vmem:[#allocation2 + $0xa8] sm:$0xff] %vm48_vm0, %v5499_v3 }
  0x17   :  { %71 = vst.msk [vmem:[#allocation2 + $0xb0] sm:$0xff] %vm48_vm0, %v5499_v3 }
  0x18   :  { %72 = vst.msk [vmem:[#allocation2 + $0xb8] sm:$0xff] %vm48_vm0, %v5499_v3 }
  0x19   :  { %73 = vst.msk [vmem:[#allocation2 + $0xc0] sm:$0xff] %vm48_vm0, %v5499_v3 }
  0x1a   :  { %74 = vst.msk [vmem:[#allocation2 + $0xc8] sm:$0xff] %vm48_vm0, %v5499_v3 }
  0x1b   :  { %75 = vst.msk [vmem:[#allocation2 + $0xd0] sm:$0xff] %vm48_vm0, %v5499_v3 }
  0x1c   :  { %76 = vst.msk [vmem:[#allocation2 + $0xd8] sm:$0xff] %vm48_vm0, %v5499_v3 }
  0x1d   :  { %77 = vst.msk [vmem:[#allocation2 + $0xe0] sm:$0xff] %vm48_vm0, %v5499_v3 }
  0x1e   :  { %78 = vst.msk [vmem:[#allocation2 + $0xe8] sm:$0xff] %vm48_vm0, %v5499_v3 }
  0x1f   :  { %79 = vst.msk [vmem:[#allocation2 + $0xf0] sm:$0xff] %vm48_vm0, %v5499_v3 }
  0x20   :  { %80 = vst.msk [vmem:[#allocation2 + $0xf8] sm:$0xff] %vm48_vm0, %v5499_v3 }
  0x21   :  { %81 = vst.msk [vmem:[#allocation2 + $0x100] sm:$0xff] %vm48_vm0, %v5499_v3 }
  0x22   :  { %82 = vst.msk [vmem:[#allocation2 + $0x108] sm:$0xff] %vm48_vm0, %v5499_v3 }
  0x23   :  { %83 = vst.msk [vmem:[#allocation2 + $0x110] sm:$0xff] %vm48_vm0, %v5499_v3 }
  0x24   :  { %84 = vst.msk [vmem:[#allocation2 + $0x118] sm:$0xff] %vm48_vm0, %v5499_v3 }
  0x25   :  { %85 = vst.msk [vmem:[#allocation2 + $0x120] sm:$0xff] %vm48_vm0, %v5499_v3 }
  0x26   :  { %86 = vst.msk [vmem:[#allocation2 + $0x128] sm:$0xff] %vm48_vm0, %v5499_v3 }
  0x27   :  { %87 = vst.msk [vmem:[#allocation2 + $0x130] sm:$0xff] %vm48_vm0, %v5499_v3 }
  0x28   :  { %88 = vst.msk [vmem:[#allocation2 + $0x138] sm:$0xff] %vm48_vm0, %v5499_v3 }
  0x29   :  { %89 = vst.msk [vmem:[#allocation2 + $0x140] sm:$0xff] %vm48_vm0, %v5499_v3 }
  0x2a   :  { %92 = vst.msk [vmem:[#allocation2 + $0x13] sm:$0xff] %vm48_vm0, %v90_v9 }
  0x2b   :  { %93 = vst.msk [vmem:[#allocation2 + $0x1b] sm:$0xff] %vm48_vm0, %v91_v10 }
  0x2c   :  { %96 = vst.msk [vmem:[#allocation2 + $0x25] sm:$0xff] %vm48_vm0, %v94_v11  ;;  %v126_v11 = vld [vmem:[%s7345_s0 + $0x90] sm:$0xff] }
  0x2d   :  { %97 = vst.msk [vmem:[#allocation2 + $0x2d] sm:$0xff] %vm48_vm0, %v95_v12 }
  0x2e   :  { %100 = vst.msk [vmem:[#allocation2 + $0x37] sm:$0xff] %vm48_vm0, %v98_v13 }
  0x2f   :  { %101 = vst.msk [vmem:[#allocation2 + $0x3f] sm:$0xff] %vm48_vm0, %v99_v14 }
  0x30   :  { %104 = vst.msk [vmem:[#allocation2 + $0x49] sm:$0xff] %vm48_vm0, %v102_v19 }
  0x31   :  { %v5661_v15 = vld [vmem:[#allocation2 + $0x12] sm:$0xff]  ;;  %105 = vst.msk [vmem:[#allocation2 + $0x51] sm:$0xff] %vm48_vm0, %v103_v23 }
  0x32   :  { %v193_v16 = vld [vmem:[#allocation2 + $0x11] sm:$0xff]  ;;  %v1003_v18 = vld [vmem:[#allocation2 + $0x1a] sm:$0xff]  ;;  %5020 = vmatmul.msk.f32.gmra.mxu2 %vm48_vm0, %v5661_v15  ;;  %108 = vst.msk [vmem:[#allocation2 + $0x5b] sm:$0xff] %vm48_vm0, %v106_v30 }
  0x33   :  { %v156_v17 = vld [vmem:[#allocation2 + $0x10] sm:$0xff]  ;;  %4947 = vmatmul.msk.f32.gmra.mxu0 %vm48_vm0, %v193_v16  ;;  %5056 = vmatmul.msk.f32.vlgmr.msra.gmra.mxu3 %vm48_vm0, %v1003_v18  ;;  %v194_v20 = vld [vmem:[#allocation2 + $0x19] sm:$0xff]  ;;  %v1004_v21 = vld [vmem:[#allocation2 + $0x22] sm:$0xff]  ;;  %109 = vst.msk [vmem:[#allocation2 + $0x63] sm:$0xff] %vm48_vm0, %v107_v34 }
  0x34   :  { %4983 = vmatmul.msk.f32.gmra.mxu1 %vm48_vm0, %v156_v17  ;;  %v157_v22 = vld [vmem:[#allocation2 + $0x18] sm:$0xff]  ;;  %v195_v24 = vld [vmem:[#allocation2 + $0x21] sm:$0xff]  ;;  %v1005_v25 = vld [vmem:[#allocation2 + $0x2a] sm:$0xff]  ;;  %112 = vst.msk [vmem:[#allocation2 + $0x6d] sm:$0xff] %vm48_vm0, %v110_v38 }
  0x35   :  { %v158_v26 = vld [vmem:[#allocation2 + $0x20] sm:$0xff]  ;;  %v196_v27 = vld [vmem:[#allocation2 + $0x29] sm:$0xff]  ;;  %v1006_v28 = vld [vmem:[#allocation2 + $0x32] sm:$0xff]  ;;  %113 = vst.msk [vmem:[#allocation2 + $0x75] sm:$0xff] %vm48_vm0, %v111_v42 }
  0x36   :  { %v159_v29 = vld [vmem:[#allocation2 + $0x28] sm:$0xff]  ;;  %v197_v31 = vld [vmem:[#allocation2 + $0x31] sm:$0xff]  ;;  %v1007_v32 = vld [vmem:[#allocation2 + $0x3a] sm:$0xff]  ;;  %116 = vst.msk [vmem:[#allocation2 + $0x7f] sm:$0xff] %vm48_vm0, %v114_v46 }
  0x37   :  { %v160_v33 = vld [vmem:[#allocation2 + $0x30] sm:$0xff]  ;;  %v198_v35 = vld [vmem:[#allocation2 + $0x39] sm:$0xff]  ;;  %v1008_v36 = vld [vmem:[#allocation2 + $0x42] sm:$0xff]  ;;  %117 = vst.msk [vmem:[#allocation2 + $0x87] sm:$0xff] %vm48_vm0, %v115_v50 }
  0x38   :  { %v161_v37 = vld [vmem:[#allocation2 + $0x38] sm:$0xff]  ;;  %v199_v39 = vld [vmem:[#allocation2 + $0x41] sm:$0xff]  ;;  %v1009_v40 = vld [vmem:[#allocation2 + $0x4a] sm:$0xff]  ;;  %120 = vst.msk [vmem:[#allocation2 + $0x91] sm:$0xff] %vm48_vm0, %v118_v54 }
  0x39   :  { %v162_v41 = vld [vmem:[#allocation2 + $0x40] sm:$0xff]  ;;  %v200_v43 = vld [vmem:[#allocation2 + $0x49] sm:$0xff]  ;;  %v1010_v44 = vld [vmem:[#allocation2 + $0x52] sm:$0xff]  ;;  %121 = vst.msk [vmem:[#allocation2 + $0x99] sm:$0xff] %vm48_vm0, %v119_v58 }
  0x3a   :  { %5021 = vmatmul.msk.f32.gmra.mxu2 %vm48_vm0, %v1003_v18  ;;  %v163_v45 = vld [vmem:[#allocation2 + $0x48] sm:$0xff]  ;;  %v201_v47 = vld [vmem:[#allocation2 + $0x51] sm:$0xff]  ;;  %v1011_v48 = vld [vmem:[#allocation2 + $0x5a] sm:$0xff]  ;;  %124 = vst.msk [vmem:[#allocation2 + $0xa3] sm:$0xff] %vm48_vm0, %v122_v1 }
  0x3b   :  { %4948 = vmatmul.msk.f32.gmra.mxu0 %vm48_vm0, %v194_v20  ;;  %5057 = vmatmul.msk.f32.gmra.mxu3 %vm48_vm0, %v1004_v21  ;;  %v164_v49 = vld [vmem:[#allocation2 + $0x50] sm:$0xff]  ;;  %v202_v51 = vld [vmem:[#allocation2 + $0x59] sm:$0xff]  ;;  %v1012_v52 = vld [vmem:[#allocation2 + $0x62] sm:$0xff]  ;;  %125 = vst.msk [vmem:[#allocation2 + $0xab] sm:$0xff] %vm48_vm0, %v123_v6 }
  0x3c   :  { %4984 = vmatmul.msk.f32.gmra.mxu1 %vm48_vm0, %v157_v22  ;;  %v165_v53 = vld [vmem:[#allocation2 + $0x58] sm:$0xff]  ;;  %v203_v55 = vld [vmem:[#allocation2 + $0x61] sm:$0xff]  ;;  %v1013_v56 = vld [vmem:[#allocation2 + $0x6a] sm:$0xff]  ;;  %128 = vst.msk [vmem:[#allocation2 + $0xb5] sm:$0xff] %vm48_vm0, %v126_v11 }
  0x3d   :  { %v166_v57 = vld [vmem:[#allocation2 + $0x60] sm:$0xff]  ;;  %v204_v59 = vld [vmem:[#allocation2 + $0x69] sm:$0xff]  ;;  %v1014_v60 = vld [vmem:[#allocation2 + $0x72] sm:$0xff] }
  0x3e   :  { %v167_v61 = vld [vmem:[#allocation2 + $0x68] sm:$0xff]  ;;  %v205_v62 = vld [vmem:[#allocation2 + $0x71] sm:$0xff]  ;;  %v1015_v63 = vld [vmem:[#allocation2 + $0x7a] sm:$0xff] }
  0x3f   :  { %v168_v0 = vld [vmem:[#allocation2 + $0x70] sm:$0xff]  ;;  %v206_v3 = vld [vmem:[#allocation2 + $0x79] sm:$0xff]  ;;  %v1016_v4 = vld [vmem:[#allocation2 + $0x82] sm:$0xff] }
  0x40   :  { %v169_v5 = vld [vmem:[#allocation2 + $0x78] sm:$0xff]  ;;  %v207_v8 = vld [vmem:[#allocation2 + $0x81] sm:$0xff]  ;;  %v1017_v9 = vld [vmem:[#allocation2 + $0x8a] sm:$0xff] }
  0x41   :  { %v170_v10 = vld [vmem:[#allocation2 + $0x80] sm:$0xff]  ;;  %v208_v14 = vld [vmem:[#allocation2 + $0x89] sm:$0xff]  ;;  %v1018_v16 = vld [vmem:[#allocation2 + $0x92] sm:$0xff] }
  0x42   :  { %5022 = vmatmul.msk.f32.gmra.mxu2 %vm48_vm0, %v1004_v21  ;;  %v171_v17 = vld [vmem:[#allocation2 + $0x88] sm:$0xff]  ;;  %v127_v18 = vld [vmem:[%s7345_s0 + $0x98] sm:$0xff] }
  0x43   :  { %4949 = vmatmul.msk.f32.gmra.mxu0 %vm48_vm0, %v195_v24  ;;  %5058 = vmatmul.msk.f32.gmra.mxu3 %vm48_vm0, %v1005_v25  ;;  %129 = vst.msk [vmem:[#allocation2 + $0xbd] sm:$0xff] %vm48_vm0, %v127_v18  ;;  %v209_v21 = vld [vmem:[#allocation2 + $0x91] sm:$0xff]  ;;  %v1019_v22 = vld [vmem:[#allocation2 + $0x9a] sm:$0xff]  ;;  %v131_v34 = vld [vmem:[%s7345_s0 + $0xa8] sm:$0xff] }
  0x44   :  { %4985 = vmatmul.msk.f32.gmra.mxu1 %vm48_vm0, %v158_v26  ;;  %v172_v24 = vld [vmem:[#allocation2 + $0x90] sm:$0xff]  ;;  %v210_v30 = vld [vmem:[#allocation2 + $0x99] sm:$0xff]  ;;  %133 = vst.msk [vmem:[#allocation2 + $0xcf] sm:$0xff] %vm48_vm0, %v131_v34 }
  0x45   :  { %v1021_v42 = vld [vmem:[#allocation2 + $0xaa] sm:$0xff]  ;;  %v138_v18 = vld [vmem:[%s7345_s0 + $0xc0] sm:$0xff] }
  0x46   :  { %140 = vst.msk [vmem:[#allocation2 + $0xeb] sm:$0xff] %vm48_vm0, %v138_v18 }
  0x4a   :  { %5023 = vmatmul.msk.f32.gmra.mxu2 %vm48_vm0, %v1005_v25  ;;  %v130_v25 = vld [vmem:[%s7345_s0 + $0xa0] sm:$0xff] }
  0x4b   :  { %4950 = vmatmul.msk.f32.gmra.mxu0 %vm48_vm0, %v196_v27  ;;  %5059 = vmatmul.msk.f32.gmra.mxu3 %vm48_vm0, %v1006_v28  ;;  %132 = vst.msk [vmem:[#allocation2 + $0xc7] sm:$0xff] %vm48_vm0, %v130_v25  ;;  %v214_v11 = vld [vmem:[#allocation2 + $0xb9] sm:$0xff] }
  0x4c   :  { %4986 = vmatmul.msk.f32.gmra.mxu1 %vm48_vm0, %v159_v29 }
  0x52   :  { %5024 = vmatmul.msk.f32.gmra.mxu2 %vm48_vm0, %v1006_v28 }
  0x53   :  { %4951 = vmatmul.msk.f32.gmra.mxu0 %vm48_vm0, %v197_v31  ;;  %5060 = vmatmul.msk.f32.gmra.mxu3 %vm48_vm0, %v1007_v32  ;;  %v1020_v31 = vld [vmem:[#allocation2 + $0xa2] sm:$0xff] }
  0x54   :  { %4987 = vmatmul.msk.f32.gmra.mxu1 %vm48_vm0, %v160_v33  ;;  %v173_v33 = vld [vmem:[#allocation2 + $0x98] sm:$0xff] }
  0x5a   :  { %5025 = vmatmul.msk.f32.gmra.mxu2 %vm48_vm0, %v1007_v32 }
  0x5b   :  { %4952 = vmatmul.msk.f32.gmra.mxu0 %vm48_vm0, %v198_v35  ;;  %5061 = vmatmul.msk.f32.gmra.mxu3 %vm48_vm0, %v1008_v36 }
  0x5c   :  { %4988 = vmatmul.msk.f32.gmra.mxu1 %vm48_vm0, %v161_v37 }
  0x62   :  { %5026 = vmatmul.msk.f32.gmra.mxu2 %vm48_vm0, %v1008_v36 }
  0x63   :  { %4953 = vmatmul.msk.f32.gmra.mxu0 %vm48_vm0, %v199_v39  ;;  %5062 = vmatmul.msk.f32.gmra.mxu3 %vm48_vm0, %v1009_v40 }
  0x64   :  { %4989 = vmatmul.msk.f32.gmra.mxu1 %vm48_vm0, %v162_v41  ;;  %v211_v41 = vld [vmem:[#allocation2 + $0xa1] sm:$0xff] }
  0x6a   :  { %5027 = vmatmul.msk.f32.gmra.mxu2 %vm48_vm0, %v1009_v40 }
  0x6b   :  { %4954 = vmatmul.msk.f32.gmra.mxu0 %vm48_vm0, %v200_v43  ;;  %5063 = vmatmul.msk.f32.gmra.mxu3 %vm48_vm0, %v1010_v44 }
  0x6c   :  { %4990 = vmatmul.msk.f32.gmra.mxu1 %vm48_vm0, %v163_v45  ;;  %v134_v45 = vld [vmem:[%s7345_s0 + $0xb0] sm:$0xff] }
  0x6d   :  { %136 = vst.msk [vmem:[#allocation2 + $0xd9] sm:$0xff] %vm48_vm0, %v134_v45 }
  0x72   :  { %5028 = vmatmul.msk.f32.gmra.mxu2 %vm48_vm0, %v1010_v44  ;;  %v174_v44 = vld [vmem:[#allocation2 + $0xa0] sm:$0xff] }
  0x73   :  { %4955 = vmatmul.msk.f32.gmra.mxu0 %vm48_vm0, %v201_v47  ;;  %5064 = vmatmul.msk.f32.gmra.mxu3 %vm48_vm0, %v1011_v48 }
  0x74   :  { %4991 = vmatmul.msk.f32.gmra.mxu1 %vm48_vm0, %v164_v49 }
  0x7a   :  { %5029 = vmatmul.msk.f32.gmra.mxu2 %vm48_vm0, %v1011_v48 }
  0x7b   :  { %4956 = vmatmul.msk.f32.gmra.mxu0 %vm48_vm0, %v202_v51  ;;  %5065 = vmatmul.msk.f32.gmra.mxu3 %vm48_vm0, %v1012_v52 }
  0x7c   :  { %4992 = vmatmul.msk.f32.gmra.mxu1 %vm48_vm0, %v165_v53  ;;  %v1022_v53 = vld [vmem:[#allocation2 + $0xb2] sm:$0xff] }
  0x82   :  { %5030 = vmatmul.msk.f32.gmra.mxu2 %vm48_vm0, %v1012_v52  ;;  %v212_v52 = vld [vmem:[#allocation2 + $0xa9] sm:$0xff] }
  0x83   :  { %4957 = vmatmul.msk.f32.gmra.mxu0 %vm48_vm0, %v203_v55  ;;  %5066 = vmatmul.msk.f32.gmra.mxu3 %vm48_vm0, %v1013_v56  ;;  %v175_v55 = vld [vmem:[#allocation2 + $0xa8] sm:$0xff] }
  0x84   :  { %4993 = vmatmul.msk.f32.gmra.mxu1 %vm48_vm0, %v166_v57 }
  0x87   :  { %v5767_v7 = vpop.f32.mrf.mxu0 }
  0x8a   :  { %5031 = vmatmul.msk.f32.gmra.mxu2 %vm48_vm0, %v1013_v56  ;;  %v5780_v13 = vpop.f32.mrf.mxu1  ;;  %v135_v56 = vld [vmem:[%s7345_s0 + $0xb8] sm:$0xff] }
  0x8b   :  { %4958 = vmatmul.msk.f32.gmra.mxu0 %vm48_vm0, %v204_v59  ;;  %5067 = vmatmul.msk.f32.gmra.mxu3 %vm48_vm0, %v1014_v60  ;;  %137 = vst.msk [vmem:[#allocation2 + $0xe1] sm:$0xff] %vm48_vm0, %v135_v56 }
  0x8c   :  { %4994 = vmatmul.msk.f32.gmra.mxu1 %vm48_vm0, %v167_v61 }
  0x8e   :  { %v5788_v19 = vpop.f32.mrf.mxu2 }
  0x8f   :  { %v5778_v12 = vpop.f32.mrf.mxu0 }
  0x92   :  { %5032 = vmatmul.msk.f32.gmra.mxu2 %vm48_vm0, %v1014_v60 }
  0x93   :  { %4959 = vmatmul.msk.f32.gmra.mxu0 %vm48_vm0, %v205_v62  ;;  %5068 = vmatmul.msk.f32.gmra.mxu3 %vm48_vm0, %v1015_v63 }
  0x94   :  { %4995 = vmatmul.msk.f32.gmra.mxu1 %vm48_vm0, %v168_v0  ;;  %v1023_v0 = vld [vmem:[#allocation2 + $0xba] sm:$0xff] }
  0x9a   :  { %5033 = vmatmul.msk.f32.gmra.mxu2 %vm48_vm0, %v1015_v63  ;;  %v213_v63 = vld [vmem:[#allocation2 + $0xb1] sm:$0xff] }
  0x9b   :  { %4960 = vmatmul.msk.f32.gmra.mxu0 %vm48_vm0, %v206_v3  ;;  %5069 = vmatmul.msk.f32.gmra.mxu3 %vm48_vm0, %v1016_v4  ;;  %v176_v3 = vld [vmem:[#allocation2 + $0xb0] sm:$0xff] }
  0x9c   :  { %4996 = vmatmul.msk.f32.gmra.mxu1 %vm48_vm0, %v169_v5 }
  0xa2   :  { %5034 = vmatmul.msk.f32.gmra.mxu2 %vm48_vm0, %v1016_v4 }
  0xa3   :  { %4961 = vmatmul.msk.f32.gmra.mxu0 %vm48_vm0, %v207_v8  ;;  %5070 = vmatmul.msk.f32.gmra.mxu3 %vm48_vm0, %v1017_v9 }
  0xa4   :  { %4997 = vmatmul.msk.f32.gmra.mxu1 %vm48_vm0, %v170_v10 }
  0xaa   :  { %5035 = vmatmul.msk.f32.gmra.mxu2 %vm48_vm0, %v1017_v9 }
  0xab   :  { %4962 = vmatmul.msk.f32.gmra.mxu0 %vm48_vm0, %v208_v14  ;;  %5071 = vmatmul.msk.f32.gmra.mxu3 %vm48_vm0, %v1018_v16  ;;  %v1024_v14 = vld [vmem:[#allocation2 + $0xc2] sm:$0xff] }
  0xac   :  { %4998 = vmatmul.msk.f32.gmra.mxu1 %vm48_vm0, %v171_v17  ;;  %v177_v17 = vld [vmem:[#allocation2 + $0xb8] sm:$0xff] }
  0xb0   :  { %v360_v20 = vpop.f32.mrf.mxu0 }
  0xb1   :  { %v593_v23 = vpop.f32.mrf.mxu1 }
  0xb2   :  { %5036 = vmatmul.msk.f32.gmra.mxu2 %vm48_vm0, %v1018_v16  ;;  %v594_v28 = vadd.f32 %v593_v23, %v360_v20 }
  0xb3   :  { %4963 = vmatmul.msk.f32.gmra.mxu0 %vm48_vm0, %v209_v21  ;;  %5072 = vmatmul.msk.f32.gmra.mxu3 %vm48_vm0, %v1019_v22 }
  0xb4   :  { %4999 = vmatmul.msk.f32.gmra.mxu1 %vm48_vm0, %v172_v24 }
  0xb5   :  { %v864_v26 = vpop.f32.mrf.mxu2 }
  0xb6   :  { %v5800_v27 = vpop.f32.mrf.mxu3  ;;  %v968_v35 = vadd.f32 %v864_v26, %v594_v28  ;;  %v215_v26 = vld [vmem:[#allocation2 + $0xc1] sm:$0xff]  ;;  %v1025_v28 = vld [vmem:[#allocation2 + $0xca] sm:$0xff] }
  0xb8   :  { %v363_v29 = vpop.f32.mrf.mxu0 }
  0xb9   :  { %v596_v32 = vpop.f32.mrf.mxu1 }
  0xba   :  { %5037 = vmatmul.msk.f32.gmra.mxu2 %vm48_vm0, %v1019_v22  ;;  %v597_v39 = vadd.f32 %v596_v32, %v363_v29 }
  0xbb   :  { %4964 = vmatmul.msk.f32.gmra.mxu0 %vm48_vm0, %v210_v30  ;;  %5073 = vmatmul.msk.f32.gmra.mxu3 %vm48_vm0, %v1020_v31  ;;  %v178_v30 = vld [vmem:[#allocation2 + $0xc0] sm:$0xff] }
  0xbc   :  { %5000 = vmatmul.msk.f32.gmra.mxu1 %vm48_vm0, %v173_v33 }
  0xbd   :  { %v867_v36 = vpop.f32.mrf.mxu2 }
  0xbe   :  { %v1171_v37 = vpop.f32.mrf.mxu3  ;;  %v969_v46 = vadd.f32 %v867_v36, %v597_v39  ;;  %v216_v39 = vld [vmem:[#allocation2 + $0xc9] sm:$0xff] }
  0xbf   :  { %v5810_v38 = vadd.f32 %v1171_v37, %v968_v35 }
  0xc0   :  { %v366_v40 = vpop.f32.mrf.mxu0 }
  0xc1   :  { %v599_v43 = vpop.f32.mrf.mxu1 }
  0xc2   :  { %5038 = vmatmul.msk.f32.gmra.mxu2 %vm48_vm0, %v1020_v31  ;;  %v600_v50 = vadd.f32 %v599_v43, %v366_v40  ;;  %v139_v31 = vld [vmem:[%s7345_s0 + $0xc8] sm:$0xff]  ;;  %v1026_v40 = vld [vmem:[#allocation2 + $0xd2] sm:$0xff] }
  0xc3   :  { %4965 = vmatmul.msk.f32.gmra.mxu0 %vm48_vm0, %v211_v41  ;;  %5074 = vmatmul.msk.f32.gmra.mxu3 %vm48_vm0, %v1021_v42  ;;  %141 = vst.msk [vmem:[#allocation2 + $0xf3] sm:$0xff] %vm48_vm0, %v139_v31  ;;  %v142_v43 = vld [vmem:[%s7345_s0 + $0xd0] sm:$0xff] }
  0xc4   :  { %5001 = vmatmul.msk.f32.gmra.mxu1 %vm48_vm0, %v174_v44  ;;  %144 = vst.msk [vmem:[#allocation2 + $0xfd] sm:$0xff] %vm48_vm0, %v142_v43 }
  0xc5   :  { %v870_v47 = vpop.f32.mrf.mxu2 }
  0xc6   :  { %v1174_v48 = vpop.f32.mrf.mxu3  ;;  %v970_v57 = vadd.f32 %v870_v47, %v600_v50 }
  0xc7   :  { %v5820_v49 = vadd.f32 %v1174_v48, %v969_v46 }
  0xc8   :  { %v369_v51 = vpop.f32.mrf.mxu0 }
  0xc9   :  { %v602_v54 = vpop.f32.mrf.mxu1 }
  0xca   :  { %5039 = vmatmul.msk.f32.gmra.mxu2 %vm48_vm0, %v1021_v42  ;;  %v603_v61 = vadd.f32 %v602_v54, %v369_v51  ;;  %v179_v42 = vld [vmem:[#allocation2 + $0xc8] sm:$0xff]  ;;  %v217_v51 = vld [vmem:[#allocation2 + $0xd1] sm:$0xff] }
  0xcb   :  { %4966 = vmatmul.msk.f32.gmra.mxu0 %vm48_vm0, %v212_v52  ;;  %5075 = vmatmul.msk.f32.gmra.mxu3 %vm48_vm0, %v1022_v53  ;;  %v1027_v52 = vld [vmem:[#allocation2 + $0xda] sm:$0xff]  ;;  %v180_v54 = vld [vmem:[#allocation2 + $0xd0] sm:$0xff] }
  0xcc   :  { %5002 = vmatmul.msk.f32.gmra.mxu1 %vm48_vm0, %v175_v55  ;;  %v143_v55 = vld [vmem:[%s7345_s0 + $0xd8] sm:$0xff] }
  0xcd   :  { %v873_v58 = vpop.f32.mrf.mxu2  ;;  %145 = vst.msk [vmem:[#allocation2 + $0x105] sm:$0xff] %vm48_vm0, %v143_v55  ;;  %v1030_v31 = vld [vmem:[#allocation2 + $0xf2] sm:$0xff] }
  0xce   :  { %v1177_v59 = vpop.f32.mrf.mxu3  ;;  %v971_v4 = vadd.f32 %v873_v58, %v603_v61  ;;  %v221_v43 = vld [vmem:[#allocation2 + $0xf1] sm:$0xff] }
  0xcf   :  { %v5830_v60 = vadd.f32 %v1177_v59, %v970_v57 }
  0xd0   :  { %v372_v62 = vpop.f32.mrf.mxu0 }
  0xd1   :  { %v605_v1 = vpop.f32.mrf.mxu1 }
  0xd2   :  { %5040 = vmatmul.msk.f32.gmra.mxu2 %vm48_vm0, %v1022_v53  ;;  %v606_v9 = vadd.f32 %v605_v1, %v372_v62 }
  0xd3   :  { %4967 = vmatmul.msk.f32.gmra.mxu0 %vm48_vm0, %v213_v63  ;;  %5076 = vmatmul.msk.f32.gmra.mxu3 %vm48_vm0, %v1023_v0  ;;  %v218_v63 = vld [vmem:[#allocation2 + $0xd9] sm:$0xff] }
  0xd4   :  { %5003 = vmatmul.msk.f32.gmra.mxu1 %vm48_vm0, %v176_v3  ;;  %v181_v3 = vld [vmem:[#allocation2 + $0xd8] sm:$0xff] }
  0xd5   :  { %v876_v5 = vpop.f32.mrf.mxu2 }
  0xd6   :  { %v1180_v6 = vpop.f32.mrf.mxu3  ;;  %v972_v20 = vadd.f32 %v876_v5, %v606_v9 }
  0xd7   :  { %v5836_v8 = vadd.f32 %v1180_v6, %v971_v4  ;;  %v146_v4 = vld [vmem:[%s7345_s0 + $0xe0] sm:$0xff] }
  0xd8   :  { %v375_v10 = vpop.f32.mrf.mxu0  ;;  %148 = vst.msk [vmem:[#allocation2 + $0x10f] sm:$0xff] %vm48_vm0, %v146_v4 }
  0xd9   :  { %v608_v16 = vpop.f32.mrf.mxu1 }
  0xda   :  { %5041 = vmatmul.msk.f32.gmra.mxu2 %vm48_vm0, %v1023_v0  ;;  %v609_v24 = vadd.f32 %v608_v16, %v375_v10  ;;  %v1028_v0 = vld [vmem:[#allocation2 + $0xe2] sm:$0xff] }
  0xdb   :  { %4968 = vmatmul.msk.f32.gmra.mxu0 %vm48_vm0, %v214_v11  ;;  %5077 = vmatmul.msk.f32.gmra.mxu3 %vm48_vm0, %v1024_v14  ;;  %v219_v16 = vld [vmem:[#allocation2 + $0xe1] sm:$0xff] }
  0xdc   :  { %5004 = vmatmul.msk.f32.gmra.mxu1 %vm48_vm0, %v177_v17  ;;  %v1029_v17 = vld [vmem:[#allocation2 + $0xea] sm:$0xff] }
  0xdd   :  { %v879_v21 = vpop.f32.mrf.mxu2 }
  0xde   :  { %v1183_v22 = vpop.f32.mrf.mxu3  ;;  %v973_v32 = vadd.f32 %v879_v21, %v609_v24  ;;  %v147_v21 = vld [vmem:[%s7345_s0 + $0xe8] sm:$0xff] }
  0xdf   :  { %v5846_v23 = vadd.f32 %v1183_v22, %v972_v20  ;;  %v182_v20 = vld [vmem:[#allocation2 + $0xe0] sm:$0xff]  ;;  %149 = vst.msk [vmem:[#allocation2 + $0x117] sm:$0xff] %vm48_vm0, %v147_v21 }
  0xe0   :  { %v378_v25 = vpop.f32.mrf.mxu0 }
  0xe1   :  { %v611_v29 = vpop.f32.mrf.mxu1 }
  0xe2   :  { %5042 = vmatmul.msk.f32.gmra.mxu2 %vm48_vm0, %v1024_v14  ;;  %v612_v36 = vadd.f32 %v611_v29, %v378_v25 }
  0xe3   :  { %4969 = vmatmul.msk.f32.gmra.mxu0 %vm48_vm0, %v215_v26  ;;  %5078 = vmatmul.msk.f32.gmra.mxu3 %vm48_vm0, %v1025_v28 }
  0xe4   :  { %5005 = vmatmul.msk.f32.gmra.mxu1 %vm48_vm0, %v178_v30  ;;  %v220_v30 = vld [vmem:[#allocation2 + $0xe9] sm:$0xff] }
  0xe5   :  { %v882_v33 = vpop.f32.mrf.mxu2 }
  0xe6   :  { %v1186_v34 = vpop.f32.mrf.mxu3  ;;  %v974_v44 = vadd.f32 %v882_v33, %v612_v36  ;;  %v183_v33 = vld [vmem:[#allocation2 + $0xe8] sm:$0xff] }
  0xe7   :  { %v5856_v35 = vadd.f32 %v1186_v34, %v973_v32  ;;  %v150_v34 = vld [vmem:[%s7345_s0 + $0xf0] sm:$0xff] }
  0xe8   :  { %v381_v37 = vpop.f32.mrf.mxu0  ;;  %152 = vst.msk [vmem:[#allocation2 + $0x121] sm:$0xff] %vm48_vm0, %v150_v34 }
  0xe9   :  { %v614_v41 = vpop.f32.mrf.mxu1 }
  0xea   :  { %5043 = vmatmul.msk.f32.gmra.mxu2 %vm48_vm0, %v1025_v28  ;;  %v615_v48 = vadd.f32 %v614_v41, %v381_v37 }
  0xeb   :  { %4970 = vmatmul.msk.f32.gmra.mxu0 %vm48_vm0, %v216_v39  ;;  %5079 = vmatmul.msk.f32.gmra.mxu3 %vm48_vm0, %v1026_v40 }
  0xec   :  { %5006 = vmatmul.msk.f32.gmra.mxu1 %vm48_vm0, %v179_v42 }
  0xed   :  { %v885_v45 = vpop.f32.mrf.mxu2 }
  0xee   :  { %v1189_v46 = vpop.f32.mrf.mxu3  ;;  %v975_v56 = vadd.f32 %v885_v45, %v615_v48  ;;  %v151_v48 = vld [vmem:[%s7345_s0 + $0xf8] sm:$0xff] }
  0xef   :  { %v5866_v47 = vadd.f32 %v1189_v46, %v974_v44  ;;  %v1031_v44 = vld [vmem:[#allocation2 + $0xfa] sm:$0xff]  ;;  %v184_v46 = vld [vmem:[#allocation2 + $0xf0] sm:$0xff]  ;;  %153 = vst.msk [vmem:[#allocation2 + $0x129] sm:$0xff] %vm48_vm0, %v151_v48 }
  0xf0   :  { %v384_v50 = vpop.f32.mrf.mxu0 }
  0xf1   :  { %v617_v53 = vpop.f32.mrf.mxu1 }
  0xf2   :  { %5044 = vmatmul.msk.f32.gmra.mxu2 %vm48_vm0, %v1026_v40  ;;  %v618_v61 = vadd.f32 %v617_v53, %v384_v50 }
  0xf3   :  { %4971 = vmatmul.msk.f32.gmra.mxu0 %vm48_vm0, %v217_v51  ;;  %5080 = vmatmul.msk.f32.gmra.mxu3 %vm48_vm0, %v1027_v52 }
  0xf4   :  { %5007 = vmatmul.msk.f32.gmra.mxu1 %vm48_vm0, %v180_v54 }
  0xf5   :  { %v888_v57 = vpop.f32.mrf.mxu2 }
  0xf6   :  { %v1192_v58 = vpop.f32.mrf.mxu3  ;;  %v976_v5 = vadd.f32 %v888_v57, %v618_v61  ;;  %v1032_v57 = vld [vmem:[#allocation2 + $0x102] sm:$0xff]  ;;  %v185_v61 = vld [vmem:[#allocation2 + $0xf8] sm:$0xff] }
  0xf7   :  { %v5876_v59 = vadd.f32 %v1192_v58, %v975_v56  ;;  %v222_v56 = vld [vmem:[#allocation2 + $0xf9] sm:$0xff] }
  0xf8   :  { %v387_v62 = vpop.f32.mrf.mxu0 }
  0xf9   :  { %v620_v1 = vpop.f32.mrf.mxu1 }
  0xfa   :  { %5045 = vmatmul.msk.f32.gmra.mxu2 %vm48_vm0, %v1027_v52  ;;  %v621_v11 = vadd.f32 %v620_v1, %v387_v62 }
  0xfb   :  { %4972 = vmatmul.msk.f32.gmra.mxu0 %vm48_vm0, %v218_v63  ;;  %5081 = vmatmul.msk.f32.gmra.mxu3 %vm48_vm0, %v1028_v0 }
  0xfc   :  { %5008 = vmatmul.msk.f32.gmra.mxu1 %vm48_vm0, %v181_v3 }
  0xfd   :  { %v891_v6 = vpop.f32.mrf.mxu2 }
  0xfe   :  { %v1195_v9 = vpop.f32.mrf.mxu3  ;;  %v977_v22 = vadd.f32 %v891_v6, %v621_v11  ;;  %v1033_v6 = vld [vmem:[#allocation2 + $0x10a] sm:$0xff]  ;;  %v186_v11 = vld [vmem:[#allocation2 + $0x100] sm:$0xff] }
  0xff   :  { %v5886_v10 = vadd.f32 %v1195_v9, %v976_v5  ;;  %v223_v5 = vld [vmem:[#allocation2 + $0x101] sm:$0xff] }
 0x100   :  { %v390_v14 = vpop.f32.mrf.mxu0 }
 0x101   :  { %v623_v18 = vpop.f32.mrf.mxu1 }
 0x102   :  { %5046 = vmatmul.msk.f32.gmra.mxu2 %vm48_vm0, %v1028_v0  ;;  %v624_v28 = vadd.f32 %v623_v18, %v390_v14 }
 0x103   :  { %4973 = vmatmul.msk.f32.gmra.mxu0 %vm48_vm0, %v219_v16  ;;  %5082 = vmatmul.msk.f32.gmra.mxu3 %vm48_vm0, %v1029_v17 }
 0x104   :  { %5009 = vmatmul.msk.f32.gmra.mxu1 %vm48_vm0, %v182_v20 }
 0x105   :  { %v894_v24 = vpop.f32.mrf.mxu2 }
 0x106   :  { %v1198_v25 = vpop.f32.mrf.mxu3  ;;  %v978_v36 = vadd.f32 %v894_v24, %v624_v28  ;;  %v1034_v24 = vld [vmem:[#allocation2 + $0x112] sm:$0xff]  ;;  %v187_v28 = vld [vmem:[#allocation2 + $0x108] sm:$0xff] }
 0x107   :  { %v5896_v26 = vadd.f32 %v1198_v25, %v977_v22  ;;  %v224_v22 = vld [vmem:[#allocation2 + $0x109] sm:$0xff] }
 0x108   :  { %v393_v29 = vpop.f32.mrf.mxu0 }
 0x109   :  { %v626_v32 = vpop.f32.mrf.mxu1 }
 0x10a   :  { %5047 = vmatmul.msk.f32.gmra.mxu2 %vm48_vm0, %v1029_v17  ;;  %v627_v41 = vadd.f32 %v626_v32, %v393_v29 }
 0x10b   :  { %4974 = vmatmul.msk.f32.gmra.mxu0 %vm48_vm0, %v220_v30  ;;  %5083 = vmatmul.msk.f32.gmra.mxu3 %vm48_vm0, %v1030_v31 }
 0x10c   :  { %5010 = vmatmul.msk.f32.gmra.mxu1 %vm48_vm0, %v183_v33 }
 0x10d   :  { %v897_v37 = vpop.f32.mrf.mxu2 }
 0x10e   :  { %v1201_v39 = vpop.f32.mrf.mxu3  ;;  %v979_v50 = vadd.f32 %v897_v37, %v627_v41  ;;  %v1035_v37 = vld [vmem:[#allocation2 + $0x11a] sm:$0xff]  ;;  %v188_v41 = vld [vmem:[#allocation2 + $0x110] sm:$0xff] }
 0x10f   :  { %v5906_v40 = vadd.f32 %v1201_v39, %v978_v36  ;;  %v225_v36 = vld [vmem:[#allocation2 + $0x111] sm:$0xff] }
 0x110   :  { %v396_v42 = vpop.f32.mrf.mxu0 }
 0x111   :  { %v629_v45 = vpop.f32.mrf.mxu1 }
 0x112   :  { %5048 = vmatmul.msk.f32.gmra.mxu2 %vm48_vm0, %v1030_v31  ;;  %v630_v54 = vadd.f32 %v629_v45, %v396_v42 }
 0x113   :  { %4975 = vmatmul.msk.f32.gmra.mxu0 %vm48_vm0, %v221_v43  ;;  %5084 = vmatmul.msk.f32.gmra.mxu3 %vm48_vm0, %v1031_v44 }
 0x114   :  { %5011 = vmatmul.msk.f32.gmra.mxu1 %vm48_vm0, %v184_v46 }
 0x115   :  { %v900_v51 = vpop.f32.mrf.mxu2 }
 0x116   :  { %v1204_v52 = vpop.f32.mrf.mxu3  ;;  %v980_v62 = vadd.f32 %v900_v51, %v630_v54  ;;  %v1036_v51 = vld [vmem:[#allocation2 + $0x122] sm:$0xff]  ;;  %v189_v54 = vld [vmem:[#allocation2 + $0x118] sm:$0xff] }
 0x117   :  { %v5916_v53 = vadd.f32 %v1204_v52, %v979_v50  ;;  %v226_v50 = vld [vmem:[#allocation2 + $0x119] sm:$0xff] }
 0x118   :  { %v399_v55 = vpop.f32.mrf.mxu0 }
 0x119   :  { %v632_v58 = vpop.f32.mrf.mxu1 }
 0x11a   :  { %5049 = vmatmul.msk.f32.gmra.mxu2 %vm48_vm0, %v1031_v44  ;;  %v633_v3 = vadd.f32 %v632_v58, %v399_v55 }
 0x11b   :  { %4976 = vmatmul.msk.f32.gmra.mxu0 %vm48_vm0, %v222_v56  ;;  %5085 = vmatmul.msk.f32.gmra.mxu3 %vm48_vm0, %v1032_v57 }
 0x11c   :  { %5012 = vmatmul.msk.f32.gmra.mxu1 %vm48_vm0, %v185_v61 }
 0x11d   :  { %v903_v63 = vpop.f32.mrf.mxu2 }
 0x11e   :  { %v1207_v0 = vpop.f32.mrf.mxu3  ;;  %v981_v14 = vadd.f32 %v903_v63, %v633_v3  ;;  %v154_v63 = vld [vmem:[#allocation2] sm:$0xff] }
 0x11f   :  { %v5922_v1 = vadd.f32 %v1207_v0, %v980_v62  ;;  %v5165_v0 = vld [vmem:[%s7346_s1 + $0x30] sm:$0xff]  ;;  %v1923_v3 = vld [vmem:[#allocation2 + $0x24] sm:$0xff] }
 0x120   :  { %v402_v4 = vpop.f32.mrf.mxu0  ;;  %2084 = vmatpush.msrb.mxu2 %v5165_v0 }
 0x121   :  { %v635_v9 = vpop.f32.mrf.mxu1 }
 0x122   :  { %5050 = vmatmul.msk.f32.gmra.mxu2 %vm48_vm0, %v1032_v57  ;;  %v636_v20 = vadd.f32 %v635_v9, %v402_v4  ;;  %v1037_v4 = vld [vmem:[#allocation2 + $0x12a] sm:$0xff] }
 0x123   :  { %4977 = vmatmul.msk.f32.gmra.mxu0 %vm48_vm0, %v223_v5  ;;  %5086 = vmatmul.msk.f32.gmra.mxu3 %vm48_vm0, %v1033_v6 }
 0x124   :  { %5013 = vmatmul.msk.f32.gmra.mxu1 %vm48_vm0, %v186_v11 }
 0x125   :  { %v906_v16 = vpop.f32.mrf.mxu2 }
 0x126   :  { %v1210_v17 = vpop.f32.mrf.mxu3  ;;  %v982_v29 = vadd.f32 %v906_v16, %v636_v20 }
 0x127   :  { %v5928_v18 = vadd.f32 %v1210_v17, %v981_v14  ;;  %v5128_v14 = vld [vmem:[%s7346_s1 + $0x28] sm:$0xff]  ;;  %v1616_v17 = vld [vmem:[#allocation2 + $0x14] sm:$0xff] }
 0x128   :  { %v405_v21 = vpop.f32.mrf.mxu0  ;;  %1777 = vmatpush.msrb.mxu1 %v5128_v14 }
 0x129   :  { %v638_v25 = vpop.f32.mrf.mxu1 }
 0x12a   :  { %5051 = vmatmul.msk.f32.gmra.mxu2 %vm48_vm0, %v1033_v6  ;;  %v639_v33 = vadd.f32 %v638_v25, %v405_v21  ;;  %v5202_v6 = vld [vmem:[%s7346_s1 + $0x38] sm:$0xff]  ;;  %v1924_v25 = vld [vmem:[#allocation2 + $0x2c] sm:$0xff] }
 0x12b   :  { %4978 = vmatmul.msk.f32.gmra.mxu0 %vm48_vm0, %v224_v22  ;;  %5087 = vmatmul.msk.f32.gmra.mxu3 %vm48_vm0, %v1034_v24 }
 0x12c   :  { %5014 = vmatmul.msk.f32.gmra.mxu1 %vm48_vm0, %v187_v28  ;;  %2391 = vmatpush.msrb.mxu3 %v5202_v6 }
 0x12d   :  { %v909_v30 = vpop.f32.mrf.mxu2 }
 0x12e   :  { %v1213_v31 = vpop.f32.mrf.mxu3  ;;  %v983_v42 = vadd.f32 %v909_v30, %v639_v33 }
 0x12f   :  { %v5934_v32 = vadd.f32 %v1213_v31, %v982_v29  ;;  %v2230_v29 = vld [vmem:[#allocation2 + $0x25] sm:$0xff] }
 0x130   :  { %v408_v34 = vpop.f32.mrf.mxu0 }
 0x131   :  { %v641_v39 = vpop.f32.mrf.mxu1 }
 0x132   :  { %5052 = vmatmul.msk.f32.gmra.mxu2 %vm48_vm0, %v1034_v24  ;;  %v642_v46 = vadd.f32 %v641_v39, %v408_v34  ;;  %v695_v24 = vld [vmem:[#allocation2 + $0x2] sm:$0xff] }
 0x133   :  { %4979 = vmatmul.msk.f32.gmra.mxu0 %vm48_vm0, %v225_v36  ;;  %5088 = vmatmul.msk.f32.gmra.mxu3 %vm48_vm0, %v1035_v37  ;;  %v1617_v34 = vld [vmem:[#allocation2 + $0x1c] sm:$0xff] }
 0x134   :  { %5015 = vmatmul.msk.f32.gmra.mxu1 %vm48_vm0, %v188_v41  ;;  %v1925_v41 = vld [vmem:[#allocation2 + $0x34] sm:$0xff] }
 0x135   :  { %v912_v43 = vpop.f32.mrf.mxu2 }
 0x136   :  { %v1216_v44 = vpop.f32.mrf.mxu3  ;;  %v984_v55 = vadd.f32 %v912_v43, %v642_v46  ;;  %v2231_v43 = vld [vmem:[#allocation2 + $0x2d] sm:$0xff] }
 0x137   :  { %v5940_v45 = vadd.f32 %v1216_v44, %v983_v42 }
 0x138   :  { %v411_v48 = vpop.f32.mrf.mxu0 }
 0x139   :  { %v644_v52 = vpop.f32.mrf.mxu1 }
 0x13a   :  { %5053 = vmatmul.msk.f32.gmra.mxu2 %vm48_vm0, %v1035_v37  ;;  %v645_v61 = vadd.f32 %v644_v52, %v411_v48 }
 0x13b   :  { %4980 = vmatmul.msk.f32.gmra.mxu0 %vm48_vm0, %v226_v50  ;;  %5089 = vmatmul.msk.f32.gmra.mxu3 %vm48_vm0, %v1036_v51 }
 0x13c   :  { %5016 = vmatmul.msk.f32.gmra.mxu1 %vm48_vm0, %v189_v54  ;;  %v1309_v54 = vld [vmem:[#allocation2 + $0x13] sm:$0xff] }
 0x13d   :  { %v915_v56 = vpop.f32.mrf.mxu2 }
 0x13e   :  { %v1219_v57 = vpop.f32.mrf.mxu3  ;;  %v985_v9 = vadd.f32 %v915_v56, %v645_v61 }
 0x13f   :  { %v5946_v58 = vadd.f32 %v1219_v57, %v984_v55  ;;  %v1926_v55 = vld [vmem:[#allocation2 + $0x3c] sm:$0xff] }
 0x140   :  { %v414_v62 = vpop.f32.mrf.mxu0  ;;  %v2232_v57 = vld [vmem:[#allocation2 + $0x35] sm:$0xff] }
 0x141   :  { %v647_v5 = vpop.f32.mrf.mxu1 }
 0x142   :  { %5166 = vmatmul.msk.f32.vlgmr.msrb.gmra.mxu2 %vm48_vm0, %v1923_v3  ;;  %v648_v21 = vadd.f32 %v647_v5, %v414_v62  ;;  %v1310_v5 = vld [vmem:[#allocation2 + $0x1b] sm:$0xff] }
 0x143   :  { %4981 = vmatmul.msk.f32.vlgmr.msrb.gmra.mxu0 %vm48_vm0, %v154_v63  ;;  %5090 = vmatmul.msk.f32.gmra.mxu3 %vm48_vm0, %v1037_v4 }
 0x144   :  { %1163 = vmatpush.msrb.mxu0 %v5586_v2  ;;  %5129 = vmatmul.msk.f32.vlgmr.msrb.gmra.mxu1 %vm48_vm0, %v1616_v17  ;;  %v5091_v2 = vld [vmem:[%s7346_s1 + $0x20] sm:$0xff] }
 0x145   :  { %v918_v11 = vpop.f32.mrf.mxu2 }
 0x146   :  { %v1222_v16 = vpop.f32.mrf.mxu3  ;;  %v986_v30 = vadd.f32 %v918_v11, %v648_v21 }
 0x147   :  { %v5961_v20 = vadd.f32 %v1222_v16, %v985_v9  ;;  %v2233_v9 = vld [vmem:[#allocation2 + $0x3d] sm:$0xff] }
 0x148   :  { %v417_v22 = vpop.f32.mrf.mxu0 }
 0x149   :  { %v650_v28 = vpop.f32.mrf.mxu1 }
 0x14a   :  { %5167 = vmatmul.msk.f32.gmra.mxu2 %vm48_vm0, %v1924_v25  ;;  %v651_v37 = vadd.f32 %v650_v28, %v417_v22 }
 0x14b   :  { %5018 = vmatmul.msk.f32.vlgmr.msra.gmra.mxu0 %vm48_vm0, %v695_v24  ;;  %5203 = vmatmul.msk.f32.vlgmr.msrb.gmra.mxu3 %vm48_vm0, %v2230_v29  ;;  %v1311_v24 = vld [vmem:[#allocation2 + $0x23] sm:$0xff] }
 0x14c   :  { %1470 = vmatpush.msra.mxu0 %v5091_v2  ;;  %5130 = vmatmul.msk.f32.gmra.mxu1 %vm48_vm0, %v1617_v34  ;;  %v2234_v2 = vld [vmem:[#allocation2 + $0x45] sm:$0xff] }
 0x14d   :  { %v921_v31 = vpop.f32.mrf.mxu2 }
 0x14e   :  { %v1225_v33 = vpop.f32.mrf.mxu3  ;;  %v987_v44 = vadd.f32 %v921_v31, %v651_v37 }
 0x14f   :  { %v5970_v36 = vadd.f32 %v1225_v33, %v986_v30 }
 0x150   :  { %v420_v39 = vpop.f32.mrf.mxu0 }
 0x151   :  { %v653_v42 = vpop.f32.mrf.mxu1 }
 0x152   :  { %5168 = vmatmul.msk.f32.gmra.mxu2 %vm48_vm0, %v1925_v41  ;;  %v654_v51 = vadd.f32 %v653_v42, %v420_v39  ;;  %v1312_v39 = vld [vmem:[#allocation2 + $0x2b] sm:$0xff] }
 0x153   :  { %5055 = vmatmul.msk.f32.vlgmr.msrb.gmra.mxu0 %vm48_vm0, %v5661_v15  ;;  %5204 = vmatmul.msk.f32.gmra.mxu3 %vm48_vm0, %v2231_v43  ;;  %v2235_v43 = vld [vmem:[#allocation2 + $0x4d] sm:$0xff] }
 0x154   :  { %5131 = vmatmul.msk.f32.gmra.mxu1 %vm48_vm0, %v1923_v3  ;;  %v1927_v3 = vld [vmem:[#allocation2 + $0x44] sm:$0xff] }
 0x155   :  { %v924_v46 = vpop.f32.mrf.mxu2 }
 0x156   :  { %v1228_v48 = vpop.f32.mrf.mxu3  ;;  %v988_v15 = vadd.f32 %v924_v46, %v654_v51 }
 0x157   :  { %v5977_v50 = vadd.f32 %v1228_v48, %v987_v44 }
 0x158   :  { %v423_v52 = vpop.f32.mrf.mxu0 }
 0x159   :  { %v656_v56 = vpop.f32.mrf.mxu1 }
 0x15a   :  { %5169 = vmatmul.msk.f32.gmra.mxu2 %vm48_vm0, %v1926_v55  ;;  %v657_v0 = vadd.f32 %v656_v56, %v423_v52  ;;  %v1313_v56 = vld [vmem:[#allocation2 + $0x33] sm:$0xff] }
 0x15b   :  { %5092 = vmatmul.msk.f32.vlgmr.msra.gmra.mxu0 %vm48_vm0, %v1309_v54  ;;  %5205 = vmatmul.msk.f32.gmra.mxu3 %vm48_vm0, %v2232_v57 }
 0x15c   :  { %5132 = vmatmul.msk.f32.gmra.mxu1 %vm48_vm0, %v1924_v25  ;;  %v1928_v25 = vld [vmem:[#allocation2 + $0x4c] sm:$0xff] }
 0x15d   :  { %v927_v61 = vpop.f32.mrf.mxu2 }
 0x15e   :  { %v1231_v62 = vpop.f32.mrf.mxu3  ;;  %v989_v11 = vadd.f32 %v927_v61, %v657_v0 }
 0x15f   :  { %v5983_v63 = vadd.f32 %v1231_v62, %v988_v15  ;;  %v2236_v15 = vld [vmem:[#allocation2 + $0x55] sm:$0xff] }
 0x160   :  { %v426_v4 = vpop.f32.mrf.mxu0 }
 0x161   :  { %v659_v6 = vpop.f32.mrf.mxu1 }
 0x162   :  { %5170 = vmatmul.msk.f32.gmra.mxu2 %vm48_vm0, %v1927_v3  ;;  %v660_v21 = vadd.f32 %v659_v6, %v426_v4 }
 0x163   :  { %5093 = vmatmul.msk.f32.gmra.mxu0 %vm48_vm0, %v1310_v5  ;;  %5206 = vmatmul.msk.f32.gmra.mxu3 %vm48_vm0, %v2233_v9  ;;  %v1314_v9 = vld [vmem:[#allocation2 + $0x3b] sm:$0xff] }
 0x164   :  { %5133 = vmatmul.msk.f32.gmra.mxu1 %vm48_vm0, %v1925_v41  ;;  %v1929_v41 = vld [vmem:[#allocation2 + $0x54] sm:$0xff] }
 0x165   :  { %v930_v14 = vpop.f32.mrf.mxu2 }
 0x166   :  { %v1234_v16 = vpop.f32.mrf.mxu3  ;;  %v990_v29 = vadd.f32 %v930_v14, %v660_v21  ;;  %v2237_v14 = vld [vmem:[#allocation2 + $0x5d] sm:$0xff] }
 0x167   :  { %v5989_v17 = vadd.f32 %v1234_v16, %v989_v11 }
 0x168   :  { %v429_v22 = vpop.f32.mrf.mxu0 }
 0x169   :  { %v662_v28 = vpop.f32.mrf.mxu1 }
 0x16a   :  { %5171 = vmatmul.msk.f32.gmra.mxu2 %vm48_vm0, %v1928_v25  ;;  %v663_v34 = vadd.f32 %v662_v28, %v429_v22 }
 0x16b   :  { %5094 = vmatmul.msk.f32.gmra.mxu0 %vm48_vm0, %v1311_v24  ;;  %5207 = vmatmul.msk.f32.gmra.mxu3 %vm48_vm0, %v2234_v2 }
 0x16c   :  { %5134 = vmatmul.msk.f32.gmra.mxu1 %vm48_vm0, %v1926_v55  ;;  %v1930_v55 = vld [vmem:[#allocation2 + $0x5c] sm:$0xff] }
 0x16d   :  { %v933_v30 = vpop.f32.mrf.mxu2 }
 0x16e   :  { %v1237_v31 = vpop.f32.mrf.mxu3  ;;  %v991_v44 = vadd.f32 %v933_v30, %v663_v34 }
 0x16f   :  { %v5995_v33 = vadd.f32 %v1237_v31, %v990_v29  ;;  %v1315_v29 = vld [vmem:[#allocation2 + $0x43] sm:$0xff] }
 0x170   :  { %v432_v37 = vpop.f32.mrf.mxu0  ;;  %v2238_v31 = vld [vmem:[#allocation2 + $0x65] sm:$0xff] }
 0x171   :  { %v665_v42 = vpop.f32.mrf.mxu1 }
 0x172   :  { %5172 = vmatmul.msk.f32.gmra.mxu2 %vm48_vm0, %v1929_v41  ;;  %v666_v52 = vadd.f32 %v665_v42, %v432_v37 }
 0x173   :  { %5095 = vmatmul.msk.f32.gmra.mxu0 %vm48_vm0, %v1312_v39  ;;  %5208 = vmatmul.msk.f32.gmra.mxu3 %vm48_vm0, %v2235_v43 }
 0x174   :  { %5135 = vmatmul.msk.f32.gmra.mxu1 %vm48_vm0, %v1927_v3  ;;  %v1931_v3 = vld [vmem:[#allocation2 + $0x64] sm:$0xff] }
 0x175   :  { %v936_v46 = vpop.f32.mrf.mxu2 }
 0x176   :  { %v1240_v48 = vpop.f32.mrf.mxu3  ;;  %v992_v61 = vadd.f32 %v936_v46, %v666_v52  ;;  %v1316_v46 = vld [vmem:[#allocation2 + $0x4b] sm:$0xff] }
 0x177   :  { %v6001_v51 = vadd.f32 %v1240_v48, %v991_v44  ;;  %v2239_v52 = vld [vmem:[#allocation2 + $0x6d] sm:$0xff] }
 0x178   :  { %v435_v54 = vpop.f32.mrf.mxu0 }
 0x179   :  { %v668_v57 = vpop.f32.mrf.mxu1 }
 0x17a   :  { %5173 = vmatmul.msk.f32.gmra.mxu2 %vm48_vm0, %v1930_v55  ;;  %v669_v5 = vadd.f32 %v668_v57, %v435_v54 }
 0x17b   :  { %5096 = vmatmul.msk.f32.gmra.mxu0 %vm48_vm0, %v1313_v56  ;;  %5209 = vmatmul.msk.f32.gmra.mxu3 %vm48_vm0, %v2236_v15 }
 0x17c   :  { %5136 = vmatmul.msk.f32.gmra.mxu1 %vm48_vm0, %v1928_v25  ;;  %v1932_v25 = vld [vmem:[#allocation2 + $0x6c] sm:$0xff] }
 0x17d   :  { %v939_v62 = vpop.f32.mrf.mxu2 }
 0x17e   :  { %v1243_v0 = vpop.f32.mrf.mxu3  ;;  %v993_v16 = vadd.f32 %v939_v62, %v669_v5 }
 0x17f   :  { %v6007_v4 = vadd.f32 %v1243_v0, %v992_v61  ;;  %v1317_v0 = vld [vmem:[#allocation2 + $0x53] sm:$0xff] }
 0x180   :  { %v438_v6 = vpop.f32.mrf.mxu0 }
 0x181   :  { %v671_v11 = vpop.f32.mrf.mxu1 }
 0x182   :  { %5174 = vmatmul.msk.f32.gmra.mxu2 %vm48_vm0, %v1931_v3  ;;  %v672_v28 = vadd.f32 %v671_v11, %v438_v6  ;;  %v2240_v6 = vld [vmem:[#allocation2 + $0x75] sm:$0xff] }
 0x183   :  { %5097 = vmatmul.msk.f32.gmra.mxu0 %vm48_vm0, %v1314_v9  ;;  %5210 = vmatmul.msk.f32.gmra.mxu3 %vm48_vm0, %v2237_v14 }
 0x184   :  { %5137 = vmatmul.msk.f32.gmra.mxu1 %vm48_vm0, %v1929_v41  ;;  %v1933_v41 = vld [vmem:[#allocation2 + $0x74] sm:$0xff] }
 0x185   :  { %v942_v21 = vpop.f32.mrf.mxu2 }
 0x186   :  { %v1246_v22 = vpop.f32.mrf.mxu3  ;;  %v994_v34 = vadd.f32 %v942_v21, %v672_v28  ;;  %v1318_v28 = vld [vmem:[#allocation2 + $0x5b] sm:$0xff] }
 0x187   :  { %v6013_v24 = vadd.f32 %v1246_v22, %v993_v16 }
 0x188   :  { %v441_v2 = vpop.f32.mrf.mxu0 }
 0x189   :  { %v674_v30 = vpop.f32.mrf.mxu1 }
 0x18a   :  { %5175 = vmatmul.msk.f32.gmra.mxu2 %vm48_vm0, %v1932_v25  ;;  %v675_v43 = vadd.f32 %v674_v30, %v441_v2 }
 0x18b   :  { %5098 = vmatmul.msk.f32.gmra.mxu0 %vm48_vm0, %v1315_v29  ;;  %5211 = vmatmul.msk.f32.gmra.mxu3 %vm48_vm0, %v2238_v31  ;;  %v2241_v29 = vld [vmem:[#allocation2 + $0x7d] sm:$0xff] }
 0x18c   :  { %5138 = vmatmul.msk.f32.gmra.mxu1 %vm48_vm0, %v1930_v55  ;;  %v1934_v55 = vld [vmem:[#allocation2 + $0x7c] sm:$0xff] }
 0x18d   :  { %v945_v37 = vpop.f32.mrf.mxu2 }
 0x18e   :  { %v1249_v39 = vpop.f32.mrf.mxu3  ;;  %v995_v54 = vadd.f32 %v945_v37, %v675_v43 }
 0x18f   :  { %v6019_v42 = vadd.f32 %v1249_v39, %v994_v34 }
 0x190   :  { %v444_v44 = vpop.f32.mrf.mxu0 }
 0x191   :  { %v677_v48 = vpop.f32.mrf.mxu1 }
 0x192   :  { %5176 = vmatmul.msk.f32.gmra.mxu2 %vm48_vm0, %v1933_v41  ;;  %v678_v61 = vadd.f32 %v677_v48, %v444_v44  ;;  %v1319_v44 = vld [vmem:[#allocation2 + $0x63] sm:$0xff] }
 0x193   :  { %5099 = vmatmul.msk.f32.gmra.mxu0 %vm48_vm0, %v1316_v46  ;;  %5212 = vmatmul.msk.f32.gmra.mxu3 %vm48_vm0, %v2239_v52  ;;  %v2242_v48 = vld [vmem:[#allocation2 + $0x85] sm:$0xff] }
 0x194   :  { %5139 = vmatmul.msk.f32.gmra.mxu1 %vm48_vm0, %v1931_v3  ;;  %v1935_v3 = vld [vmem:[#allocation2 + $0x84] sm:$0xff] }
 0x195   :  { %v948_v56 = vpop.f32.mrf.mxu2 }
 0x196   :  { %v1252_v57 = vpop.f32.mrf.mxu3  ;;  %v996_v9 = vadd.f32 %v948_v56, %v678_v61 }
 0x197   :  { %v6025_v15 = vadd.f32 %v1252_v57, %v995_v54 }
 0x198   :  { %v447_v62 = vpop.f32.mrf.mxu0 }
 0x199   :  { %v680_v5 = vpop.f32.mrf.mxu1 }
 0x19a   :  { %5177 = vmatmul.msk.f32.gmra.mxu2 %vm48_vm0, %v1934_v55  ;;  %v681_v21 = vadd.f32 %v680_v5, %v447_v62  ;;  %v2243_v5 = vld [vmem:[#allocation2 + $0x8d] sm:$0xff] }
 0x19b   :  { %5100 = vmatmul.msk.f32.gmra.mxu0 %vm48_vm0, %v1317_v0  ;;  %5213 = vmatmul.msk.f32.gmra.mxu3 %vm48_vm0, %v2240_v6  ;;  %v1320_v0 = vld [vmem:[#allocation2 + $0x6b] sm:$0xff] }
 0x19c   :  { %5140 = vmatmul.msk.f32.gmra.mxu1 %vm48_vm0, %v1932_v25  ;;  %v1936_v25 = vld [vmem:[#allocation2 + $0x8c] sm:$0xff] }
 0x19d   :  { %v951_v11 = vpop.f32.mrf.mxu2 }
 0x19e   :  { %v1255_v14 = vpop.f32.mrf.mxu3  ;;  %v997_v30 = vadd.f32 %v951_v11, %v681_v21 }
 0x19f   :  { %v6031_v16 = vadd.f32 %v1255_v14, %v996_v9 }
 0x1a0   :  { %v450_v22 = vpop.f32.mrf.mxu0 }
 0x1a1   :  { %7360 = vst [vmem:[#allocation9_spill] sm:$0xff] %v6031_v16  ;;  %v683_v2 = vpop.f32.mrf.mxu1 }
 0x1a2   :  { %5178 = vmatmul.msk.f32.gmra.mxu2 %vm48_vm0, %v1935_v3  ;;  %v684_v39 = vadd.f32 %v683_v2, %v450_v22  ;;  %v1321_v2 = vld [vmem:[#allocation2 + $0x73] sm:$0xff] }
 0x1a3   :  { %5101 = vmatmul.msk.f32.gmra.mxu0 %vm48_vm0, %v1318_v28  ;;  %5214 = vmatmul.msk.f32.gmra.mxu3 %vm48_vm0, %v2241_v29  ;;  %v2244_v29 = vld [vmem:[#allocation2 + $0x95] sm:$0xff] }
 0x1a4   :  { %5141 = vmatmul.msk.f32.gmra.mxu1 %vm48_vm0, %v1933_v41  ;;  %v1937_v41 = vld [vmem:[#allocation2 + $0x94] sm:$0xff] }
 0x1a5   :  { %v954_v31 = vpop.f32.mrf.mxu2 }
 0x1a6   :  { %v1258_v34 = vpop.f32.mrf.mxu3  ;;  %v998_v52 = vadd.f32 %v954_v31, %v684_v39 }
 0x1a7   :  { %v6037_v37 = vadd.f32 %v1258_v34, %v997_v30 }
 0x1a8   :  { %v453_v43 = vpop.f32.mrf.mxu0 }
 0x1a9   :  { %7361 = vst [vmem:[#allocation10_spill] sm:$0xff] %v6037_v37  ;;  %v686_v46 = vpop.f32.mrf.mxu1  ;;  %v2562_v37 = vld [vmem:[#allocation2 + $0xee] sm:$0xff] }
 0x1aa   :  { %5179 = vmatmul.msk.f32.gmra.mxu2 %vm48_vm0, %v1936_v25  ;;  %v687_v61 = vadd.f32 %v686_v46, %v453_v43 }
 0x1ab   :  { %5102 = vmatmul.msk.f32.gmra.mxu0 %vm48_vm0, %v1319_v44  ;;  %5215 = vmatmul.msk.f32.gmra.mxu3 %vm48_vm0, %v2242_v48  ;;  %v1322_v48 = vld [vmem:[#allocation2 + $0x7b] sm:$0xff] }
 0x1ac   :  { %5142 = vmatmul.msk.f32.gmra.mxu1 %vm48_vm0, %v1934_v55  ;;  %v1938_v55 = vld [vmem:[#allocation2 + $0x9c] sm:$0xff] }
 0x1ad   :  { %v957_v54 = vpop.f32.mrf.mxu2 }
 0x1ae   :  { %v1261_v56 = vpop.f32.mrf.mxu3  ;;  %v999_v9 = vadd.f32 %v957_v54, %v687_v61 }
 0x1af   :  { %v6043_v57 = vadd.f32 %v1261_v56, %v998_v52  ;;  %v2245_v52 = vld [vmem:[#allocation2 + $0x9d] sm:$0xff] }
 0x1b0   :  { %v456_v62 = vpop.f32.mrf.mxu0 }
 0x1b1   :  { %7362 = vst [vmem:[#allocation11_spill] sm:$0xff] %v6043_v57  ;;  %v689_v6 = vpop.f32.mrf.mxu1 }
 0x1b2   :  { %5180 = vmatmul.msk.f32.gmra.mxu2 %vm48_vm0, %v1937_v41  ;;  %v690_v22 = vadd.f32 %v689_v6, %v456_v62  ;;  %v1323_v6 = vld [vmem:[#allocation2 + $0x83] sm:$0xff] }
 0x1b3   :  { %5103 = vmatmul.msk.f32.gmra.mxu0 %vm48_vm0, %v1320_v0  ;;  %5216 = vmatmul.msk.f32.gmra.mxu3 %vm48_vm0, %v2243_v5 }
 0x1b4   :  { %5143 = vmatmul.msk.f32.gmra.mxu1 %vm48_vm0, %v1935_v3  ;;  %v1939_v3 = vld [vmem:[#allocation2 + $0xa4] sm:$0xff] }
 0x1b5   :  { %v960_v11 = vpop.f32.mrf.mxu2 }
 0x1b6   :  { %v1264_v14 = vpop.f32.mrf.mxu3  ;;  %v1000_v30 = vadd.f32 %v960_v11, %v690_v22 }
 0x1b7   :  { %v6049_v21 = vadd.f32 %v1264_v14, %v999_v9  ;;  %v1940_v9 = vld [vmem:[#allocation2 + $0xac] sm:$0xff] }
 0x1b8   :  { %v459_v28 = vpop.f32.mrf.mxu0 }
 0x1b9   :  { %7363 = vst [vmem:[#allocation12_spill] sm:$0xff] %v6049_v21  ;;  %v692_v31 = vpop.f32.mrf.mxu1  ;;  %v2554_v21 = vld [vmem:[#allocation2 + $0xae] sm:$0xff] }
 0x1ba   :  { %5181 = vmatmul.msk.f32.gmra.mxu2 %vm48_vm0, %v1938_v55  ;;  %v693_v44 = vadd.f32 %v692_v31, %v459_v28 }
 0x1bb   :  { %5104 = vmatmul.msk.f32.gmra.mxu0 %vm48_vm0, %v1321_v2  ;;  %5217 = vmatmul.msk.f32.gmra.mxu3 %vm48_vm0, %v2244_v29  ;;  %v1324_v2 = vld [vmem:[#allocation2 + $0x8b] sm:$0xff]  ;;  %v1941_v29 = vld [vmem:[#allocation2 + $0xb4] sm:$0xff] }
 0x1bc   :  { %5144 = vmatmul.msk.f32.gmra.mxu1 %vm48_vm0, %v1936_v25  ;;  %v2246_v25 = vld [vmem:[#allocation2 + $0xa5] sm:$0xff] }
 0x1bd   :  { %v963_v34 = vpop.f32.mrf.mxu2 }
 0x1be   :  { %v1267_v39 = vpop.f32.mrf.mxu3  ;;  %v1001_v54 = vadd.f32 %v963_v34, %v693_v44 }
 0x1bf   :  { %v6055_v43 = vadd.f32 %v1267_v39, %v1000_v30  ;;  %v2247_v30 = vld [vmem:[#allocation2 + $0xad] sm:$0xff]  ;;  %v591_v39 = vadd.f32 %v5780_v13, %v5778_v12 }
 0x1c0   :  { %v587_v46 = vpop.f32.mrf.mxu0 }
 0x1c1   :  { %7364 = vst [vmem:[#allocation13_spill] sm:$0xff] %v6055_v43  ;;  %v1779_v56 = vpop.f32.mrf.mxu1  ;;  %v588_v31 = vadd.f32 %v587_v46, %v5767_v7  ;;  %v2248_v46 = vld [vmem:[#allocation2 + $0xb5] sm:$0xff]  ;;  %v2553_v43 = vld [vmem:[#allocation2 + $0xa6] sm:$0xff] }
 0x1c2   :  { %5182 = vmatmul.msk.f32.gmra.mxu2 %vm48_vm0, %v1939_v3 }
 0x1c3   :  { %5105 = vmatmul.msk.f32.gmra.mxu0 %vm48_vm0, %v1322_v48  ;;  %5218 = vmatmul.msk.f32.gmra.mxu3 %vm48_vm0, %v2245_v52 }
 0x1c4   :  { %5145 = vmatmul.msk.f32.gmra.mxu1 %vm48_vm0, %v1937_v41 }
 0x1c5   :  { %v2086_v61 = vpop.f32.mrf.mxu2 }
 0x1c6   :  { %v1270_v62 = vpop.f32.mrf.mxu3 }
 0x1c7   :  { %v6061_v0 = vadd.f32 %v1270_v62, %v1001_v54  ;;  %v1325_v54 = vld [vmem:[#allocation2 + $0x93] sm:$0xff]  ;;  %v1942_v62 = vld [vmem:[#allocation2 + $0xbc] sm:$0xff] }
 0x1c8   :  { %v858_v5 = vpop.f32.mrf.mxu0 }
 0x1c9   :  { %7365 = vst [vmem:[#allocation14_spill] sm:$0xff] %v6061_v0  ;;  %v1782_v11 = vpop.f32.mrf.mxu1  ;;  %v966_v41 = vadd.f32 %v858_v5, %v588_v31  ;;  %v1943_v31 = vld [vmem:[#allocation2 + $0xc4] sm:$0xff] }
 0x1ca   :  { %5183 = vmatmul.msk.f32.gmra.mxu2 %vm48_vm0, %v1940_v9  ;;  %v2552_v0 = vld [vmem:[#allocation2 + $0x9e] sm:$0xff] }
 0x1cb   :  { %5106 = vmatmul.msk.f32.gmra.mxu0 %vm48_vm0, %v1323_v6  ;;  %5219 = vmatmul.msk.f32.gmra.mxu3 %vm48_vm0, %v2246_v25  ;;  %v967_v6 = vadd.f32 %v5788_v19, %v591_v39 }
 0x1cc   :  { %5146 = vmatmul.msk.f32.gmra.mxu1 %vm48_vm0, %v1938_v55 }
 0x1cd   :  { %v2089_v14 = vpop.f32.mrf.mxu2  ;;  %v1274_v13 = vadd.f32 %v5800_v27, %v967_v6 }
 0x1ce   :  { %v2393_v22 = vpop.f32.mrf.mxu3 }
 0x1d0   :  { %v1165_v28 = vpop.f32.mrf.mxu0 }
 0x1d1   :  { %v1785_v34 = vpop.f32.mrf.mxu1  ;;  %v1273_v44 = vadd.f32 %v1165_v28, %v966_v41 }
 0x1d2   :  { %5184 = vmatmul.msk.f32.gmra.mxu2 %vm48_vm0, %v1941_v29 }
 0x1d3   :  { %5107 = vmatmul.msk.f32.gmra.mxu0 %vm48_vm0, %v1324_v2  ;;  %5220 = vmatmul.msk.f32.gmra.mxu3 %vm48_vm0, %v2247_v30 }
 0x1d4   :  { %5147 = vmatmul.msk.f32.gmra.mxu1 %vm48_vm0, %v1939_v3  ;;  %v1326_v3 = vld [vmem:[#allocation2 + $0x9b] sm:$0xff] }
 0x1d5   :  { %v2092_v55 = vpop.f32.mrf.mxu2 }
 0x1d6   :  { %v2396_v48 = vpop.f32.mrf.mxu3 }
 0x1d8   :  { %v1472_v52 = vpop.f32.mrf.mxu0 }
 0x1d9   :  { %v1580_v7 = vadd.f32 %v1472_v52, %v1273_v44  ;;  %v1788_v30 = vpop.f32.mrf.mxu1  ;;  %v1327_v52 = vld [vmem:[#allocation2 + $0xa3] sm:$0xff] }
 0x1da   :  { %5185 = vmatmul.msk.f32.gmra.mxu2 %vm48_vm0, %v1942_v62 }
 0x1db   :  { %v1887_v25 = vadd.f32 %v1779_v56, %v1580_v7  ;;  %5108 = vmatmul.msk.f32.gmra.mxu0 %vm48_vm0, %v1325_v54  ;;  %5221 = vmatmul.msk.f32.gmra.mxu3 %vm48_vm0, %v2248_v46  ;;  %v2249_v56 = vld [vmem:[#allocation2 + $0xbd] sm:$0xff]  ;;  %v2250_v7 = vld [vmem:[#allocation2 + $0xc5] sm:$0xff] }
 0x1dc   :  { %5148 = vmatmul.msk.f32.gmra.mxu1 %vm48_vm0, %v1940_v9  ;;  %v1944_v9 = vld [vmem:[#allocation2 + $0xcc] sm:$0xff] }
 0x1dd   :  { %v2194_v12 = vadd.f32 %v2086_v61, %v1887_v25  ;;  %v2095_v41 = vpop.f32.mrf.mxu2 }
 0x1de   :  { %v2399_v28 = vpop.f32.mrf.mxu3 }
 0x1df   :  { %v6080_v5 = vadd.f32 %v2393_v22, %v2194_v12 }
 0x1e0   :  { %v1475_v2 = vpop.f32.mrf.mxu0 }
 0x1e1   :  { %v1581_v19 = vadd.f32 %v1475_v2, %v1274_v13  ;;  %v1791_v46 = vpop.f32.mrf.mxu1  ;;  %v1328_v13 = vld [vmem:[#allocation2 + $0xab] sm:$0xff] }
 0x1e2   :  { %5186 = vmatmul.msk.f32.gmra.mxu2 %vm48_vm0, %v1943_v31  ;;  %v2251_v2 = vld [vmem:[#allocation2 + $0xcd] sm:$0xff] }
 0x1e3   :  { %v1888_v39 = vadd.f32 %v1782_v11, %v1581_v19  ;;  %5109 = vmatmul.msk.f32.gmra.mxu0 %vm48_vm0, %v1326_v3  ;;  %5222 = vmatmul.msk.f32.gmra.mxu3 %vm48_vm0, %v2249_v56 }
 0x1e4   :  { %5149 = vmatmul.msk.f32.gmra.mxu1 %vm48_vm0, %v1941_v29  ;;  %v1945_v29 = vld [vmem:[#allocation2 + $0xd4] sm:$0xff] }
 0x1e5   :  { %v2195_v27 = vadd.f32 %v2089_v14, %v1888_v39  ;;  %v2098_v14 = vpop.f32.mrf.mxu2  ;;  %v1329_v39 = vld [vmem:[#allocation2 + $0xb3] sm:$0xff] }
 0x1e6   :  { %v2402_v22 = vpop.f32.mrf.mxu3 }
 0x1e7   :  { %v6086_v61 = vadd.f32 %v2396_v48, %v2195_v27 }
 0x1e8   :  { %v1478_v44 = vpop.f32.mrf.mxu0 }
 0x1e9   :  { %v1582_v54 = vadd.f32 %v1478_v44, %v5810_v38  ;;  %v1794_v3 = vpop.f32.mrf.mxu1 }
 0x1ea   :  { %5187 = vmatmul.msk.f32.gmra.mxu2 %vm48_vm0, %v1944_v9 }
 0x1eb   :  { %v1889_v11 = vadd.f32 %v1785_v34, %v1582_v54  ;;  %5110 = vmatmul.msk.f32.gmra.mxu0 %vm48_vm0, %v1327_v52  ;;  %5223 = vmatmul.msk.f32.gmra.mxu3 %vm48_vm0, %v2250_v7  ;;  %v1330_v7 = vld [vmem:[#allocation2 + $0xbb] sm:$0xff] }
 0x1ec   :  { %5150 = vmatmul.msk.f32.gmra.mxu1 %vm48_vm0, %v1942_v62  ;;  %v1946_v62 = vld [vmem:[#allocation2 + $0xdc] sm:$0xff] }
 0x1ed   :  { %v2196_v48 = vadd.f32 %v2092_v55, %v1889_v11 }
 0x1ee   :  { %v2405_v25 = vpop.f32.mrf.mxu3 }
 0x1ef   :  { %v6093_v6 = vadd.f32 %v2399_v28, %v2196_v48  ;;  %v2101_v28 = vpop.f32.mrf.mxu2  ;;  %v2253_v48 = vld [vmem:[#allocation2 + $0xdd] sm:$0xff] }
 0x1f0   :  { %v1481_v12 = vpop.f32.mrf.mxu0 }
 0x1f1   :  { %v1583_v38 = vadd.f32 %v1481_v12, %v5820_v49  ;;  %v1797_v52 = vpop.f32.mrf.mxu1 }
 0x1f2   :  { %5188 = vmatmul.msk.f32.gmra.mxu2 %vm48_vm0, %v1945_v29 }
 0x1f3   :  { %v1890_v34 = vadd.f32 %v1788_v30, %v1583_v38  ;;  %5111 = vmatmul.msk.f32.gmra.mxu0 %vm48_vm0, %v1328_v13  ;;  %5224 = vmatmul.msk.f32.gmra.mxu3 %vm48_vm0, %v2251_v2  ;;  %v2252_v30 = vld [vmem:[#allocation2 + $0xd5] sm:$0xff]  ;;  %v1331_v38 = vld [vmem:[#allocation2 + $0xc3] sm:$0xff] }
 0x1f4   :  { %5151 = vmatmul.msk.f32.gmra.mxu1 %vm48_vm0, %v1943_v31  ;;  %v1947_v31 = vld [vmem:[#allocation2 + $0xe4] sm:$0xff] }
 0x1f5   :  { %v2197_v55 = vadd.f32 %v2095_v41, %v1890_v34  ;;  %v2254_v34 = vld [vmem:[#allocation2 + $0xe5] sm:$0xff] }
 0x1f6   :  { %v2408_v27 = vpop.f32.mrf.mxu3 }
 0x1f7   :  { %v6100_v19 = vadd.f32 %v2402_v22, %v2197_v55  ;;  %v2104_v11 = vpop.f32.mrf.mxu2 }
 0x1f8   :  { %v1484_v56 = vpop.f32.mrf.mxu0 }
 0x1f9   :  { %v1584_v49 = vadd.f32 %v1484_v56, %v5830_v60  ;;  %v1800_v2 = vpop.f32.mrf.mxu1 }
 0x1fa   :  { %5189 = vmatmul.msk.f32.gmra.mxu2 %vm48_vm0, %v1946_v62 }
 0x1fb   :  { %v1891_v44 = vadd.f32 %v1791_v46, %v1584_v49  ;;  %5112 = vmatmul.msk.f32.gmra.mxu0 %vm48_vm0, %v1329_v39  ;;  %5225 = vmatmul.msk.f32.gmra.mxu3 %vm48_vm0, %v2252_v30  ;;  %v1332_v49 = vld [vmem:[#allocation2 + $0xcb] sm:$0xff] }
 0x1fc   :  { %5152 = vmatmul.msk.f32.gmra.mxu1 %vm48_vm0, %v1944_v9  ;;  %v1948_v9 = vld [vmem:[#allocation2 + $0xec] sm:$0xff] }
 0x1fd   :  { %v2198_v41 = vadd.f32 %v2098_v14, %v1891_v44  ;;  %v2255_v30 = vld [vmem:[#allocation2 + $0xed] sm:$0xff] }
 0x1fe   :  { %v2411_v46 = vpop.f32.mrf.mxu3 }
 0x1ff   :  { %v6107_v22 = vadd.f32 %v2405_v25, %v2198_v41  ;;  %v2107_v55 = vpop.f32.mrf.mxu2 }
 0x200   :  { %v1487_v54 = vpop.f32.mrf.mxu0 }
 0x201   :  { %v1585_v60 = vadd.f32 %v1487_v54, %v5836_v8  ;;  %v1803_v44 = vpop.f32.mrf.mxu1 }
 0x202   :  { %5190 = vmatmul.msk.f32.gmra.mxu2 %vm48_vm0, %v1947_v31 }
 0x203   :  { %v1892_v12 = vadd.f32 %v1794_v3, %v1585_v60  ;;  %5113 = vmatmul.msk.f32.gmra.mxu0 %vm48_vm0, %v1330_v7  ;;  %5226 = vmatmul.msk.f32.gmra.mxu3 %vm48_vm0, %v2253_v48  ;;  %v1333_v48 = vld [vmem:[#allocation2 + $0xd3] sm:$0xff] }
 0x204   :  { %5153 = vmatmul.msk.f32.gmra.mxu1 %vm48_vm0, %v1945_v29  ;;  %v1949_v29 = vld [vmem:[#allocation2 + $0xf4] sm:$0xff] }
 0x205   :  { %v2199_v14 = vadd.f32 %v2101_v28, %v1892_v12 }
 0x206   :  { %v2414_v56 = vpop.f32.mrf.mxu3 }
 0x207   :  { %v6114_v25 = vadd.f32 %v2408_v27, %v2199_v14 }
 0x208   :  { %v1490_v13 = vpop.f32.mrf.mxu0 }
 0x209   :  { %v1586_v8 = vadd.f32 %v1490_v13, %v5846_v23  ;;  %v1806_v14 = vpop.f32.mrf.mxu1 }
 0x20a   :  { %5191 = vmatmul.msk.f32.gmra.mxu2 %vm48_vm0, %v1948_v9 }
 0x20b   :  { %v1893_v3 = vadd.f32 %v1797_v52, %v1586_v8  ;;  %5114 = vmatmul.msk.f32.gmra.mxu0 %vm48_vm0, %v1331_v38  ;;  %5227 = vmatmul.msk.f32.gmra.mxu3 %vm48_vm0, %v2254_v34  ;;  %v2110_v52 = vpop.f32.mrf.mxu2  ;;  %v1334_v34 = vld [vmem:[#allocation2 + $0xdb] sm:$0xff] }
 0x20c   :  { %5154 = vmatmul.msk.f32.gmra.mxu1 %vm48_vm0, %v1946_v62  ;;  %v1950_v62 = vld [vmem:[#allocation2 + $0xfc] sm:$0xff] }
 0x20d   :  { %v2200_v28 = vadd.f32 %v2104_v11, %v1893_v3  ;;  %v2257_v3 = vld [vmem:[#allocation2 + $0xfd] sm:$0xff] }
 0x20e   :  { %v2417_v7 = vpop.f32.mrf.mxu3 }
 0x20f   :  { %v6121_v39 = vadd.f32 %v2411_v46, %v2200_v28  ;;  %v2256_v46 = vld [vmem:[#allocation2 + $0xf5] sm:$0xff] }
 0x210   :  { %v1493_v27 = vpop.f32.mrf.mxu0 }
 0x211   :  { %v1587_v23 = vadd.f32 %v1493_v27, %v5856_v35  ;;  %v1809_v27 = vpop.f32.mrf.mxu1 }
 0x212   :  { %5192 = vmatmul.msk.f32.gmra.mxu2 %vm48_vm0, %v1949_v29 }
 0x213   :  { %v1894_v41 = vadd.f32 %v1800_v2, %v1587_v23  ;;  %5115 = vmatmul.msk.f32.gmra.mxu0 %vm48_vm0, %v1332_v49  ;;  %5228 = vmatmul.msk.f32.gmra.mxu3 %vm48_vm0, %v2255_v30  ;;  %v2113_v38 = vpop.f32.mrf.mxu2  ;;  %v1335_v30 = vld [vmem:[#allocation2 + $0xe3] sm:$0xff] }
 0x214   :  { %5155 = vmatmul.msk.f32.gmra.mxu1 %vm48_vm0, %v1947_v31  ;;  %v1951_v31 = vld [vmem:[#allocation2 + $0x104] sm:$0xff] }
 0x215   :  { %v2201_v54 = vadd.f32 %v2107_v55, %v1894_v41  ;;  %v2258_v41 = vld [vmem:[#allocation2 + $0x105] sm:$0xff] }
 0x216   :  { %v2420_v55 = vpop.f32.mrf.mxu3 }
 0x217   :  { %v6128_v11 = vadd.f32 %v2414_v56, %v2201_v54 }
 0x218   :  { %v1496_v60 = vpop.f32.mrf.mxu0 }
 0x219   :  { %v1588_v35 = vadd.f32 %v1496_v60, %v5866_v47 }
 0x21a   :  { %5193 = vmatmul.msk.f32.gmra.mxu2 %vm48_vm0, %v1950_v62 }
 0x21b   :  { %v1895_v12 = vadd.f32 %v1803_v44, %v1588_v35  ;;  %5116 = vmatmul.msk.f32.gmra.mxu0 %vm48_vm0, %v1333_v48  ;;  %5229 = vmatmul.msk.f32.gmra.mxu3 %vm48_vm0, %v2256_v46  ;;  %v2116_v44 = vpop.f32.mrf.mxu2  ;;  %v1812_v35 = vpop.f32.mrf.mxu1  ;;  %v1336_v46 = vld [vmem:[#allocation2 + $0xeb] sm:$0xff] }
 0x21c   :  { %5156 = vmatmul.msk.f32.gmra.mxu1 %vm48_vm0, %v1948_v9  ;;  %v1952_v9 = vld [vmem:[#allocation2 + $0x10c] sm:$0xff] }
 0x21d   :  { %v2202_v13 = vadd.f32 %v2110_v52, %v1895_v12  ;;  %v2259_v12 = vld [vmem:[#allocation2 + $0x10d] sm:$0xff] }
 0x21e   :  { %v2423_v52 = vpop.f32.mrf.mxu3 }
 0x21f   :  { %v6135_v2 = vadd.f32 %v2417_v7, %v2202_v13 }
 0x220   :  { %v1499_v8 = vpop.f32.mrf.mxu0 }
 0x221   :  { %v1589_v47 = vadd.f32 %v1499_v8, %v5876_v59 }
 0x222   :  { %5194 = vmatmul.msk.f32.gmra.mxu2 %vm48_vm0, %v1951_v31 }
 0x223   :  { %v1896_v56 = vadd.f32 %v1806_v14, %v1589_v47  ;;  %5117 = vmatmul.msk.f32.gmra.mxu0 %vm48_vm0, %v1334_v34  ;;  %5230 = vmatmul.msk.f32.gmra.mxu3 %vm48_vm0, %v2257_v3  ;;  %v2119_v14 = vpop.f32.mrf.mxu2  ;;  %v1337_v47 = vld [vmem:[#allocation2 + $0xf3] sm:$0xff] }
 0x224   :  { %5157 = vmatmul.msk.f32.gmra.mxu1 %vm48_vm0, %v1949_v29  ;;  %v1953_v29 = vld [vmem:[#allocation2 + $0x114] sm:$0xff] }
 0x225   :  { %v2203_v28 = vadd.f32 %v2113_v38, %v1896_v56  ;;  %v1338_v56 = vld [vmem:[#allocation2 + $0xfb] sm:$0xff] }
 0x226   :  { %v2426_v38 = vpop.f32.mrf.mxu3 }
 0x227   :  { %v6142_v49 = vadd.f32 %v2420_v55, %v2203_v28  ;;  %v1955_v28 = vld [vmem:[#allocation2 + $0x124] sm:$0xff] }
 0x228   :  { %v1502_v23 = vpop.f32.mrf.mxu0 }
 0x229   :  { %v1590_v59 = vadd.f32 %v1502_v23, %v5886_v10 }
 0x22a   :  { %5195 = vmatmul.msk.f32.gmra.mxu2 %vm48_vm0, %v1952_v9 }
 0x22b   :  { %v1897_v54 = vadd.f32 %v1809_v27, %v1590_v59  ;;  %5118 = vmatmul.msk.f32.gmra.mxu0 %vm48_vm0, %v1335_v30  ;;  %5231 = vmatmul.msk.f32.gmra.mxu3 %vm48_vm0, %v2258_v41  ;;  %v2261_v27 = vld [vmem:[#allocation2 + $0x11d] sm:$0xff]  ;;  %v1340_v41 = vld [vmem:[#allocation2 + $0x10b] sm:$0xff] }
 0x22c   :  { %5158 = vmatmul.msk.f32.gmra.mxu1 %vm48_vm0, %v1950_v62  ;;  %v1954_v62 = vld [vmem:[#allocation2 + $0x11c] sm:$0xff] }
 0x22d   :  { %v2204_v7 = vadd.f32 %v2116_v44, %v1897_v54  ;;  %v1339_v30 = vld [vmem:[#allocation2 + $0x103] sm:$0xff]  ;;  %v1956_v44 = vld [vmem:[#allocation2 + $0x12c] sm:$0xff] }
 0x22e   :  { %v2263_v54 = vld [vmem:[#allocation2 + $0x12d] sm:$0xff] }
 0x22f   :  { %v6149_v60 = vadd.f32 %v2423_v52, %v2204_v7  ;;  %v1957_v52 = vld [vmem:[#allocation2 + $0x134] sm:$0xff] }
 0x230   :  { %v1505_v48 = vpop.f32.mrf.mxu0 }
 0x231   :  { %v1591_v10 = vadd.f32 %v1505_v48, %v5896_v26  ;;  %v2260_v26 = vld [vmem:[#allocation2 + $0x115] sm:$0xff] }
 0x232   :  { %5196 = vmatmul.msk.f32.gmra.mxu2 %vm48_vm0, %v1953_v29  ;;  %v1341_v48 = vld [vmem:[#allocation2 + $0x113] sm:$0xff] }
 0x233   :  { %v1898_v13 = vadd.f32 %v1812_v35, %v1591_v10  ;;  %5119 = vmatmul.msk.f32.gmra.mxu0 %vm48_vm0, %v1336_v46  ;;  %5232 = vmatmul.msk.f32.gmra.mxu3 %vm48_vm0, %v2259_v12  ;;  %v1958_v35 = vld [vmem:[#allocation2 + $0x13c] sm:$0xff] }
 0x234   :  { %5159 = vmatmul.msk.f32.gmra.mxu1 %vm48_vm0, %v1951_v31  ;;  %v5239_v31 = vld [vmem:[%s7346_s1 + $0x40] sm:$0xff]  ;;  %v2264_v46 = vld [vmem:[#allocation2 + $0x135] sm:$0xff] }
 0x235   :  { %v2205_v8 = vadd.f32 %v2119_v14, %v1898_v13  ;;  %2698 = vmatpush.msrb.mxu0 %v5239_v31  ;;  %v1342_v10 = vld [vmem:[#allocation2 + $0x11b] sm:$0xff]  ;;  %v1343_v13 = vld [vmem:[#allocation2 + $0x123] sm:$0xff] }
 0x236   :  { %v2265_v12 = vld [vmem:[#allocation2 + $0x13d] sm:$0xff] }
 0x237   :  { %v6156_v34 = vadd.f32 %v2426_v38, %v2205_v8  ;;  %v1344_v8 = vld [vmem:[#allocation2 + $0x12b] sm:$0xff] }
 0x238   :  { %v6158_v55 = vpop.f32.mrf.mxu0 }
 0x23a   :  { %5197 = vmatmul.msk.f32.gmra.mxu2 %vm48_vm0, %v1954_v62 }
 0x23b   :  { %5120 = vmatmul.msk.f32.gmra.mxu0 %vm48_vm0, %v1337_v47  ;;  %5233 = vmatmul.msk.f32.gmra.mxu3 %vm48_vm0, %v2260_v26 }
 0x23c   :  { %5160 = vmatmul.msk.f32.gmra.mxu1 %vm48_vm0, %v1952_v9  ;;  %v2262_v9 = vld [vmem:[#allocation2 + $0x125] sm:$0xff] }
 0x240   :  { %v6164_v3 = vpop.f32.mrf.mxu0 }
 0x242   :  { %5198 = vmatmul.msk.f32.gmra.mxu2 %vm48_vm0, %v1955_v28 }
 0x243   :  { %5121 = vmatmul.msk.f32.gmra.mxu0 %vm48_vm0, %v1338_v56  ;;  %5234 = vmatmul.msk.f32.gmra.mxu3 %vm48_vm0, %v2261_v27  ;;  %v2538_v56 = vld [vmem:[#allocation2 + $0x2e] sm:$0xff]  ;;  %v2539_v27 = vld [vmem:[#allocation2 + $0x36] sm:$0xff] }
 0x244   :  { %5161 = vmatmul.msk.f32.gmra.mxu1 %vm48_vm0, %v1953_v29 }
 0x248   :  { %v6173_v23 = vpop.f32.mrf.mxu0 }
 0x24a   :  { %5199 = vmatmul.msk.f32.gmra.mxu2 %vm48_vm0, %v1956_v44 }
 0x24b   :  { %5122 = vmatmul.msk.f32.gmra.mxu0 %vm48_vm0, %v1339_v30  ;;  %5235 = vmatmul.msk.f32.gmra.mxu3 %vm48_vm0, %v2262_v9  ;;  %v2540_v30 = vld [vmem:[#allocation2 + $0x3e] sm:$0xff]  ;;  %v2541_v9 = vld [vmem:[#allocation2 + $0x46] sm:$0xff] }
 0x24c   :  { %5162 = vmatmul.msk.f32.gmra.mxu1 %vm48_vm0, %v1954_v62  ;;  %v2537_v62 = vld [vmem:[#allocation2 + $0x26] sm:$0xff] }
 0x250   :  { %v6179_v59 = vpop.f32.mrf.mxu0 }
 0x252   :  { %5200 = vmatmul.msk.f32.gmra.mxu2 %vm48_vm0, %v1957_v52  ;;  %v2542_v52 = vld [vmem:[#allocation2 + $0x4e] sm:$0xff] }
 0x253   :  { %5123 = vmatmul.msk.f32.gmra.mxu0 %vm48_vm0, %v1340_v41  ;;  %5236 = vmatmul.msk.f32.gmra.mxu3 %vm48_vm0, %v2263_v54 }
 0x254   :  { %5163 = vmatmul.msk.f32.gmra.mxu1 %vm48_vm0, %v1955_v28 }
 0x258   :  { %v6185_v7 = vpop.f32.mrf.mxu0 }
 0x25a   :  { %5201 = vmatmul.msk.f32.gmra.mxu2 %vm48_vm0, %v1958_v35 }
 0x25b   :  { %5124 = vmatmul.msk.f32.gmra.mxu0 %vm48_vm0, %v1341_v48  ;;  %5237 = vmatmul.msk.f32.gmra.mxu3 %vm48_vm0, %v2264_v46  ;;  %v2543_v48 = vld [vmem:[#allocation2 + $0x56] sm:$0xff]  ;;  %v2544_v46 = vld [vmem:[#allocation2 + $0x5e] sm:$0xff] }
 0x25c   :  { %5164 = vmatmul.msk.f32.gmra.mxu1 %vm48_vm0, %v1956_v44 }
 0x260   :  { %v6191_v29 = vpop.f32.mrf.mxu0 }
 0x263   :  { %5125 = vmatmul.msk.f32.gmra.mxu0 %vm48_vm0, %v1342_v10  ;;  %5238 = vmatmul.msk.f32.gmra.mxu3 %vm48_vm0, %v2265_v12  ;;  %v2545_v12 = vld [vmem:[#allocation2 + $0x66] sm:$0xff] }
 0x268   :  { %v6196_v14 = vpop.f32.mrf.mxu0 }
 0x26b   :  { %5126 = vmatmul.msk.f32.gmra.mxu0 %vm48_vm0, %v1343_v13 }
 0x270   :  { %v6199_v38 = vpop.f32.mrf.mxu0 }
 0x273   :  { %5127 = vmatmul.msk.f32.gmra.mxu0 %vm48_vm0, %v1344_v8  ;;  %v2546_v8 = vld [vmem:[#allocation2 + $0x6e] sm:$0xff] }
 0x278   :  { %v6202_v47 = vpop.f32.mrf.mxu0 }
 0x27b   :  { %5240 = vmatmul.msk.f32.vlgmr.msrb.gmra.mxu0 %vm48_vm0, %v2537_v62 }
 0x280   :  { %v6205_v26 = vpop.f32.mrf.mxu0 }
 0x283   :  { %5241 = vmatmul.msk.f32.gmra.mxu0 %vm48_vm0, %v2538_v56  ;;  %v2547_v56 = vld [vmem:[#allocation2 + $0x76] sm:$0xff] }
 0x288   :  { %v6208_v28 = vpop.f32.mrf.mxu0 }
 0x28b   :  { %5242 = vmatmul.msk.f32.gmra.mxu0 %vm48_vm0, %v2539_v27 }
 0x290   :  { %v6211_v31 = vpop.f32.mrf.mxu0 }
 0x293   :  { %5243 = vmatmul.msk.f32.gmra.mxu0 %vm48_vm0, %v2540_v30  ;;  %v2548_v30 = vld [vmem:[#allocation2 + $0x7e] sm:$0xff] }
 0x298   :  { %v6214_v44 = vpop.f32.mrf.mxu0 }
 0x29b   :  { %5244 = vmatmul.msk.f32.gmra.mxu0 %vm48_vm0, %v2541_v9 }
 0x2a0   :  { %v6217_v41 = vpop.f32.mrf.mxu0 }
 0x2a3   :  { %5245 = vmatmul.msk.f32.gmra.mxu0 %vm48_vm0, %v2542_v52  ;;  %v2549_v52 = vld [vmem:[#allocation2 + $0x86] sm:$0xff] }
 0x2a8   :  { %v6220_v54 = vpop.f32.mrf.mxu0 }
 0x2ab   :  { %5246 = vmatmul.msk.f32.gmra.mxu0 %vm48_vm0, %v2543_v48 }
 0x2b0   :  { %v6223_v35 = vpop.f32.mrf.mxu0 }
 0x2b3   :  { %5247 = vmatmul.msk.f32.gmra.mxu0 %vm48_vm0, %v2544_v46  ;;  %v2550_v46 = vld [vmem:[#allocation2 + $0x8e] sm:$0xff] }
 0x2b8   :  { %v6226_v10 = vpop.f32.mrf.mxu0 }
 0x2bb   :  { %5248 = vmatmul.msk.f32.gmra.mxu0 %vm48_vm0, %v2545_v12 }
 0x2c0   :  { %v6229_v13 = vpop.f32.mrf.mxu0 }
 0x2c1   :  { %7366 = vst [vmem:[#allocation15_spill] sm:$0xff] %v6229_v13 }
 0x2c3   :  { %5249 = vmatmul.msk.f32.gmra.mxu0 %vm48_vm0, %v2546_v8  ;;  %v2551_v8 = vld [vmem:[#allocation2 + $0x96] sm:$0xff] }
 0x2c8   :  { %v6232_v62 = vpop.f32.mrf.mxu0 }
 0x2c9   :  { %7367 = vst [vmem:[#allocation16_spill] sm:$0xff] %v6232_v62  ;;  %v2563_v62 = vld [vmem:[#allocation2 + $0xf6] sm:$0xff] }
 0x2cb   :  { %5250 = vmatmul.msk.f32.gmra.mxu0 %vm48_vm0, %v2547_v56 }
 0x2d0   :  { %v6235_v27 = vpop.f32.mrf.mxu0 }
 0x2d1   :  { %7368 = vst [vmem:[#allocation17_spill] sm:$0xff] %v6235_v27  ;;  %v2555_v27 = vld [vmem:[#allocation2 + $0xb6] sm:$0xff] }
 0x2d3   :  { %5251 = vmatmul.msk.f32.gmra.mxu0 %vm48_vm0, %v2548_v30  ;;  %v6253_v30 = vld [vmem:[%s7347_s2] ss:$0 sm:$0xff] }
 0x2d8   :  { %v6238_v9 = vpop.f32.mrf.mxu0 }
 0x2d9   :  { %7369 = vst [vmem:[#allocation18_spill] sm:$0xff] %v6238_v9 }
 0x2db   :  { %5252 = vmatmul.msk.f32.gmra.mxu0 %vm48_vm0, %v2549_v52 }
 0x2e0   :  { %v6241_v48 = vpop.f32.mrf.mxu0 }
 0x2e1   :  { %7370 = vst [vmem:[#allocation19_spill] sm:$0xff] %v6241_v48 }
 0x2e3   :  { %5253 = vmatmul.msk.f32.gmra.mxu0 %vm48_vm0, %v2550_v46  ;;  %v6259_v46 = vld [vmem:[%s7348_s3] ss:$0 sm:$0xff] }
 0x2e8   :  { %v6244_v12 = vpop.f32.mrf.mxu0 }
 0x2e9   :  { %7371 = vst [vmem:[#allocation20_spill] sm:$0xff] %v6244_v12 }
 0x2eb   :  { %5254 = vmatmul.msk.f32.gmra.mxu0 %vm48_vm0, %v2551_v8 }
 0x2f0   :  { %v6247_v56 = vpop.f32.mrf.mxu0 }
 0x2f1   :  { %7372 = vst [vmem:[#allocation21_spill] sm:$0xff] %v6247_v56 }
 0x2f3   :  { %5255 = vmatmul.msk.f32.gmra.mxu0 %vm48_vm0, %v2552_v0 }
 0x2f8   :  { %v2700_v52 = vpop.f32.mrf.mxu0 }
 0x2f9   :  { %v2808_v48 = vadd.f32 %v2700_v52, %v6080_v5 }
 0x2fb   :  { %v2848_v8 = vmul.f32 %v6253_v30, %v2808_v48  ;;  %5256 = vmatmul.msk.f32.gmra.mxu0 %vm48_vm0, %v2553_v43 }
 0x2fd   :  { %v2888_v0 = vadd.f32 %v6259_v46, %v2848_v8 }
 0x2ff   :  { %v2924_v56 = vmax.f32 %v2888_v0, 0.0 }
 0x300   :  { %v2703_v12 = vpop.f32.mrf.mxu0 }
 0x301   :  { %2961 = vst.msk [vmem:[#allocation3] sm:$0xff] %vm2960_vm1, %v2924_v56  ;;  %v2809_v9 = vadd.f32 %v2703_v12, %v6086_v61 }
 0x303   :  { %v2849_v5 = vmul.f32 %v6253_v30, %v2809_v9  ;;  %5257 = vmatmul.msk.f32.gmra.mxu0 %vm48_vm0, %v2554_v21  ;;  %v2556_v9 = vld [vmem:[#allocation2 + $0xbe] sm:$0xff] }
 0x305   :  { %v2889_v52 = vadd.f32 %v6259_v46, %v2849_v5 }
 0x307   :  { %v2925_v57 = vmax.f32 %v2889_v52, 0.0  ;;  %v2557_v52 = vld [vmem:[#allocation2 + $0xc6] sm:$0xff] }
 0x308   :  { %v2706_v48 = vpop.f32.mrf.mxu0 }
 0x309   :  { %2962 = vst.msk [vmem:[#allocation3 + $0x8] sm:$0xff] %vm2960_vm1, %v2925_v57  ;;  %v2810_v43 = vadd.f32 %v2706_v48, %v6093_v6 }
 0x30b   :  { %v2850_v8 = vmul.f32 %v6253_v30, %v2810_v43  ;;  %5258 = vmatmul.msk.f32.gmra.mxu0 %vm48_vm0, %v2555_v27 }
 0x30d   :  { %v2890_v56 = vadd.f32 %v6259_v46, %v2850_v8 }
 0x30f   :  { %v2926_v61 = vmax.f32 %v2890_v56, 0.0 }
 0x310   :  { %v2709_v12 = vpop.f32.mrf.mxu0 }
 0x311   :  { %2963 = vst.msk [vmem:[#allocation3 + $0x10] sm:$0xff] %vm2960_vm1, %v2926_v61  ;;  %v2811_v21 = vadd.f32 %v2709_v12, %v6100_v19  ;;  %v6284_v19 = vpop.f32.mrf.mxu1  ;;  %v2558_v61 = vld [vmem:[#allocation2 + $0xce] sm:$0xff] }
 0x313   :  { %v2851_v0 = vmul.f32 %v6253_v30, %v2811_v21  ;;  %5259 = vmatmul.msk.f32.gmra.mxu0 %vm48_vm0, %v2556_v9  ;;  %v6288_v9 = vpop.f32.mrf.mxu2 }
 0x315   :  { %v2891_v57 = vadd.f32 %v6259_v46, %v2851_v0  ;;  %v6293_v0 = vpop.f32.mrf.mxu3 }
 0x317   :  { %v2927_v6 = vmax.f32 %v2891_v57, 0.0 }
 0x318   :  { %v2712_v5 = vpop.f32.mrf.mxu0 }
 0x319   :  { %2964 = vst.msk [vmem:[#allocation3 + $0x18] sm:$0xff] %vm2960_vm1, %v2927_v6  ;;  %v2812_v27 = vadd.f32 %v2712_v5, %v6107_v22  ;;  %v6295_v6 = vpop.f32.mrf.mxu1 }
 0x31b   :  { %v2852_v48 = vmul.f32 %v6253_v30, %v2812_v27  ;;  %5260 = vmatmul.msk.f32.gmra.mxu0 %vm48_vm0, %v2557_v52  ;;  %v2559_v52 = vld [vmem:[#allocation2 + $0xd6] sm:$0xff] }
 0x31d   :  { %v2892_v43 = vadd.f32 %v6259_v46, %v2852_v48  ;;  %v6301_v48 = vpop.f32.mrf.mxu2 }
 0x31f   :  { %v2928_v8 = vmax.f32 %v2892_v43, 0.0 }
 0x320   :  { %v2715_v56 = vpop.f32.mrf.mxu0 }
 0x321   :  { %2965 = vst.msk [vmem:[#allocation3 + $0x20] sm:$0xff] %vm2960_vm1, %v2928_v8  ;;  %v2813_v12 = vadd.f32 %v2715_v56, %v6114_v25  ;;  %v6304_v56 = vpop.f32.mrf.mxu3 }
 0x323   :  { %v2853_v21 = vmul.f32 %v6253_v30, %v2813_v12  ;;  %5261 = vmatmul.msk.f32.gmra.mxu0 %vm48_vm0, %v2558_v61  ;;  %v2560_v12 = vld [vmem:[#allocation2 + $0xde] sm:$0xff] }
 0x325   :  { %v2893_v22 = vadd.f32 %v6259_v46, %v2853_v21 }
 0x327   :  { %v2929_v57 = vmax.f32 %v2893_v22, 0.0  ;;  %v6308_v22 = vpop.f32.mrf.mxu1 }
 0x328   :  { %v2718_v5 = vpop.f32.mrf.mxu0 }
 0x329   :  { %2966 = vst.msk [vmem:[#allocation3 + $0x28] sm:$0xff] %vm2960_vm1, %v2929_v57  ;;  %v2814_v27 = vadd.f32 %v2718_v5, %v6121_v39  ;;  %v6313_v5 = vpop.f32.mrf.mxu2 }
 0x32b   :  { %v2854_v25 = vmul.f32 %v6253_v30, %v2814_v27  ;;  %5262 = vmatmul.msk.f32.gmra.mxu0 %vm48_vm0, %v2559_v52 }
 0x32d   :  { %v2894_v43 = vadd.f32 %v6259_v46, %v2854_v25  ;;  %v2561_v25 = vld [vmem:[#allocation2 + $0xe6] sm:$0xff] }
 0x32f   :  { %v2930_v8 = vmax.f32 %v2894_v43, 0.0 }
 0x330   :  { %v2721_v61 = vpop.f32.mrf.mxu0 }
 0x331   :  { %2967 = vst.msk [vmem:[#allocation3 + $0x30] sm:$0xff] %vm2960_vm1, %v2930_v8  ;;  %v2815_v21 = vadd.f32 %v2721_v61, %v6128_v11  ;;  %v6317_v8 = vpop.f32.mrf.mxu3  ;;  %v6321_v61 = vpop.f32.mrf.mxu1 }
 0x333   :  { %v2855_v39 = vmul.f32 %v6253_v30, %v2815_v21  ;;  %5263 = vmatmul.msk.f32.gmra.mxu0 %vm48_vm0, %v2560_v12 }
 0x335   :  { %v2895_v57 = vadd.f32 %v6259_v46, %v2855_v39  ;;  %v6324_v39 = vpop.f32.mrf.mxu2 }
 0x337   :  { %v2931_v52 = vmax.f32 %v2895_v57, 0.0 }
 0x338   :  { %v2724_v27 = vpop.f32.mrf.mxu0 }
 0x339   :  { %2968 = vst.msk [vmem:[#allocation3 + $0x38] sm:$0xff] %vm2960_vm1, %v2931_v52  ;;  %v2816_v43 = vadd.f32 %v2724_v27, %v6135_v2  ;;  %v6330_v27 = vpop.f32.mrf.mxu3 }
 0x33b   :  { %v2856_v11 = vmul.f32 %v6253_v30, %v2816_v43  ;;  %5264 = vmatmul.msk.f32.gmra.mxu0 %vm48_vm0, %v2561_v25  ;;  %v6333_v43 = vpop.f32.mrf.mxu1 }
 0x33d   :  { %v2896_v12 = vadd.f32 %v6259_v46, %v2856_v11 }
 0x33f   :  { %v2932_v21 = vmax.f32 %v2896_v12, 0.0 }
 0x340   :  { %v2727_v57 = vpop.f32.mrf.mxu0 }
 0x341   :  { %2969 = vst.msk [vmem:[#allocation3 + $0x40] sm:$0xff] %vm2960_vm1, %v2932_v21  ;;  %v2817_v52 = vadd.f32 %v2727_v57, %v6142_v49  ;;  %v6337_v21 = vpop.f32.mrf.mxu2  ;;  %v1592_v49 = vadd.f32 %v6158_v55, %v5906_v40 }
 0x343   :  { %v2857_v2 = vmul.f32 %v6253_v30, %v2817_v52  ;;  %5265 = vmatmul.msk.f32.gmra.mxu0 %vm48_vm0, %v2562_v37  ;;  %v6344_v52 = vpop.f32.mrf.mxu3  ;;  %v6347_v13 = vpop.f32.mrf.mxu1 }
 0x345   :  { %v2897_v25 = vadd.f32 %v6259_v46, %v2857_v2  ;;  %v1899_v2 = vadd.f32 %v6284_v19, %v1592_v49 }
 0x347   :  { %v2933_v11 = vmax.f32 %v2897_v25, 0.0  ;;  %v2206_v40 = vadd.f32 %v6288_v9, %v1899_v2  ;;  %v2565_v9 = vld [vmem:[#allocation2 + $0x106] sm:$0xff] }
 0x348   :  { %v2730_v12 = vpop.f32.mrf.mxu0 }
 0x349   :  { %2970 = vst.msk [vmem:[#allocation3 + $0x48] sm:$0xff] %vm2960_vm1, %v2933_v11  ;;  %v2818_v16 = vadd.f32 %v2730_v12, %v6149_v60  ;;  %v2564_v60 = vld [vmem:[#allocation2 + $0xfe] sm:$0xff]  ;;  %v2513_v49 = vadd.f32 %v6293_v0, %v2206_v40 }
 0x34b   :  { %v2858_v37 = vmul.f32 %v6253_v30, %v2818_v16  ;;  %5266 = vmatmul.msk.f32.gmra.mxu0 %vm48_vm0, %v2563_v62  ;;  %v1593_v16 = vadd.f32 %v6164_v3, %v5916_v53  ;;  %v6356_v62 = vpop.f32.mrf.mxu2  ;;  %v6364_v3 = vpop.f32.mrf.mxu1 }
 0x34d   :  { %v2898_v57 = vadd.f32 %v6259_v46, %v2858_v37  ;;  %v1900_v37 = vadd.f32 %v6295_v6, %v1593_v16 }
 0x34f   :  { %v2934_v25 = vmax.f32 %v2898_v57, 0.0  ;;  %v2207_v2 = vadd.f32 %v6301_v48, %v1900_v37 }
 0x350   :  { %v2733_v11 = vpop.f32.mrf.mxu0 }
 0x351   :  { %2971 = vst.msk [vmem:[#allocation3 + $0x50] sm:$0xff] %vm2960_vm1, %v2934_v25  ;;  %v2819_v12 = vadd.f32 %v2733_v11, %v6156_v34  ;;  %v6361_v25 = vpop.f32.mrf.mxu3  ;;  %v1594_v11 = vadd.f32 %v6173_v23, %v5922_v1  ;;  %v1595_v23 = vadd.f32 %v6179_v59, %v5928_v18  ;;  %v1596_v59 = vadd.f32 %v6185_v7, %v5934_v32 }
 0x352   :  { %v1597_v7 = vadd.f32 %v6191_v29, %v5940_v45  ;;  %v1598_v29 = vadd.f32 %v6196_v14, %v5946_v58 }
 0x353   :  { %v2859_v55 = vmul.f32 %v6253_v30, %v2819_v12  ;;  %5267 = vmatmul.msk.f32.gmra.mxu0 %vm48_vm0, %v2564_v60  ;;  %v6372_v6 = vpop.f32.mrf.mxu2  ;;  %v2514_v12 = vadd.f32 %v6304_v56, %v2207_v2  ;;  %v1901_v40 = vadd.f32 %v6308_v22, %v1594_v11  ;;  %v1836_v56 = vpop.f32.mrf.mxu1  ;;  %v2567_v11 = vld [vmem:[#allocation2 + $0x116] sm:$0xff] }
 0x355   :  { %v2899_v19 = vadd.f32 %v6259_v46, %v2859_v55  ;;  %v2208_v1 = vadd.f32 %v6313_v5, %v1901_v40  ;;  %v1903_v40 = vadd.f32 %v6333_v43, %v1596_v59 }
 0x357   :  { %v2935_v57 = vmax.f32 %v2899_v19, 0.0  ;;  %v2566_v19 = vld [vmem:[#allocation2 + $0x10e] sm:$0xff]  ;;  %v2210_v32 = vadd.f32 %v6337_v21, %v1903_v40 }
 0x358   :  { %v2736_v34 = vpop.f32.mrf.mxu0 }
 0x359   :  { %2972 = vst.msk [vmem:[#allocation3 + $0x58] sm:$0xff] %vm2960_vm1, %v2935_v57  ;;  %v2820_v53 = vadd.f32 %v2736_v34, %v2513_v49  ;;  %v6377_v49 = vpop.f32.mrf.mxu3  ;;  %v2515_v57 = vadd.f32 %v6317_v8, %v2208_v1  ;;  %v1902_v34 = vadd.f32 %v6321_v61, %v1595_v23  ;;  %v2517_v43 = vadd.f32 %v6344_v52, %v2210_v32  ;;  %v2571_v32 = vld [vmem:[#allocation2 + $0x136] sm:$0xff] }
 0x35b   :  { %v2860_v60 = vmul.f32 %v6253_v30, %v2820_v53  ;;  %5268 = vmatmul.msk.f32.gmra.mxu0 %vm48_vm0, %v2565_v9  ;;  %v6387_v53 = vpop.f32.mrf.mxu2  ;;  %v2209_v18 = vadd.f32 %v6324_v39, %v1902_v34 }
 0x35d   :  { %v2900_v0 = vadd.f32 %v6259_v46, %v2860_v60 }
 0x35f   :  { %v2936_v16 = vmax.f32 %v2900_v0, 0.0  ;;  %v1839_v0 = vpop.f32.mrf.mxu1 }
 0x360   :  { %v2739_v55 = vpop.f32.mrf.mxu0 }
 0x361   :  { %2973 = vst.msk [vmem:[#allocation3 + $0x60] sm:$0xff] %vm2960_vm1, %v2936_v16  ;;  %v2821_v48 = vadd.f32 %v2739_v55, %v2514_v12  ;;  %v2450_v8 = vpop.f32.mrf.mxu3  ;;  %v2516_v12 = vadd.f32 %v6330_v27, %v2209_v18 }
 0x363   :  { %v2861_v37 = vmul.f32 %v6253_v30, %v2821_v48  ;;  %5269 = vmatmul.msk.f32.gmra.mxu0 %vm48_vm0, %v2566_v19  ;;  %v2568_v19 = vld [vmem:[#allocation2 + $0x11e] sm:$0xff]  ;;  %v2146_v48 = vpop.f32.mrf.mxu2 }
 0x365   :  { %v2901_v22 = vadd.f32 %v6259_v46, %v2861_v37  ;;  %v1904_v37 = vadd.f32 %v6347_v13, %v1597_v7 }
 0x367   :  { %v2937_v9 = vmax.f32 %v2901_v22, 0.0  ;;  %v2211_v45 = vadd.f32 %v6356_v62, %v1904_v37  ;;  %v2570_v62 = vld [vmem:[#allocation2 + $0x12e] sm:$0xff] }
 0x368   :  { %v2742_v2 = vpop.f32.mrf.mxu0 }
 0x369   :  { %2974 = vst.msk [vmem:[#allocation3 + $0x68] sm:$0xff] %vm2960_vm1, %v2937_v9  ;;  %v2822_v5 = vadd.f32 %v2742_v2, %v2515_v57  ;;  %v6405_v23 = vpop.f32.mrf.mxu3  ;;  %v1842_v57 = vpop.f32.mrf.mxu1  ;;  %v2569_v9 = vld [vmem:[#allocation2 + $0x126] sm:$0xff]  ;;  %v2518_v52 = vadd.f32 %v6361_v25, %v2211_v45 }
 0x36b   :  { %v2862_v60 = vmul.f32 %v6253_v30, %v2822_v5  ;;  %5270 = vmatmul.msk.f32.gmra.mxu0 %vm48_vm0, %v2567_v11  ;;  %v6415_v11 = vpop.f32.mrf.mxu2  ;;  %v1905_v5 = vadd.f32 %v6364_v3, %v1598_v29 }
 0x36d   :  { %v2902_v61 = vadd.f32 %v6259_v46, %v2862_v60 }
 0x36f   :  { %v2938_v16 = vmax.f32 %v2902_v61, 0.0  ;;  %v2212_v61 = vadd.f32 %v6372_v6, %v1905_v5 }
 0x370   :  { %v2745_v55 = vpop.f32.mrf.mxu0 }
 0x371   :  { %2975 = vst.msk [vmem:[#allocation3 + $0x70] sm:$0xff] %vm2960_vm1, %v2938_v16  ;;  %v2823_v39 = vadd.f32 %v2745_v55, %v2516_v12  ;;  %v6420_v59 = vpop.f32.mrf.mxu3  ;;  %v6423_v14 = vpop.f32.mrf.mxu1  ;;  %v1599_v12 = vadd.f32 %v6199_v38, %v5961_v20  ;;  %v2519_v16 = vadd.f32 %v6377_v49, %v2212_v61  ;;  %v1600_v38 = vadd.f32 %v6202_v47, %v5970_v36 }
 0x372   :  { %v1601_v36 = vadd.f32 %v6205_v26, %v5977_v50 }
 0x373   :  { %v2863_v1 = vmul.f32 %v6253_v30, %v2823_v39  ;;  %5271 = vmatmul.msk.f32.gmra.mxu0 %vm48_vm0, %v2568_v19  ;;  %v6431_v3 = vpop.f32.mrf.mxu2  ;;  %v1906_v55 = vadd.f32 %v1836_v56, %v1599_v12 }
 0x375   :  { %v2903_v27 = vadd.f32 %v6259_v46, %v2863_v1  ;;  %v2213_v20 = vadd.f32 %v6387_v53, %v1906_v55 }
 0x377   :  { %v2939_v22 = vmax.f32 %v2903_v27, 0.0  ;;  %v2520_v56 = vadd.f32 %v2450_v8, %v2213_v20 }
 0x378   :  { %v2748_v34 = vpop.f32.mrf.mxu0 }
 0x379   :  { %2976 = vst.msk [vmem:[#allocation3 + $0x78] sm:$0xff] %vm2960_vm1, %v2939_v22  ;;  %v2824_v21 = vadd.f32 %v2748_v34, %v2517_v43  ;;  %v6435_v7 = vpop.f32.mrf.mxu3  ;;  %v6442_v27 = vpop.f32.mrf.mxu1  ;;  %v1907_v43 = vadd.f32 %v1839_v0, %v1600_v38  ;;  %v1908_v0 = vadd.f32 %v1842_v57, %v1601_v36 }
 0x37b   :  { %v2864_v2 = vmul.f32 %v6253_v30, %v2824_v21  ;;  %5272 = vmatmul.msk.f32.gmra.mxu0 %vm48_vm0, %v2569_v9  ;;  %v6445_v22 = vpop.f32.mrf.mxu2  ;;  %v2572_v9 = vld [vmem:[#allocation2 + $0x13e] sm:$0xff]  ;;  %v2214_v47 = vadd.f32 %v2146_v48, %v1907_v43  ;;  %v2215_v55 = vadd.f32 %v6415_v11, %v1908_v0  ;;  %v3043_v43 = vld [vmem:[#allocation3 + $0x61] sm:$0xff] }
 0x37c   :  { %v3109_v0 = vld [vmem:[#allocation3 + $0x62] sm:$0xff] }
 0x37d   :  { %v2904_v13 = vadd.f32 %v6259_v46, %v2864_v2  ;;  %v2521_v5 = vadd.f32 %v6405_v23, %v2214_v47  ;;  %v1602_v23 = vadd.f32 %v6208_v28, %v5983_v63  ;;  %v3042_v28 = vld [vmem:[#allocation3 + $0x59] sm:$0xff]  ;;  %v2522_v36 = vadd.f32 %v6420_v59, %v2215_v55 }
 0x37e   :  { %v3142_v59 = vld [vmem:[#allocation3 + $0x5b] sm:$0xff]  ;;  %v3107_v55 = vld [vmem:[#allocation3 + $0x52] sm:$0xff] }
 0x37f   :  { %v2940_v18 = vmax.f32 %v2904_v13, 0.0  ;;  %v1909_v47 = vadd.f32 %v6423_v14, %v1602_v23  ;;  %v3141_v23 = vld [vmem:[#allocation3 + $0x53] sm:$0xff] }
 0x380   :  { %v2751_v60 = vpop.f32.mrf.mxu0  ;;  %v3045_v50 = vld [vmem:[#allocation3 + $0x71] sm:$0xff] }
 0x381   :  { %2977 = vst.msk [vmem:[#allocation3 + $0x80] sm:$0xff] %vm2960_vm1, %v2940_v18  ;;  %v2825_v58 = vadd.f32 %v2751_v60, %v2518_v52  ;;  %v6452_v45 = vpop.f32.mrf.mxu3  ;;  %v6455_v29 = vpop.f32.mrf.mxu1  ;;  %v3012_v60 = vld [vmem:[#allocation3 + $0x78] sm:$0xff] }
 0x383   :  { %v2865_v40 = vmul.f32 %v6253_v30, %v2825_v58  ;;  %5273 = vmatmul.msk.f32.gmra.mxu0 %vm48_vm0, %v2570_v62 }
 0x385   :  { %v2905_v25 = vadd.f32 %v6259_v46, %v2865_v40 }
 0x387   :  { %v2941_v19 = vmax.f32 %v2905_v25, 0.0  ;;  %v3011_v25 = vld [vmem:[#allocation3 + $0x70] sm:$0xff] }
 0x388   :  { %v2754_v39 = vpop.f32.mrf.mxu0  ;;  %v3046_v2 = vld [vmem:[#allocation3 + $0x79] sm:$0xff] }
 0x389   :  { %2978 = vst.msk [vmem:[#allocation3 + $0x88] sm:$0xff] %vm2960_vm1, %v2941_v19  ;;  %v2826_v6 = vadd.f32 %v2754_v39, %v2519_v16  ;;  %v3112_v26 = vld [vmem:[#allocation3 + $0x7a] sm:$0xff]  ;;  %v3080_v40 = vmax.f32 %v3012_v60, %v3046_v2  ;;  %v6462_v19 = vpop.f32.mrf.mxu2  ;;  %v3044_v39 = vld [vmem:[#allocation3 + $0x69] sm:$0xff] }
 0x38a   :  { %v3146_v61 = vld [vmem:[#allocation3 + $0x7b] sm:$0xff]  ;;  %v3143_v2 = vld [vmem:[#allocation3 + $0x63] sm:$0xff] }
 0x38b   :  { %v2866_v1 = vmul.f32 %v6253_v30, %v2826_v6  ;;  %5274 = vmatmul.msk.f32.gmra.mxu0 %vm48_vm0, %v2571_v32  ;;  %v3111_v32 = vld [vmem:[#allocation3 + $0x72] sm:$0xff] }
 0x38c   :  { %v3145_v6 = vld [vmem:[#allocation3 + $0x73] sm:$0xff] }
 0x38d   :  { %v2906_v49 = vadd.f32 %v6259_v46, %v2866_v1  ;;  %v3079_v1 = vmax.f32 %v3011_v25, %v3045_v50  ;;  %v3179_v63 = vmax.f32 %v3111_v32, %v3145_v6  ;;  %v6470_v50 = vpop.f32.mrf.mxu1  ;;  %v1603_v25 = vadd.f32 %v6211_v31, %v5989_v17 }
 0x38e   :  { %v3175_v31 = vmax.f32 %v3107_v55, %v3141_v23  ;;  %v3002_v55 = vld [vmem:[#allocation3 + $0x28] sm:$0xff] }
 0x38f   :  { %v2942_v37 = vmax.f32 %v2906_v49, 0.0  ;;  %v3010_v49 = vld [vmem:[#allocation3 + $0x68] sm:$0xff] }
 0x390   :  { %v2757_v34 = vpop.f32.mrf.mxu0  ;;  %v3113_v13 = vld [vmem:[#allocation3 + $0x82] sm:$0xff] }
 0x391   :  { %2979 = vst.msk [vmem:[#allocation3 + $0x90] sm:$0xff] %vm2960_vm1, %v2942_v37  ;;  %v2827_v53 = vadd.f32 %v2757_v34, %v2520_v56  ;;  %v3147_v52 = vld [vmem:[#allocation3 + $0x83] sm:$0xff]  ;;  %v3180_v56 = vmax.f32 %v3112_v26, %v3146_v61  ;;  %v3144_v34 = vld [vmem:[#allocation3 + $0x6b] sm:$0xff] }
 0x392   :  { %v3181_v16 = vmax.f32 %v3113_v13, %v3147_v52  ;;  %v3110_v37 = vld [vmem:[#allocation3 + $0x6a] sm:$0xff] }
 0x393   :  { %v2867_v21 = vmul.f32 %v6253_v30, %v2827_v53  ;;  %5275 = vmatmul.msk.f32.gmra.mxu0 %vm48_vm0, %v2572_v9  ;;  %v3078_v53 = vmax.f32 %v3010_v49, %v3044_v39  ;;  %v3178_v60 = vmax.f32 %v3110_v37, %v3144_v34  ;;  %v3039_v49 = vld [vmem:[#allocation3 + $0x41] sm:$0xff]  ;;  %v3038_v34 = vld [vmem:[#allocation3 + $0x39] sm:$0xff] }
 0x394   :  { %v3215_v11 = vmax.f32 %v3079_v1, %v3181_v16  ;;  %v3040_v16 = vld [vmem:[#allocation3 + $0x49] sm:$0xff]  ;;  %v6477_v1 = vpop.f32.mrf.mxu2 }
 0x395   :  { %v2907_v8 = vadd.f32 %v6259_v46, %v2867_v21  ;;  %v6468_v21 = vpop.f32.mrf.mxu3  ;;  %v3214_v52 = vmax.f32 %v3078_v53, %v3180_v56  ;;  %v3106_v56 = vld [vmem:[#allocation3 + $0x4a] sm:$0xff]  ;;  %v3005_v53 = vld [vmem:[#allocation3 + $0x40] sm:$0xff] }
 0x397   :  { %v2943_v18 = vmax.f32 %v2907_v8, 0.0  ;;  %v3009_v8 = vld [vmem:[#allocation3 + $0x60] sm:$0xff] }
 0x398   :  { %v2760_v48 = vpop.f32.mrf.mxu0  ;;  %v3114_v62 = vld [vmem:[#allocation3 + $0x8a] sm:$0xff] }
 0x399   :  { %v3148_v58 = vld [vmem:[#allocation3 + $0x8b] sm:$0xff]  ;;  %2980 = vst.msk [vmem:[#allocation3 + $0x98] sm:$0xff] %vm2960_vm1, %v2943_v18  ;;  %v2828_v12 = vadd.f32 %v2760_v48, %v2521_v5  ;;  %v3077_v5 = vmax.f32 %v3009_v8, %v3043_v43  ;;  %v3008_v18 = vld [vmem:[#allocation3 + $0x58] sm:$0xff]  ;;  %v3073_v8 = vmax.f32 %v3005_v53, %v3039_v49 }
 0x39a   :  { %v3182_v57 = vmax.f32 %v3114_v62, %v3148_v58  ;;  %v3076_v48 = vmax.f32 %v3008_v18, %v3042_v28  ;;  %v3041_v62 = vld [vmem:[#allocation3 + $0x51] sm:$0xff]  ;;  %v3108_v58 = vld [vmem:[#allocation3 + $0x5a] sm:$0xff]  ;;  %v3139_v28 = vld [vmem:[#allocation3 + $0x43] sm:$0xff] }
 0x39b   :  { %v2868_v20 = vmul.f32 %v6253_v30, %v2828_v12  ;;  %v3213_v61 = vmax.f32 %v3077_v5, %v3179_v63  ;;  %v3007_v12 = vld [vmem:[#allocation3 + $0x50] sm:$0xff]  ;;  %v3105_v63 = vld [vmem:[#allocation3 + $0x42] sm:$0xff] }
 0x39c   :  { %v3216_v38 = vmax.f32 %v3080_v40, %v3182_v57  ;;  %v3177_v40 = vmax.f32 %v3109_v0, %v3143_v2  ;;  %v2216_v57 = vadd.f32 %v6431_v3, %v1909_v47  ;;  %v3212_v32 = vmax.f32 %v3076_v48, %v3178_v60  ;;  %v3140_v43 = vld [vmem:[#allocation3 + $0x4b] sm:$0xff]  ;;  %v3004_v0 = vld [vmem:[#allocation3 + $0x38] sm:$0xff] }
 0x39d   :  { %v2908_v9 = vadd.f32 %v6259_v46, %v2868_v20  ;;  %v3075_v6 = vmax.f32 %v3007_v12, %v3041_v62  ;;  %v3006_v20 = vld [vmem:[#allocation3 + $0x48] sm:$0xff]  ;;  %v3174_v2 = vmax.f32 %v3106_v56, %v3140_v43  ;;  %v3072_v5 = vmax.f32 %v3004_v0, %v3038_v34  ;;  %v3037_v18 = vld [vmem:[#allocation3 + $0x31] sm:$0xff]  ;;  %v3104_v60 = vld [vmem:[#allocation3 + $0x3a] sm:$0xff]  ;;  %v6494_v43 = vpop.f32.mrf.mxu2 }
 0x39e   :  { %3318 = vmatpush.msra.mxu1 %v3216_v38  ;;  %v3176_v38 = vmax.f32 %v3108_v58, %v3142_v59  ;;  %v3074_v17 = vmax.f32 %v3006_v20, %v3040_v16  ;;  %v3003_v48 = vld [vmem:[#allocation3 + $0x30] sm:$0xff]  ;;  %v3173_v62 = vmax.f32 %v3105_v63, %v3139_v28  ;;  %v1604_v59 = vadd.f32 %v6214_v44, %v5995_v33 }
 0x39f   :  { %v2944_v13 = vmax.f32 %v2908_v9, 0.0  ;;  %v3211_v37 = vmax.f32 %v3075_v6, %v3177_v40  ;;  %v2523_v9 = vadd.f32 %v6435_v7, %v2216_v57  ;;  %v3103_v12 = vld [vmem:[#allocation3 + $0x32] sm:$0xff]  ;;  %v3071_v16 = vmax.f32 %v3003_v48, %v3037_v18 }
 0x3a0   :  { %3319 = vmatpush.msra.mxu1 %v3215_v11  ;;  %v2763_v26 = vpop.f32.mrf.mxu0  ;;  %v1910_v11 = vadd.f32 %v6442_v27, %v1603_v25  ;;  %v3210_v47 = vmax.f32 %v3074_v17, %v3176_v38  ;;  %v3209_v27 = vmax.f32 %v3073_v8, %v3175_v31  ;;  %v3137_v40 = vld [vmem:[#allocation3 + $0x33] sm:$0xff]  ;;  %v3208_v25 = vmax.f32 %v3072_v5, %v3174_v2  ;;  %v3136_v6 = vld [vmem:[#allocation3 + $0x2b] sm:$0xff]  ;;  %v3135_v17 = vld [vmem:[#allocation3 + $0x23] sm:$0xff] }
 0x3a1   :  { %2981 = vst.msk [vmem:[#allocation3 + $0xa0] sm:$0xff] %vm2960_vm1, %v2944_v13  ;;  %v2829_v14 = vadd.f32 %v2763_v26, %v2522_v36  ;;  %v6482_v13 = vpop.f32.mrf.mxu3  ;;  %v3138_v26 = vld [vmem:[#allocation3 + $0x3b] sm:$0xff]  ;;  %v3207_v20 = vmax.f32 %v3071_v16, %v3173_v62  ;;  %v3171_v44 = vmax.f32 %v3103_v12, %v3137_v40  ;;  %v1911_v56 = vadd.f32 %v6455_v29, %v1604_v59  ;;  %v2999_v0 = vld [vmem:[#allocation3 + $0x10] sm:$0xff] }
 0x3a2   :  { %3320 = vmatpush.msra.mxu1 %v3214_v52  ;;  %v2217_v58 = vadd.f32 %v6445_v22, %v1910_v11  ;;  %v3172_v23 = vmax.f32 %v3104_v60, %v3138_v26  ;;  %v3034_v38 = vld [vmem:[#allocation3 + $0x19] sm:$0xff]  ;;  %v1605_v5 = vadd.f32 %v6217_v41, %v6001_v51  ;;  %v3032_v60 = vld [vmem:[#allocation3 + $0x9] sm:$0xff]  ;;  %v3031_v12 = vld [vmem:[#allocation3 + $0x1] sm:$0xff] }
 0x3a3   :  { %v2869_v39 = vmul.f32 %v6253_v30, %v2829_v14  ;;  %v6488_v14 = vpop.f32.mrf.mxu1  ;;  %v3000_v11 = vld [vmem:[#allocation3 + $0x18] sm:$0xff]  ;;  %v2997_v41 = vld [vmem:[#allocation3] sm:$0xff] }
 0x3a4   :  { %3321 = vmatpush.msra.mxu1 %v3213_v61  ;;  %v3036_v61 = vld [vmem:[#allocation3 + $0x29] sm:$0xff]  ;;  %v2524_v49 = vadd.f32 %v6452_v45, %v2217_v58  ;;  %v3068_v28 = vmax.f32 %v3000_v11, %v3034_v38  ;;  %v3134_v8 = vld [vmem:[#allocation3 + $0x1b] sm:$0xff]  ;;  %v3099_v26 = vld [vmem:[#allocation3 + $0x12] sm:$0xff]  ;;  %v1912_v16 = vadd.f32 %v6470_v50, %v1605_v5 }
 0x3a5   :  { %v2909_v3 = vadd.f32 %v6259_v46, %v2869_v39  ;;  %v3035_v39 = vld [vmem:[#allocation3 + $0x21] sm:$0xff]  ;;  %v3070_v33 = vmax.f32 %v3002_v55, %v3036_v61 }
 0x3a6   :  { %3322 = vmatpush.msra.mxu1 %v3212_v32  ;;  %v3102_v32 = vld [vmem:[#allocation3 + $0x2a] sm:$0xff] }
 0x3a7   :  { %v2945_v36 = vmax.f32 %v2909_v3, 0.0  ;;  %v3001_v3 = vld [vmem:[#allocation3 + $0x20] sm:$0xff]  ;;  %v3206_v34 = vmax.f32 %v3070_v33, %v3172_v23  ;;  %v3170_v53 = vmax.f32 %v3102_v32, %v3136_v6  ;;  %v2998_v61 = vld [vmem:[#allocation3 + $0x8] sm:$0xff]  ;;  %v2167_v32 = vpop.f32.mrf.mxu2  ;;  %v2219_v33 = vadd.f32 %v6477_v1, %v1912_v16 }
 0x3a8   :  { %3323 = vmatpush.msra.mxu1 %v3211_v37  ;;  %v2766_v52 = vpop.f32.mrf.mxu0  ;;  %v3101_v37 = vld [vmem:[#allocation3 + $0x22] sm:$0xff] }
 0x3a9   :  { %2982 = vst.msk [vmem:[#allocation3 + $0xa8] sm:$0xff] %vm2960_vm1, %v2945_v36  ;;  %v2830_v7 = vadd.f32 %v2766_v52, %v2523_v9  ;;  %v3069_v9 = vmax.f32 %v3001_v3, %v3035_v39  ;;  %v3033_v36 = vld [vmem:[#allocation3 + $0x11] sm:$0xff]  ;;  %v3169_v2 = vmax.f32 %v3101_v37, %v3135_v17  ;;  %v2218_v52 = vadd.f32 %v6462_v19, %v1911_v56  ;;  %v2471_v18 = vpop.f32.mrf.mxu3 }
 0x3aa   :  { %3324 = vmatpush.msra.mxu1 %v3210_v47  ;;  %v3100_v47 = vld [vmem:[#allocation3 + $0x1a] sm:$0xff]  ;;  %v3204_v48 = vmax.f32 %v3068_v28, %v3170_v53  ;;  %v3067_v62 = vmax.f32 %v2999_v0, %v3033_v36  ;;  %v3065_v39 = vmax.f32 %v2997_v41, %v3031_v12  ;;  %v2526_v56 = vadd.f32 %v6482_v13, %v2219_v33 }
 0x3ab   :  { %v2870_v57 = vmul.f32 %v6253_v30, %v2830_v7  ;;  %v3205_v29 = vmax.f32 %v3069_v9, %v3171_v44  ;;  %v3133_v7 = vld [vmem:[#allocation3 + $0x13] sm:$0xff]  ;;  %v3168_v58 = vmax.f32 %v3100_v47, %v3134_v8  ;;  %v1860_v59 = vpop.f32.mrf.mxu1  ;;  %v2525_v51 = vadd.f32 %v6468_v21, %v2218_v52 }
 0x3ac   :  { %3325 = vmatpush.msra.mxu1 %v3209_v27  ;;  %v3203_v19 = vmax.f32 %v3067_v62, %v3169_v2  ;;  %v1606_v44 = vadd.f32 %v6220_v54, %v6007_v4  ;;  %v1607_v4 = vadd.f32 %v6223_v35, %v6013_v24  ;;  %v7377_v33 = vld [vmem:[#allocation17_spill] sm:$0xff] }
 0x3ad   :  { %v2910_v22 = vadd.f32 %v6259_v46, %v2870_v57  ;;  %v3066_v57 = vmax.f32 %v2998_v61, %v3032_v60 }
 0x3ae   :  { %3326 = vmatpush.msra.mxu1 %v3208_v25  ;;  %v3167_v25 = vmax.f32 %v3099_v26, %v3133_v7  ;;  %v1913_v3 = vadd.f32 %v6488_v14, %v1606_v44  ;;  %v1914_v13 = vadd.f32 %v1860_v59, %v1607_v4  ;;  %v7373_v26 = vld [vmem:[#allocation15_spill] sm:$0xff] }
 0x3af   :  { %v2946_v31 = vmax.f32 %v2910_v22, 0.0  ;;  %v3202_v23 = vmax.f32 %v3066_v57, %v3168_v58  ;;  %v2170_v1 = vpop.f32.mrf.mxu2  ;;  %v1609_v7 = vadd.f32 %v7373_v26, %v6025_v15  ;;  %v7375_v57 = vld [vmem:[#allocation16_spill] sm:$0xff]  ;;  %v7378_v4 = vld [vmem:[#allocation11_spill] sm:$0xff] }
 0x3b0   :  { %3327 = vmatpush.msra.mxu1 %v3207_v20  ;;  %v2769_v63 = vpop.f32.mrf.mxu0  ;;  %v3201_v20 = vmax.f32 %v3065_v39, %v3167_v25  ;;  %v2221_v47 = vadd.f32 %v2167_v32, %v1914_v13 }
 0x3b1   :  { %2983 = vst.msk [vmem:[#allocation3 + $0xb0] sm:$0xff] %vm2960_vm1, %v2946_v31  ;;  %v2831_v45 = vadd.f32 %v2769_v63, %v2524_v49  ;;  %v2474_v50 = vpop.f32.mrf.mxu3 }
 0x3b2   :  { %3328 = vmatpush.msra.mxu1 %v3206_v34  ;;  %v2220_v34 = vadd.f32 %v6494_v43, %v1913_v3  ;;  %v1608_v43 = vadd.f32 %v6226_v10, %v6019_v42 }
 0x3b3   :  { %v2871_v27 = vmul.f32 %v6253_v30, %v2831_v45  ;;  %v1863_v49 = vpop.f32.mrf.mxu1  ;;  %v2528_v45 = vadd.f32 %v2474_v50, %v2221_v47 }
 0x3b4   :  { %3329 = vmatpush.msra.mxu1 %v3205_v29  ;;  %v2527_v53 = vadd.f32 %v2471_v18, %v2220_v34  ;;  %v1915_v29 = vadd.f32 %v1863_v49, %v1608_v43 }
 0x3b5   :  { %v2911_v40 = vadd.f32 %v6259_v46, %v2871_v27 }
 0x3b6   :  { %3330 = vmatpush.msra.mxu1 %v3204_v48  ;;  %v2222_v60 = vadd.f32 %v2170_v1, %v1915_v29 }
 0x3b7   :  { %v2947_v55 = vmax.f32 %v2911_v40, 0.0  ;;  %v2173_v24 = vpop.f32.mrf.mxu2 }
 0x3b8   :  { %3331 = vmatpush.msra.mxu1 %v3203_v19  ;;  %v2772_v6 = vpop.f32.mrf.mxu0  ;;  %v7374_v19 = vld [vmem:[#allocation9_spill] sm:$0xff] }
 0x3b9   :  { %2984 = vst.msk [vmem:[#allocation3 + $0xb8] sm:$0xff] %vm2960_vm1, %v2947_v55  ;;  %v2832_v22 = vadd.f32 %v2772_v6, %v2525_v51  ;;  %v2477_v11 = vpop.f32.mrf.mxu3  ;;  %v1610_v25 = vadd.f32 %v7375_v57, %v7374_v19 }
 0x3ba   :  { %3332 = vmatpush.msra.mxu1 %v3202_v23  ;;  %v2529_v48 = vadd.f32 %v2477_v11, %v2222_v60 }
 0x3bb   :  { %v2872_v21 = vmul.f32 %v6253_v30, %v2832_v22  ;;  %v1866_v14 = vpop.f32.mrf.mxu1 }
 0x3bc   :  { %3333 = vmatpush.msra.mxu1 %v3201_v20  ;;  %v1916_v62 = vadd.f32 %v1866_v14, %v1609_v7  ;;  %v7376_v20 = vld [vmem:[#allocation10_spill] sm:$0xff] }
 0x3bd   :  { %v2912_v38 = vadd.f32 %v6259_v46, %v2872_v21  ;;  %v1611_v44 = vadd.f32 %v7377_v33, %v7376_v20 }
 0x3be   :  { %v2223_v40 = vadd.f32 %v2173_v24, %v1916_v62  ;;  %v7380_v24 = vld [vmem:[#allocation12_spill] sm:$0xff] }
 0x3bf   :  { %v2948_v37 = vmax.f32 %v2912_v38, 0.0  ;;  %v2176_v27 = vpop.f32.mrf.mxu2 }
 0x3c0   :  { %v2775_v17 = vpop.f32.mrf.mxu0 }
 0x3c1   :  { %2985 = vst.msk [vmem:[#allocation3 + $0xc0] sm:$0xff] %vm2960_vm1, %v2948_v37  ;;  %v2833_v31 = vadd.f32 %v2775_v17, %v2526_v56  ;;  %v2480_v2 = vpop.f32.mrf.mxu3 }
 0x3c2   :  { %v2530_v16 = vadd.f32 %v2480_v2, %v2223_v40 }
 0x3c3   :  { %v2873_v54 = vmul.f32 %v6253_v30, %v2833_v31  ;;  %v1869_v18 = vpop.f32.mrf.mxu1 }
 0x3c4   :  { %v1917_v55 = vadd.f32 %v1869_v18, %v1610_v25 }
 0x3c5   :  { %v2913_v9 = vadd.f32 %v6259_v46, %v2873_v54  ;;  %v7379_v54 = vld [vmem:[#allocation18_spill] sm:$0xff] }
 0x3c6   :  { %v2224_v22 = vadd.f32 %v2176_v27, %v1917_v55  ;;  %v7382_v27 = vld [vmem:[#allocation13_spill] sm:$0xff] }
 0x3c7   :  { %v2949_v63 = vmax.f32 %v2913_v9, 0.0  ;;  %v2179_v39 = vpop.f32.mrf.mxu2  ;;  %v1612_v9 = vadd.f32 %v7379_v54, %v7378_v4 }
 0x3c8   :  { %v2778_v28 = vpop.f32.mrf.mxu0 }
 0x3c9   :  { %2986 = vst.msk [vmem:[#allocation3 + $0xc8] sm:$0xff] %vm2960_vm1, %v2949_v63  ;;  %v2834_v36 = vadd.f32 %v2778_v28, %v2527_v53  ;;  %v2483_v12 = vpop.f32.mrf.mxu3 }
 0x3ca   :  { %v2531_v56 = vadd.f32 %v2483_v12, %v2224_v22 }
 0x3cb   :  { %v2874_v8 = vmul.f32 %v6253_v30, %v2834_v36  ;;  %v1872_v15 = vpop.f32.mrf.mxu1 }
 0x3cc   :  { %v1918_v3 = vadd.f32 %v1872_v15, %v1611_v44 }
 0x3cd   :  { %v2914_v35 = vadd.f32 %v6259_v46, %v2874_v8 }
 0x3ce   :  { %v2225_v34 = vadd.f32 %v2179_v39, %v1918_v3 }
 0x3cf   :  { %v2950_v0 = vmax.f32 %v2914_v35, 0.0  ;;  %v2182_v1 = vpop.f32.mrf.mxu2  ;;  %v7381_v35 = vld [vmem:[#allocation19_spill] sm:$0xff] }
 0x3d0   :  { %v2781_v52 = vpop.f32.mrf.mxu0 }
 0x3d1   :  { %2987 = vst.msk [vmem:[#allocation3 + $0xd0] sm:$0xff] %vm2960_vm1, %v2950_v0  ;;  %v2835_v5 = vadd.f32 %v2781_v52, %v2528_v45  ;;  %v2486_v50 = vpop.f32.mrf.mxu3  ;;  %v1613_v45 = vadd.f32 %v7381_v35, %v7380_v24 }
 0x3d2   :  { %v2532_v63 = vadd.f32 %v2486_v50, %v2225_v34 }
 0x3d3   :  { %v2875_v42 = vmul.f32 %v6253_v30, %v2835_v5  ;;  %v1875_v49 = vpop.f32.mrf.mxu1 }
 0x3d4   :  { %v1919_v14 = vadd.f32 %v1875_v49, %v1612_v9 }
 0x3d5   :  { %v2915_v10 = vadd.f32 %v6259_v46, %v2875_v42 }
 0x3d6   :  { %v2226_v8 = vadd.f32 %v2182_v1, %v1919_v14 }
 0x3d7   :  { %v2951_v58 = vmax.f32 %v2915_v10, 0.0  ;;  %v2185_v0 = vpop.f32.mrf.mxu2 }
 0x3d8   :  { %v2784_v59 = vpop.f32.mrf.mxu0 }
 0x3d9   :  { %2988 = vst.msk [vmem:[#allocation3 + $0xd8] sm:$0xff] %vm2960_vm1, %v2951_v58  ;;  %v2836_v61 = vadd.f32 %v2784_v59, %v2529_v48  ;;  %v2489_v13 = vpop.f32.mrf.mxu3  ;;  %v7383_v48 = vld [vmem:[#allocation20_spill] sm:$0xff] }
 0x3da   :  { %v2533_v52 = vadd.f32 %v2489_v13, %v2226_v8  ;;  %v1614_v62 = vadd.f32 %v7383_v48, %v7382_v27 }
 0x3db   :  { %v2876_v51 = vmul.f32 %v6253_v30, %v2836_v61  ;;  %v1878_v36 = vpop.f32.mrf.mxu1 }
 0x3dc   :  { %v1920_v5 = vadd.f32 %v1878_v36, %v1613_v45 }
 0x3dd   :  { %v2916_v41 = vadd.f32 %v6259_v46, %v2876_v51 }
 0x3de   :  { %v2227_v10 = vadd.f32 %v2185_v0, %v1920_v5 }
 0x3df   :  { %v2952_v23 = vmax.f32 %v2916_v41, 0.0  ;;  %v2188_v61 = vpop.f32.mrf.mxu2  ;;  %v7384_v41 = vld [vmem:[#allocation14_spill] sm:$0xff] }
 0x3e0   :  { %v2787_v32 = vpop.f32.mrf.mxu0 }
 0x3e1   :  { %2989 = vst.msk [vmem:[#allocation3 + $0xe0] sm:$0xff] %vm2960_vm1, %v2952_v23  ;;  %v2837_v6 = vadd.f32 %v2787_v32, %v2530_v16  ;;  %v2492_v60 = vpop.f32.mrf.mxu3  ;;  %v7385_v16 = vld [vmem:[#allocation21_spill] sm:$0xff] }
 0x3e2   :  { %v2534_v12 = vadd.f32 %v2492_v60, %v2227_v10  ;;  %v1615_v55 = vadd.f32 %v7385_v16, %v7384_v41 }
 0x3e3   :  { %v2877_v21 = vmul.f32 %v6253_v30, %v2837_v6  ;;  %v1881_v42 = vpop.f32.mrf.mxu1 }
 0x3e4   :  { %v1921_v40 = vadd.f32 %v1881_v42, %v1614_v62  ;;  %v3024_v62 = vld [vmem:[#allocation3 + $0xd8] sm:$0xff] }
 0x3e5   :  { %v2917_v38 = vadd.f32 %v6259_v46, %v2877_v21 }
 0x3e6   :  { %v2228_v15 = vadd.f32 %v2188_v61, %v1921_v40 }
 0x3e7   :  { %v2953_v37 = vmax.f32 %v2917_v38, 0.0  ;;  %v2191_v33 = vpop.f32.mrf.mxu2 }
 0x3e8   :  { %v2790_v17 = vpop.f32.mrf.mxu0  ;;  %v3025_v27 = vld [vmem:[#allocation3 + $0xe0] sm:$0xff] }
 0x3e9   :  { %2990 = vst.msk [vmem:[#allocation3 + $0xe8] sm:$0xff] %vm2960_vm1, %v2953_v37  ;;  %v2838_v31 = vadd.f32 %v2790_v17, %v2531_v56  ;;  %v2495_v51 = vpop.f32.mrf.mxu3 }
 0x3ea   :  { %v2535_v6 = vadd.f32 %v2495_v51, %v2228_v15  ;;  %v3124_v51 = vld [vmem:[#allocation3 + $0xda] sm:$0xff] }
 0x3eb   :  { %v2878_v11 = vmul.f32 %v6253_v30, %v2838_v31  ;;  %v1884_v39 = vpop.f32.mrf.mxu1  ;;  %v3158_v15 = vld [vmem:[#allocation3 + $0xdb] sm:$0xff] }
 0x3ec   :  { %v1922_v22 = vadd.f32 %v1884_v39, %v1615_v55 }
 0x3ed   :  { %v2918_v53 = vadd.f32 %v6259_v46, %v2878_v11 }
 0x3ee   :  { %v2229_v50 = vadd.f32 %v2191_v33, %v1922_v22  ;;  %v3023_v22 = vld [vmem:[#allocation3 + $0xd0] sm:$0xff] }
 0x3ef   :  { %v2954_v28 = vmax.f32 %v2918_v53, 0.0 }
 0x3f0   :  { %v2793_v47 = vpop.f32.mrf.mxu0 }
 0x3f1   :  { %2991 = vst.msk [vmem:[#allocation3 + $0xf0] sm:$0xff] %vm2960_vm1, %v2954_v28  ;;  %v2839_v43 = vadd.f32 %v2793_v47, %v2532_v63  ;;  %v2498_v49 = vpop.f32.mrf.mxu3 }
 0x3f2   :  { %v2536_v3 = vadd.f32 %v2498_v49, %v2229_v50  ;;  %v3123_v49 = vld [vmem:[#allocation3 + $0xd2] sm:$0xff] }
 0x3f3   :  { %v2879_v29 = vmul.f32 %v6253_v30, %v2839_v43  ;;  %v5471_v30 = vld [vmem:[%s7347_s2] ss:$0 sm:$0xff] }
 0x3f5   :  { %v2919_v2 = vadd.f32 %v6259_v46, %v2879_v29  ;;  %v5472_v46 = vld [vmem:[%s7348_s3] ss:$0 sm:$0xff] }
 0x3f7   :  { %v2955_v18 = vmax.f32 %v2919_v2, 0.0 }
 0x3f8   :  { %v2796_v26 = vpop.f32.mrf.mxu0  ;;  %v3027_v8 = vld [vmem:[#allocation3 + $0xf0] sm:$0xff] }
 0x3f9   :  { %2992 = vst.msk [vmem:[#allocation3 + $0xf8] sm:$0xff] %vm2960_vm1, %v2955_v18  ;;  %v2840_v7 = vadd.f32 %v2796_v26, %v2533_v52  ;;  %v3060_v35 = vld [vmem:[#allocation3 + $0xe9] sm:$0xff]  ;;  %v3059_v18 = vld [vmem:[#allocation3 + $0xe1] sm:$0xff] }
 0x3fa   :  { %v3026_v52 = vld [vmem:[#allocation3 + $0xe8] sm:$0xff] }
 0x3fb   :  { %v2880_v58 = vmul.f32 %v5471_v30, %v2840_v7  ;;  %v3126_v60 = vld [vmem:[#allocation3 + $0xea] sm:$0xff]  ;;  %v3235_v7 = vld [vmem:[%s7349_s4] sm:$0xff]  ;;  %v3094_v10 = vmax.f32 %v3026_v52, %v3060_v35 }
 0x3fc   :  { %v3160_v26 = vld [vmem:[#allocation3 + $0xeb] sm:$0xff]  ;;  %3334 = vmatmul.f32.vlgmr.msra.gmra.mxu1 %v3235_v7  ;;  %v3020_v35 = vld [vmem:[#allocation3 + $0xb8] sm:$0xff] }
 0x3fd   :  { %v2920_v59 = vadd.f32 %v5472_v46, %v2880_v58  ;;  %v3057_v58 = vld [vmem:[#allocation3 + $0xd1] sm:$0xff] }
 0x3fe   :  { %v3119_v7 = vld [vmem:[#allocation3 + $0xb2] sm:$0xff] }
 0x3ff   :  { %v2956_v19 = vmax.f32 %v2920_v59, 0.0 }
 0x400   :  { %v2799_v57 = vpop.f32.mrf.mxu0  ;;  %v3028_v53 = vld [vmem:[#allocation3 + $0xf8] sm:$0xff] }
 0x401   :  { %2993 = vst.msk [vmem:[#allocation3 + $0x100] sm:$0xff] %vm2960_vm1, %v2956_v19  ;;  %v2841_v25 = vadd.f32 %v2799_v57, %v2534_v12  ;;  %v3061_v13 = vld [vmem:[#allocation3 + $0xf1] sm:$0xff]  ;;  %v3159_v12 = vld [vmem:[#allocation3 + $0xe3] sm:$0xff]  ;;  %v3093_v19 = vmax.f32 %v3025_v27, %v3059_v18  ;;  %v3194_v57 = vmax.f32 %v3126_v60, %v3160_v26 }
 0x402   :  { %v3127_v45 = vld [vmem:[#allocation3 + $0xf2] sm:$0xff]  ;;  %v3095_v2 = vmax.f32 %v3027_v8, %v3061_v13  ;;  %v3052_v26 = vld [vmem:[#allocation3 + $0xa9] sm:$0xff] }
 0x403   :  { %v2881_v23 = vmul.f32 %v5471_v30, %v2841_v25  ;;  %v3161_v29 = vld [vmem:[#allocation3 + $0xf3] sm:$0xff] }
 0x404   :  { %v3195_v48 = vmax.f32 %v3127_v45, %v3161_v29  ;;  %v3053_v29 = vld [vmem:[#allocation3 + $0xb1] sm:$0xff] }
 0x405   :  { %v2921_v32 = vadd.f32 %v5472_v46, %v2881_v23  ;;  %v3019_v18 = vld [vmem:[#allocation3 + $0xb0] sm:$0xff] }
 0x406   :  { %v3229_v39 = vmax.f32 %v3093_v19, %v3195_v48  ;;  %v3087_v27 = vmax.f32 %v3019_v18, %v3053_v29  ;;  %v3018_v48 = vld [vmem:[#allocation3 + $0xa8] sm:$0xff]  ;;  %v3256_v29 = vld [vmem:[%s7349_s4 + $0xa8] sm:$0xff]  ;;  %v3251_v18 = vld [vmem:[%s7349_s4 + $0x80] sm:$0xff] }
 0x407   :  { %v2957_v20 = vmax.f32 %v2921_v32, 0.0 }
 0x408   :  { %v2802_v44 = vpop.f32.mrf.mxu0  ;;  %v3062_v4 = vld [vmem:[#allocation3 + $0xf9] sm:$0xff] }
 0x409   :  { %2994 = vst.msk [vmem:[#allocation3 + $0x108] sm:$0xff] %vm2960_vm1, %v2957_v20  ;;  %v2842_v21 = vadd.f32 %v2802_v44, %v2535_v6  ;;  %v3128_v63 = vld [vmem:[#allocation3 + $0xfa] sm:$0xff]  ;;  %v3096_v47 = vmax.f32 %v3028_v53, %v3062_v4  ;;  %v3056_v44 = vld [vmem:[#allocation3 + $0xc9] sm:$0xff] }
 0x40a   :  { %v3162_v36 = vld [vmem:[#allocation3 + $0xfb] sm:$0xff] }
 0x40b   :  { %v2882_v38 = vmul.f32 %v5471_v30, %v2842_v21  ;;  %v3196_v5 = vmax.f32 %v3128_v63, %v3162_v36  ;;  %v3091_v21 = vmax.f32 %v3023_v22, %v3057_v58  ;;  %v3029_v50 = vld [vmem:[#allocation3 + $0x100] sm:$0xff]  ;;  %v3118_v58 = vld [vmem:[#allocation3 + $0xaa] sm:$0xff] }
 0x40c   :  { %v3021_v63 = vld [vmem:[#allocation3 + $0xc0] sm:$0xff] }
 0x40d   :  { %v2922_v56 = vadd.f32 %v5472_v46, %v2882_v38  ;;  %v3230_v40 = vmax.f32 %v3094_v10, %v3196_v5  ;;  %v3054_v36 = vld [vmem:[#allocation3 + $0xb9] sm:$0xff] }
 0x40e   :  { %v3088_v5 = vmax.f32 %v3020_v35, %v3054_v36  ;;  %v3239_v36 = vld [vmem:[%s7349_s4 + $0x20] sm:$0xff]  ;;  %v3252_v35 = vld [vmem:[%s7349_s4 + $0x88] sm:$0xff] }
 0x40f   :  { %v2958_v37 = vmax.f32 %v2922_v56, 0.0  ;;  %v3157_v56 = vld [vmem:[#allocation3 + $0xd3] sm:$0xff] }
 0x410   :  { %v2805_v17 = vpop.f32.mrf.mxu0  ;;  %v3129_v54 = vld [vmem:[#allocation3 + $0x102] sm:$0xff] }
 0x411   :  { %2995 = vst.msk [vmem:[#allocation3 + $0x110] sm:$0xff] %vm2960_vm1, %v2958_v37  ;;  %v2843_v31 = vadd.f32 %v2805_v17, %v2536_v3  ;;  %v3163_v9 = vld [vmem:[#allocation3 + $0x103] sm:$0xff] }
 0x412   :  { %v3197_v24 = vmax.f32 %v3129_v54, %v3163_v9  ;;  %v3030_v59 = vld [vmem:[#allocation3 + $0x108] sm:$0xf] }
 0x413   :  { %v2883_v1 = vmul.f32 %v5471_v30, %v2843_v31  ;;  %v3058_v30 = vld [vmem:[#allocation3 + $0xd9] sm:$0xff]  ;;  %v3064_v61 = vld [vmem:[#allocation3 + $0x109] sm:$0xf]  ;;  %v3063_v25 = vld [vmem:[#allocation3 + $0x101] sm:$0xff] }
 0x414   :  { %v3231_v42 = vmax.f32 %v3095_v2, %v3197_v24  ;;  %v3092_v41 = vmax.f32 %v3024_v62, %v3058_v30  ;;  %v3098_v32 = vmax.f32 %v3030_v59, %v3064_v61  ;;  %v3097_v17 = vmax.f32 %v3029_v50, %v3063_v25  ;;  %v3022_v31 = vld [vmem:[#allocation3 + $0xc8] sm:$0xff]  ;;  %v3154_v2 = vld [vmem:[#allocation3 + $0xbb] sm:$0xff]  ;;  %v3115_v50 = vld [vmem:[#allocation3 + $0x92] sm:$0xff] }
 0x415   :  { %v2923_v34 = vadd.f32 %v5472_v46, %v2883_v1  ;;  %v3125_v46 = vld [vmem:[#allocation3 + $0xe2] sm:$0xff]  ;;  %v3192_v1 = vmax.f32 %v3124_v51, %v3158_v15  ;;  %v3090_v4 = vmax.f32 %v3022_v31, %v3056_v44  ;;  %v3122_v54 = vld [vmem:[#allocation3 + $0xca] sm:$0xff]  ;;  %v3050_v25 = vld [vmem:[#allocation3 + $0x99] sm:$0xff] }
 0x416   :  { %v3193_v20 = vmax.f32 %v3125_v46, %v3159_v12  ;;  %v3228_v3 = vmax.f32 %v3092_v41, %v3194_v57  ;;  %v3156_v9 = vld [vmem:[#allocation3 + $0xcb] sm:$0xff]  ;;  %v3051_v30 = vld [vmem:[#allocation3 + $0xa1] sm:$0xff]  ;;  %v3086_v12 = vmax.f32 %v3018_v48, %v3052_v26  ;;  %v3267_v48 = vld [vmem:[%s7349_s4 + $0x100] sm:$0xff] }
 0x417   :  { %v2959_v11 = vmax.f32 %v2923_v34, 0.0  ;;  %v3055_v34 = vld [vmem:[#allocation3 + $0xc1] sm:$0xff]  ;;  %v3226_v8 = vmax.f32 %v3090_v4, %v3192_v1  ;;  %v3190_v45 = vmax.f32 %v3122_v54, %v3156_v9  ;;  %v3152_v46 = vld [vmem:[#allocation3 + $0xab] sm:$0xff]  ;;  %v3243_v54 = vld [vmem:[%s7349_s4 + $0x40] sm:$0xff] }
 0x418   :  { %v3130_v14 = vld [vmem:[#allocation3 + $0x10a] sm:$0xff]  ;;  %v3227_v53 = vmax.f32 %v3091_v21, %v3193_v20  ;;  %v3089_v24 = vmax.f32 %v3021_v63, %v3055_v34  ;;  %v3240_v57 = vld [vmem:[%s7349_s4 + $0x28] sm:$0xff] }
 0x419   :  { %v3164_v28 = vld [vmem:[#allocation3 + $0x10b] sm:$0xff]  ;;  %2996 = vst.msk [vmem:[#allocation3 + $0x118] sm:$0xff] %vm2960_vm1, %v2959_v11  ;;  %v3224_v10 = vmax.f32 %v3088_v5, %v3190_v45  ;;  %v3117_v51 = vld [vmem:[#allocation3 + $0xa2] sm:$0xff] }
 0x41a   :  { %v3198_v43 = vmax.f32 %v3130_v14, %v3164_v28  ;;  %v3238_v11 = vld [vmem:[%s7349_s4 + $0x18] sm:$0xff]  ;;  %v3191_v14 = vmax.f32 %v3123_v49, %v3157_v56  ;;  %v3237_v28 = vld [vmem:[%s7349_s4 + $0x10] sm:$0xff]  ;;  %v3244_v31 = vld [vmem:[%s7349_s4 + $0x48] sm:$0xff] }
 0x41b   :  { %3337 = vmatmul.f32.gmra.mxu1 %v3238_v11  ;;  %v3241_v59 = vld [vmem:[%s7349_s4 + $0x30] sm:$0xff]  ;;  %v3013_v9 = vld [vmem:[#allocation3 + $0x80] sm:$0xff]  ;;  %v3258_v5 = vld [vmem:[%s7349_s4 + $0xb8] sm:$0xff] }
 0x41c   :  { %v3232_v0 = vmax.f32 %v3096_v47, %v3198_v43  ;;  %v3121_v47 = vld [vmem:[#allocation3 + $0xc2] sm:$0xff]  ;;  %v3225_v52 = vmax.f32 %v3089_v24, %v3191_v14  ;;  %v3247_v14 = vld [vmem:[%s7349_s4 + $0x60] sm:$0xff] }
 0x41d   :  { %v3155_v43 = vld [vmem:[#allocation3 + $0xc3] sm:$0xff] }
 0x41e   :  { %3374 = vmatpush.msra.mxu2 %v3232_v0  ;;  %v3120_v0 = vld [vmem:[#allocation3 + $0xba] sm:$0xff]  ;;  %v3189_v60 = vmax.f32 %v3121_v47, %v3155_v43  ;;  %v3151_v15 = vld [vmem:[#allocation3 + $0xa3] sm:$0xff]  ;;  %v3250_v47 = vld [vmem:[%s7349_s4 + $0x78] sm:$0xff] }
 0x41f   :  { %v3188_v62 = vmax.f32 %v3120_v0, %v3154_v2  ;;  %v3185_v44 = vmax.f32 %v3117_v51, %v3151_v15  ;;  %v3048_v21 = vld [vmem:[#allocation3 + $0x89] sm:$0xff]  ;;  %v3236_v63 = vld [vmem:[%s7349_s4 + $0x8] sm:$0xff]  ;;  %v3255_v0 = vld [vmem:[%s7349_s4 + $0xa0] sm:$0xff] }
 0x420   :  { %3375 = vmatpush.msra.mxu2 %v3231_v42  ;;  %v3132_v16 = vld [vmem:[#allocation3 + $0x11a] sm:$0xf]  ;;  %v3131_v23 = vld [vmem:[#allocation3 + $0x112] sm:$0xff]  ;;  %v3223_v61 = vmax.f32 %v3087_v27, %v3189_v60  ;;  %v3249_v43 = vld [vmem:[%s7349_s4 + $0x70] sm:$0xff] }
 0x421   :  { %v3166_v55 = vld [vmem:[#allocation3 + $0x11b] sm:$0xf]  ;;  %v3165_v33 = vld [vmem:[#allocation3 + $0x113] sm:$0xff]  ;;  %v3222_v41 = vmax.f32 %v3086_v12, %v3188_v62  ;;  %v3253_v24 = vld [vmem:[%s7349_s4 + $0x90] sm:$0xff] }
 0x422   :  { %3376 = vmatpush.msra.mxu2 %v3230_v40  ;;  %v3200_v6 = vmax.f32 %v3132_v16, %v3166_v55  ;;  %v3199_v38 = vmax.f32 %v3131_v23, %v3165_v33  ;;  %v3153_v42 = vld [vmem:[#allocation3 + $0xb3] sm:$0xff]  ;;  %v3017_v40 = vld [vmem:[#allocation3 + $0xa0] sm:$0xff]  ;;  %v3186_v23 = vmax.f32 %v3118_v58, %v3152_v46  ;;  %v3245_v45 = vld [vmem:[%s7349_s4 + $0x50] sm:$0xff] }
 0x423   :  { %v3187_v19 = vmax.f32 %v3119_v7, %v3153_v42  ;;  %3340 = vmatmul.f32.gmra.mxu1 %v3241_v59  ;;  %v3085_v16 = vmax.f32 %v3017_v40, %v3051_v30  ;;  %v3016_v55 = vld [vmem:[#allocation3 + $0x98] sm:$0xff]  ;;  %v3015_v33 = vld [vmem:[#allocation3 + $0x90] sm:$0xff]  ;;  %v3248_v2 = vld [vmem:[%s7349_s4 + $0x68] sm:$0xff] }
 0x424   :  { %3377 = vmatpush.msra.mxu2 %v3229_v39  ;;  %v3234_v37 = vmax.f32 %v3098_v32, %v3200_v6  ;;  %v3233_v13 = vmax.f32 %v3097_v17, %v3199_v38  ;;  %v3049_v39 = vld [vmem:[#allocation3 + $0x91] sm:$0xff]  ;;  %v3116_v32 = vld [vmem:[#allocation3 + $0x9a] sm:$0xff]  ;;  %v3084_v20 = vmax.f32 %v3016_v55, %v3050_v25  ;;  %v3261_v26 = vld [vmem:[%s7349_s4 + $0xd0] sm:$0xff] }
 0x425   :  { %v3150_v6 = vld [vmem:[#allocation3 + $0x9b] sm:$0xff]  ;;  %v3221_v22 = vmax.f32 %v3085_v16, %v3187_v19  ;;  %v3149_v38 = vld [vmem:[#allocation3 + $0x93] sm:$0xff]  ;;  %v3083_v56 = vmax.f32 %v3015_v33, %v3049_v39  ;;  %v3265_v42 = vld [vmem:[%s7349_s4 + $0xf0] sm:$0xff] }
 0x426   :  { %3378 = vmatpush.msra.mxu2 %v3228_v3  ;;  %5276 = vmatpush.msk.msra.mxu3 %vm3314_vm2, %v3234_v37  ;;  %v3220_v49 = vmax.f32 %v3084_v20, %v3186_v23  ;;  %v3184_v3 = vmax.f32 %v3116_v32, %v3150_v6  ;;  %v3014_v37 = vld [vmem:[#allocation3 + $0x88] sm:$0xff]  ;;  %v3183_v4 = vmax.f32 %v3115_v50, %v3149_v38  ;;  %v3262_v60 = vld [vmem:[%s7349_s4 + $0xd8] sm:$0xff]  ;;  %v3260_v62 = vld [vmem:[%s7349_s4 + $0xc8] sm:$0xff] }
 0x427   :  { %v3047_v17 = vld [vmem:[#allocation3 + $0x81] sm:$0xff]  ;;  %v3219_v1 = vmax.f32 %v3083_v56, %v3185_v44  ;;  %v3082_v34 = vmax.f32 %v3014_v37, %v3048_v21  ;;  %v3254_v7 = vld [vmem:[%s7349_s4 + $0x98] sm:$0xff]  ;;  %v3263_v58 = vld [vmem:[%s7349_s4 + $0xe0] sm:$0xff] }
 0x428   :  { %3379 = vmatpush.msra.mxu2 %v3227_v53  ;;  %3445 = vmatpush.msra.mxu3 %v3233_v13  ;;  %v3081_v53 = vmax.f32 %v3013_v9, %v3047_v17  ;;  %v3257_v27 = vld [vmem:[%s7349_s4 + $0xb0] sm:$0xff]  ;;  %v3270_v30 = vld [vmem:[%s7349_s4 + $0x118] sm:$0xff]  ;;  %v3268_v46 = vld [vmem:[%s7349_s4 + $0x108] sm:$0xff] }
 0x429   :  { %5277 = vmatmul.msk.f32.vlgmr.msra.gmra.mxu3 %vm3274_vm3, %v3237_v28  ;;  %v3218_v11 = vmax.f32 %v3082_v34, %v3184_v3  ;;  %v3246_v28 = vld [vmem:[%s7349_s4 + $0x58] sm:$0xff]  ;;  %v3272_v40 = vld [vmem:[%s7349_s4 + $0x128] sm:$0xff]  ;;  %v3271_v25 = vld [vmem:[%s7349_s4 + $0x120] sm:$0xff] }
 0x42a   :  { %3380 = vmatpush.msra.mxu2 %v3226_v8  ;;  %v3217_v13 = vmax.f32 %v3081_v53, %v3183_v4  ;;  %v3242_v8 = vld [vmem:[%s7349_s4 + $0x38] sm:$0xff]  ;;  %v3510_v51 = vld [vmem:[%s7350_s5 + $0x8] sm:$0xff]  ;;  %v3509_v16 = vld [vmem:[%s7350_s5] sm:$0xff] }
 0x42b   :  { %3343 = vmatmul.f32.gmra.mxu1 %v3244_v31  ;;  %v3266_v59 = vld [vmem:[%s7349_s4 + $0xf8] sm:$0xff]  ;;  %v5313_v55 = vld [vmem:[%s7350_s5 + $0x28] sm:$0xff]  ;;  %v5312_v39 = vld [vmem:[%s7350_s5 + $0x20] sm:$0xff] }
 0x42c   :  { %3381 = vmatpush.msra.mxu2 %v3225_v52  ;;  %v3259_v52 = vld [vmem:[%s7349_s4 + $0xc0] sm:$0xff]  ;;  %v5291_v23 = vld [vmem:[%s7350_s5 + $0x18] sm:$0xff]  ;;  %3735 = vmatpush.msrb.mxu3 %v5313_v55  ;;  %v5290_v32 = vld [vmem:[%s7350_s5 + $0x10] sm:$0xff] }
 0x42d   :  { %3568 = vmatpush.msrb.mxu1 %v5291_v23  ;;  %v5325_v55 = vld [vmem:[%s7350_s5 + $0x38] sm:$0xff]  ;;  %v5348_v23 = vld [vmem:[%s7350_s5 + $0x50] sm:$0xff] }
 0x42e   :  { %3382 = vmatpush.msra.mxu2 %v3224_v10  ;;  %v3264_v10 = vld [vmem:[%s7349_s4 + $0xe8] sm:$0xff]  ;;  %3736 = vmatpush.msrb.mxu3 %v5312_v39 }
 0x42f   :  { %3569 = vmatpush.msrb.mxu1 %v5290_v32 }
 0x430   :  { %3383 = vmatpush.msra.mxu2 %v3223_v61  ;;  %v3269_v61 = vld [vmem:[%s7349_s4 + $0x110] sm:$0xff] }
 0x431   :  { %5278 = vmatmul.msk.f32.gmra.mxu3 %vm3274_vm3, %v3240_v57  ;;  %v3273_v57 = vld [vmem:[%s7349_s4 + $0x130] sm:$0xff]  ;;  %3835 = vmatpush.msra.mxu1 %v5325_v55 }
 0x432   :  { %3384 = vmatpush.msra.mxu2 %v3222_v41 }
 0x433   :  { %3346 = vmatmul.f32.gmra.mxu1 %v3247_v14 }
 0x434   :  { %3385 = vmatpush.msra.mxu2 %v3221_v22 }
 0x436   :  { %3386 = vmatpush.msra.mxu2 %v3220_v49 }
 0x438   :  { %3387 = vmatpush.msra.mxu2 %v3219_v1 }
 0x439   :  { %5279 = vmatmul.msk.f32.gmra.mxu3 %vm3274_vm3, %v3243_v54 }
 0x43a   :  { %3388 = vmatpush.msra.mxu2 %v3218_v11 }
 0x43b   :  { %3349 = vmatmul.f32.gmra.mxu1 %v3250_v47 }
 0x43c   :  { %3389 = vmatpush.msra.mxu2 %v3217_v13 }
 0x43d   :  { %3390 = vmatmul.f32.vlgmr.msra.gmra.mxu2 %v3236_v63 }
 0x43e   :  { %3645 = vmatpush.msrb.mxu2 %v3510_v51 }
 0x440   :  { %3646 = vmatpush.msrb.mxu2 %v3509_v16  ;;  %v5336_v16 = vld [vmem:[%s7350_s5 + $0x40] sm:$0xff] }
 0x441   :  { %5280 = vmatmul.msk.f32.gmra.mxu3 %vm3274_vm3, %v3246_v28 }
 0x443   :  { %3352 = vmatmul.f32.gmra.mxu1 %v3253_v24 }
 0x445   :  { %3393 = vmatmul.f32.gmra.mxu2 %v3239_v36 }
 0x449   :  { %5281 = vmatmul.msk.f32.gmra.mxu3 %vm3274_vm3, %v3249_v43 }
 0x44b   :  { %3355 = vmatmul.f32.gmra.mxu1 %v3256_v29 }
 0x44d   :  { %3396 = vmatmul.f32.gmra.mxu2 %v3242_v8 }
 0x451   :  { %5282 = vmatmul.msk.f32.gmra.mxu3 %vm3274_vm3, %v3252_v35 }
 0x453   :  { %3358 = vmatmul.f32.gmra.mxu1 %v3259_v52 }
 0x455   :  { %3399 = vmatmul.f32.gmra.mxu2 %v3245_v45 }
 0x459   :  { %5283 = vmatmul.msk.f32.gmra.mxu3 %vm3274_vm3, %v3255_v0 }
 0x45b   :  { %3361 = vmatmul.f32.gmra.mxu1 %v3262_v60 }
 0x45d   :  { %3402 = vmatmul.f32.gmra.mxu2 %v3248_v2 }
 0x461   :  { %5284 = vmatmul.msk.f32.gmra.mxu3 %vm3274_vm3, %v3258_v5 }
 0x463   :  { %3364 = vmatmul.f32.gmra.mxu1 %v3265_v42 }
 0x465   :  { %3405 = vmatmul.f32.gmra.mxu2 %v3251_v18 }
 0x469   :  { %5285 = vmatmul.msk.f32.gmra.mxu3 %vm3274_vm3, %v3261_v26 }
 0x46b   :  { %3367 = vmatmul.f32.gmra.mxu1 %v3268_v46 }
 0x46d   :  { %3408 = vmatmul.f32.gmra.mxu2 %v3254_v7 }
 0x471   :  { %5286 = vmatmul.msk.f32.gmra.mxu3 %vm3274_vm3, %v3264_v10 }
 0x473   :  { %3370 = vmatmul.f32.gmra.mxu1 %v3271_v25 }
 0x475   :  { %3411 = vmatmul.f32.gmra.mxu2 %v3257_v27 }
 0x479   :  { %5287 = vmatmul.msk.f32.gmra.mxu3 %vm3274_vm3, %v3267_v48  ;;  %v3335_v12 = vpop.f32.mrf.mxu1 }
 0x47d   :  { %3414 = vmatmul.f32.gmra.mxu2 %v3260_v62 }
 0x481   :  { %5288 = vmatmul.msk.f32.gmra.mxu3 %vm3274_vm3, %v3270_v30 }
 0x485   :  { %3417 = vmatmul.f32.gmra.mxu2 %v3263_v58 }
 0x489   :  { %5289 = vmatmul.msk.f32.gmra.mxu3 %vm3274_vm3, %v3273_v57 }
 0x48d   :  { %3420 = vmatmul.f32.gmra.mxu2 %v3266_v59 }
 0x495   :  { %3423 = vmatmul.f32.gmra.mxu2 %v3269_v61 }
 0x498   :  { %v3338_v15 = vpop.f32.mrf.mxu1 }
 0x49d   :  { %3426 = vmatmul.f32.gmra.mxu2 %v3272_v40 }
 0x4a0   :  { %v3341_v6 = vpop.f32.mrf.mxu1 }
 0x4a8   :  { %v3344_v21 = vpop.f32.mrf.mxu1 }
 0x4ac   :  { %v3447_v19 = vpop.f32.mrf.mxu3 }
 0x4b0   :  { %v3347_v17 = vpop.f32.mrf.mxu1 }
 0x4b4   :  { %v3450_v41 = vpop.f32.mrf.mxu3 }
 0x4b8   :  { %v3350_v13 = vpop.f32.mrf.mxu1 }
 0x4bc   :  { %v3453_v22 = vpop.f32.mrf.mxu3 }
 0x4c0   :  { %v3391_v20 = vpop.f32.mrf.mxu2  ;;  %v3353_v0 = vpop.f32.mrf.mxu1 }
 0x4c1   :  { %v3392_v33 = vadd.f32 %v3391_v20, %v3335_v12 }
 0x4c3   :  { %v3448_v44 = vadd.f32 %v3447_v19, %v3392_v33 }
 0x4c4   :  { %v3456_v38 = vpop.f32.mrf.mxu3 }
 0x4c5   :  { %3486 = vst.msk [vmem:[#allocation4] sm:$0xff] %vm2960_vm1, %v3448_v44 }
 0x4c8   :  { %v3394_v50 = vpop.f32.mrf.mxu2  ;;  %v3356_v42 = vpop.f32.mrf.mxu1 }
 0x4c9   :  { %v3395_v49 = vadd.f32 %v3394_v50, %v3338_v15  ;;  %v5337_v15 = vld [vmem:[%s7350_s5 + $0x48] sm:$0xff]  ;;  %v5324_v50 = vld [vmem:[%s7350_s5 + $0x30] sm:$0xff] }
 0x4ca   :  { %3935 = vmatpush.msra.mxu2 %v5337_v15  ;;  %3836 = vmatpush.msra.mxu1 %v5324_v50 }
 0x4cb   :  { %v3451_v56 = vadd.f32 %v3450_v41, %v3395_v49  ;;  %v5349_v41 = vld [vmem:[%s7350_s5 + $0x58] sm:$0xff] }
 0x4cc   :  { %v3499_v3 = vld [vmem:[#allocation4] sm:$0xff]  ;;  %v3459_v1 = vpop.f32.mrf.mxu3  ;;  %4035 = vmatpush.msra.mxu3 %v5349_v41  ;;  %3936 = vmatpush.msra.mxu2 %v5336_v16 }
 0x4cd   :  { %3487 = vst.msk [vmem:[#allocation4 + $0x8] sm:$0xff] %vm2960_vm1, %v3451_v56  ;;  %5302 = vmatmul.msk.f32.vlgmr.msrb.gmra.mxu2 %vm2960_vm1, %v3499_v3 }
 0x4ce   :  { %4036 = vmatpush.msra.mxu3 %v5348_v23 }
 0x4d0   :  { %v3397_v37 = vpop.f32.mrf.mxu2  ;;  %v3359_v61 = vpop.f32.mrf.mxu1 }
 0x4d1   :  { %v3398_v31 = vadd.f32 %v3397_v37, %v3341_v6 }
 0x4d3   :  { %v3454_v34 = vadd.f32 %v3453_v22, %v3398_v31 }
 0x4d4   :  { %v3678_v4 = vld [vmem:[#allocation4 + $0x2] sm:$0xff]  ;;  %v3462_v47 = vpop.f32.mrf.mxu3 }
 0x4d5   :  { %v3511_v54 = vld [vmem:[#allocation4 + $0x1] sm:$0xff]  ;;  %3488 = vst.msk [vmem:[#allocation4 + $0x10] sm:$0xff] %vm2960_vm1, %v3454_v34  ;;  %5314 = vmatmul.msk.f32.vlgmr.msrb.gmra.mxu3 %vm2960_vm1, %v3678_v4 }
 0x4d6   :  { %v3500_v9 = vld [vmem:[#allocation4 + $0x8] sm:$0xff]  ;;  %5292 = vmatmul.msk.f32.vlgmr.msrb.gmra.mxu1 %vm2960_vm1, %v3511_v54 }
 0x4d7   :  { %5303 = vmatmul.msk.f32.gmra.mxu2 %vm2960_vm1, %v3500_v9 }
 0x4d8   :  { %v3400_v11 = vpop.f32.mrf.mxu2  ;;  %v3362_v6 = vpop.f32.mrf.mxu1 }
 0x4d9   :  { %v3401_v53 = vadd.f32 %v3400_v11, %v3344_v21 }
 0x4db   :  { %v3457_v63 = vadd.f32 %v3456_v38, %v3401_v53 }
 0x4dc   :  { %v6719_v14 = vld [vmem:[#allocation4 + $0xa] sm:$0xff]  ;;  %v3465_v2 = vpop.f32.mrf.mxu3 }
 0x4dd   :  { %v3512_v28 = vld [vmem:[#allocation4 + $0x9] sm:$0xff]  ;;  %3489 = vst.msk [vmem:[#allocation4 + $0x18] sm:$0xff] %vm2960_vm1, %v3457_v63  ;;  %5315 = vmatmul.msk.f32.gmra.mxu3 %vm2960_vm1, %v6719_v14 }
 0x4de   :  { %v3501_v36 = vld [vmem:[#allocation4 + $0x10] sm:$0xff]  ;;  %5293 = vmatmul.msk.f32.gmra.mxu1 %vm2960_vm1, %v3512_v28 }
 0x4df   :  { %5304 = vmatmul.msk.f32.gmra.mxu2 %vm2960_vm1, %v3501_v36 }
 0x4e0   :  { %v3403_v43 = vpop.f32.mrf.mxu2 }
 0x4e1   :  { %v3404_v8 = vadd.f32 %v3403_v43, %v3347_v17  ;;  %v3365_v17 = vpop.f32.mrf.mxu1 }
 0x4e3   :  { %v3460_v24 = vadd.f32 %v3459_v1, %v3404_v8 }
 0x4e4   :  { %v6726_v35 = vld [vmem:[#allocation4 + $0x12] sm:$0xff]  ;;  %v3468_v27 = vpop.f32.mrf.mxu3 }
 0x4e5   :  { %v3513_v45 = vld [vmem:[#allocation4 + $0x11] sm:$0xff]  ;;  %3490 = vst.msk [vmem:[#allocation4 + $0x20] sm:$0xff] %vm2960_vm1, %v3460_v24  ;;  %5316 = vmatmul.msk.f32.gmra.mxu3 %vm2960_vm1, %v6726_v35 }
 0x4e6   :  { %v3502_v29 = vld [vmem:[#allocation4 + $0x18] sm:$0xff]  ;;  %5294 = vmatmul.msk.f32.gmra.mxu1 %vm2960_vm1, %v3513_v45  ;;  %v3878_v24 = vld [vmem:[#allocation4 + $0xb] sm:$0xff] }
 0x4e7   :  { %5305 = vmatmul.msk.f32.gmra.mxu2 %vm2960_vm1, %v3502_v29  ;;  %v3978_v45 = vld [vmem:[#allocation4 + $0xc] sm:$0xff] }
 0x4e8   :  { %v3406_v52 = vpop.f32.mrf.mxu2  ;;  %v3879_v29 = vld [vmem:[#allocation4 + $0x13] sm:$0xff] }
 0x4e9   :  { %v3407_v5 = vadd.f32 %v3406_v52, %v3350_v13  ;;  %v3368_v13 = vpop.f32.mrf.mxu1 }
 0x4eb   :  { %v3463_v18 = vadd.f32 %v3462_v47, %v3407_v5 }
 0x4ec   :  { %v6733_v60 = vld [vmem:[#allocation4 + $0x1a] sm:$0xff]  ;;  %v3471_v40 = vpop.f32.mrf.mxu3 }
 0x4ed   :  { %v3514_v26 = vld [vmem:[#allocation4 + $0x19] sm:$0xff]  ;;  %3491 = vst.msk [vmem:[#allocation4 + $0x28] sm:$0xff] %vm2960_vm1, %v3463_v18  ;;  %5317 = vmatmul.msk.f32.gmra.mxu3 %vm2960_vm1, %v6733_v60 }
 0x4ee   :  { %v3503_v7 = vld [vmem:[#allocation4 + $0x20] sm:$0xff]  ;;  %5295 = vmatmul.msk.f32.gmra.mxu1 %vm2960_vm1, %v3514_v26 }
 0x4ef   :  { %5306 = vmatmul.msk.f32.gmra.mxu2 %vm2960_vm1, %v3503_v7 }
 0x4f0   :  { %v3409_v10 = vpop.f32.mrf.mxu2 }
 0x4f1   :  { %v3410_v48 = vadd.f32 %v3409_v10, %v3353_v0  ;;  %v6804_v0 = vld [vmem:[#allocation4 + $0x14] sm:$0xff]  ;;  %v3371_v52 = vpop.f32.mrf.mxu1 }
 0x4f3   :  { %v3466_v62 = vadd.f32 %v3465_v2, %v3410_v48  ;;  %v3880_v2 = vld [vmem:[#allocation4 + $0x1b] sm:$0xff] }
 0x4f4   :  { %v6740_v30 = vld [vmem:[#allocation4 + $0x22] sm:$0xff]  ;;  %v3474_v44 = vpop.f32.mrf.mxu3 }
 0x4f5   :  { %v3515_v58 = vld [vmem:[#allocation4 + $0x21] sm:$0xff]  ;;  %3492 = vst.msk [vmem:[#allocation4 + $0x30] sm:$0xff] %vm2960_vm1, %v3466_v62  ;;  %5318 = vmatmul.msk.f32.gmra.mxu3 %vm2960_vm1, %v6740_v30 }
 0x4f6   :  { %v3504_v46 = vld [vmem:[#allocation4 + $0x28] sm:$0xff]  ;;  %5296 = vmatmul.msk.f32.gmra.mxu1 %vm2960_vm1, %v3515_v58  ;;  %v5373_v58 = vld [vmem:[%s7350_s5 + $0x78] sm:$0xff] }
 0x4f7   :  { %5307 = vmatmul.msk.f32.gmra.mxu2 %vm2960_vm1, %v3504_v46  ;;  %v5372_v46 = vld [vmem:[%s7350_s5 + $0x70] sm:$0xff] }
 0x4f8   :  { %v3412_v59 = vpop.f32.mrf.mxu2  ;;  %4235 = vmatpush.msrb.mxu2 %v5373_v58 }
 0x4f9   :  { %v3413_v12 = vadd.f32 %v3412_v59, %v3356_v42  ;;  %v3881_v42 = vld [vmem:[#allocation4 + $0x23] sm:$0xff] }
 0x4fa   :  { %v5385_v59 = vld [vmem:[%s7350_s5 + $0x88] sm:$0xff]  ;;  %4236 = vmatpush.msrb.mxu2 %v5372_v46 }
 0x4fb   :  { %v3469_v19 = vadd.f32 %v3468_v27, %v3413_v12  ;;  %4335 = vmatpush.msrb.mxu3 %v5385_v59  ;;  %v5361_v12 = vld [vmem:[%s7350_s5 + $0x68] sm:$0xff] }
 0x4fc   :  { %v6747_v57 = vld [vmem:[#allocation4 + $0x2a] sm:$0xff]  ;;  %v3477_v1 = vpop.f32.mrf.mxu3  ;;  %4135 = vmatpush.msrb.mxu1 %v5361_v12 }
 0x4fd   :  { %v3516_v25 = vld [vmem:[#allocation4 + $0x29] sm:$0xff]  ;;  %3493 = vst.msk [vmem:[#allocation4 + $0x38] sm:$0xff] %vm2960_vm1, %v3469_v19  ;;  %5319 = vmatmul.msk.f32.gmra.mxu3 %vm2960_vm1, %v6747_v57 }
 0x4fe   :  { %v3505_v51 = vld [vmem:[#allocation4 + $0x30] sm:$0xff]  ;;  %5297 = vmatmul.msk.f32.gmra.mxu1 %vm2960_vm1, %v3516_v25  ;;  %v5360_v25 = vld [vmem:[%s7350_s5 + $0x60] sm:$0xff] }
 0x4ff   :  { %5308 = vmatmul.msk.f32.gmra.mxu2 %vm2960_vm1, %v3505_v51  ;;  %v3882_v10 = vld [vmem:[#allocation4 + $0x2b] sm:$0xff]  ;;  %4136 = vmatpush.msrb.mxu1 %v5360_v25 }
 0x500   :  { %v3415_v39 = vpop.f32.mrf.mxu2  ;;  %v6826_v27 = vld [vmem:[#allocation4 + $0x2c] sm:$0xff] }
 0x501   :  { %v3416_v32 = vadd.f32 %v3415_v39, %v3359_v61 }
 0x503   :  { %v3472_v22 = vadd.f32 %v3471_v40, %v3416_v32  ;;  %v5384_v40 = vld [vmem:[%s7350_s5 + $0x80] sm:$0xff] }
 0x504   :  { %v6769_v20 = vld [vmem:[#allocation4 + $0x32] sm:$0xff]  ;;  %v3480_v28 = vpop.f32.mrf.mxu3  ;;  %4336 = vmatpush.msrb.mxu3 %v5384_v40 }
 0x505   :  { %v3517_v33 = vld [vmem:[#allocation4 + $0x31] sm:$0xff]  ;;  %3494 = vst.msk [vmem:[#allocation4 + $0x40] sm:$0xff] %vm2960_vm1, %v3472_v22  ;;  %5320 = vmatmul.msk.f32.gmra.mxu3 %vm2960_vm1, %v6769_v20 }
 0x506   :  { %v3506_v21 = vld [vmem:[#allocation4 + $0x38] sm:$0xff]  ;;  %5298 = vmatmul.msk.f32.gmra.mxu1 %vm2960_vm1, %v3517_v33 }
 0x507   :  { %5309 = vmatmul.msk.f32.gmra.mxu2 %vm2960_vm1, %v3506_v21  ;;  %v6833_v48 = vld [vmem:[#allocation4 + $0x34] sm:$0xff] }
 0x508   :  { %v3418_v38 = vpop.f32.mrf.mxu2 }
 0x509   :  { %v3419_v49 = vadd.f32 %v3418_v38, %v3362_v6 }
 0x50b   :  { %v3475_v56 = vadd.f32 %v3474_v44, %v3419_v49 }
 0x50c   :  { %v6779_v3 = vld [vmem:[#allocation4 + $0x3a] sm:$0xff]  ;;  %v3483_v26 = vpop.f32.mrf.mxu3 }
 0x50d   :  { %v3518_v37 = vld [vmem:[#allocation4 + $0x39] sm:$0xff]  ;;  %3495 = vst.msk [vmem:[#allocation4 + $0x48] sm:$0xff] %vm2960_vm1, %v3475_v56  ;;  %5321 = vmatmul.msk.f32.gmra.mxu3 %vm2960_vm1, %v6779_v3 }
 0x50e   :  { %v3507_v31 = vld [vmem:[#allocation4 + $0x40] sm:$0xff]  ;;  %5299 = vmatmul.msk.f32.gmra.mxu1 %vm2960_vm1, %v3518_v37 }
 0x50f   :  { %5310 = vmatmul.msk.f32.gmra.mxu2 %vm2960_vm1, %v3507_v31  ;;  %v3884_v62 = vld [vmem:[#allocation4 + $0x3b] sm:$0xff] }
 0x510   :  { %v3421_v34 = vpop.f32.mrf.mxu2  ;;  %v6855_v19 = vld [vmem:[#allocation4 + $0x3c] sm:$0xff] }
 0x511   :  { %v3422_v4 = vadd.f32 %v3421_v34, %v3365_v17  ;;  %v4178_v31 = vld [vmem:[#allocation4 + $0x15] sm:$0xff]  ;;  %v4183_v12 = vld [vmem:[#allocation4 + $0x3d] sm:$0xff] }
 0x513   :  { %v3478_v54 = vadd.f32 %v3477_v1, %v3422_v4 }
 0x514   :  { %v6786_v9 = vld [vmem:[#allocation4 + $0x42] sm:$0xff] }
 0x515   :  { %v3519_v11 = vld [vmem:[#allocation4 + $0x41] sm:$0xff]  ;;  %3496 = vst.msk [vmem:[#allocation4 + $0x50] sm:$0xff] %vm2960_vm1, %v3478_v54  ;;  %5322 = vmatmul.msk.f32.gmra.mxu3 %vm2960_vm1, %v6786_v9 }
 0x516   :  { %v3508_v53 = vld [vmem:[#allocation4 + $0x48] sm:$0xff]  ;;  %5300 = vmatmul.msk.f32.gmra.mxu1 %vm2960_vm1, %v3519_v11  ;;  %v4278_v11 = vld [vmem:[#allocation4 + $0x16] sm:$0xff] }
 0x517   :  { %5311 = vmatmul.msk.f32.gmra.mxu2 %vm2960_vm1, %v3508_v53  ;;  %v6867_v23 = vld [vmem:[#allocation4 + $0x44] sm:$0xff] }
 0x518   :  { %v3424_v63 = vpop.f32.mrf.mxu2  ;;  %v4179_v53 = vld [vmem:[#allocation4 + $0x1d] sm:$0xff] }
 0x519   :  { %v3425_v36 = vadd.f32 %v3424_v63, %v3368_v13 }
 0x51b   :  { %v3481_v47 = vadd.f32 %v3480_v28, %v3425_v36 }
 0x51c   :  { %v6793_v43 = vld [vmem:[#allocation4 + $0x4a] sm:$0xff] }
 0x51d   :  { %v3520_v8 = vld [vmem:[#allocation4 + $0x49] sm:$0xff]  ;;  %5323 = vmatmul.msk.f32.gmra.mxu3 %vm2960_vm1, %v6793_v43  ;;  %3497 = vst.msk [vmem:[#allocation4 + $0x58] sm:$0xff] %vm2960_vm1, %v3481_v47 }
 0x51e   :  { %5301 = vmatmul.msk.f32.gmra.mxu1 %vm2960_vm1, %v3520_v8  ;;  %v3886_v39 = vld [vmem:[#allocation4 + $0x4b] sm:$0xff] }
 0x51f   :  { %5338 = vmatmul.msk.f32.vlgmr.msra.gmra.mxu2 %vm2960_vm1, %v3878_v24  ;;  %v6876_v44 = vld [vmem:[#allocation4 + $0x4c] sm:$0xff] }
 0x520   :  { %v3427_v5 = vpop.f32.mrf.mxu2  ;;  %v4180_v8 = vld [vmem:[#allocation4 + $0x25] sm:$0xff] }
 0x521   :  { %v3428_v18 = vadd.f32 %v3427_v5, %v3371_v52  ;;  %v4280_v5 = vld [vmem:[#allocation4 + $0x26] sm:$0xff] }
 0x523   :  { %v3484_v7 = vadd.f32 %v3483_v26, %v3428_v18  ;;  %v4181_v18 = vld [vmem:[#allocation4 + $0x2d] sm:$0xff] }
 0x524   :  { %v3887_v21 = vld [vmem:[#allocation4 + $0x53] sm:$0xff] }
 0x525   :  { %5350 = vmatmul.msk.f32.vlgmr.msra.gmra.mxu3 %vm2960_vm1, %v3978_v45  ;;  %3498 = vst.msk [vmem:[#allocation4 + $0x60] sm:$0xff] %vm2960_vm1, %v3484_v7  ;;  %v6885_v37 = vld [vmem:[#allocation4 + $0x54] sm:$0xff] }
 0x526   :  { %5326 = vmatmul.msk.f32.vlgmr.msra.gmra.mxu1 %vm2960_vm1, %v6719_v14  ;;  %v6811_v14 = vld [vmem:[#allocation4 + $0x1c] sm:$0xff]  ;;  %v3787_v17 = vld [vmem:[#allocation4 + $0x52] sm:$0xff] }
 0x527   :  { %5339 = vmatmul.msk.f32.gmra.mxu2 %vm2960_vm1, %v3879_v29 }
 0x52d   :  { %5351 = vmatmul.msk.f32.gmra.mxu3 %vm2960_vm1, %v6804_v0 }
 0x52e   :  { %5327 = vmatmul.msk.f32.gmra.mxu1 %vm2960_vm1, %v6726_v35  ;;  %v6819_v35 = vld [vmem:[#allocation4 + $0x24] sm:$0xff] }
 0x52f   :  { %5340 = vmatmul.msk.f32.gmra.mxu2 %vm2960_vm1, %v3880_v2 }
 0x535   :  { %5352 = vmatmul.msk.f32.gmra.mxu3 %vm2960_vm1, %v6811_v14 }
 0x536   :  { %5328 = vmatmul.msk.f32.gmra.mxu1 %vm2960_vm1, %v6733_v60  ;;  %v3883_v60 = vld [vmem:[#allocation4 + $0x33] sm:$0xff] }
 0x537   :  { %5341 = vmatmul.msk.f32.gmra.mxu2 %vm2960_vm1, %v3881_v42 }
 0x53d   :  { %5353 = vmatmul.msk.f32.gmra.mxu3 %vm2960_vm1, %v6819_v35 }
 0x53e   :  { %5329 = vmatmul.msk.f32.gmra.mxu1 %vm2960_vm1, %v6740_v30 }
 0x53f   :  { %5342 = vmatmul.msk.f32.gmra.mxu2 %vm2960_vm1, %v3882_v10 }
 0x545   :  { %5354 = vmatmul.msk.f32.gmra.mxu3 %vm2960_vm1, %v6826_v27 }
 0x546   :  { %5330 = vmatmul.msk.f32.gmra.mxu1 %vm2960_vm1, %v6747_v57  ;;  %v3885_v57 = vld [vmem:[#allocation4 + $0x43] sm:$0xff] }
 0x547   :  { %5343 = vmatmul.msk.f32.gmra.mxu2 %vm2960_vm1, %v3883_v60  ;;  %v4281_v60 = vld [vmem:[#allocation4 + $0x2e] sm:$0xff] }
 0x54d   :  { %5355 = vmatmul.msk.f32.gmra.mxu3 %vm2960_vm1, %v6833_v48 }
 0x54e   :  { %5331 = vmatmul.msk.f32.gmra.mxu1 %vm2960_vm1, %v6769_v20 }
 0x54f   :  { %5344 = vmatmul.msk.f32.gmra.mxu2 %vm2960_vm1, %v3884_v62  ;;  %v4182_v62 = vld [vmem:[#allocation4 + $0x35] sm:$0xff] }
 0x550   :  { %v3648_v30 = vpop.f32.mrf.mxu2 }
 0x553   :  { %v3571_v61 = vpop.f32.mrf.mxu1 }
 0x554   :  { %v3649_v51 = vadd.f32 %v3648_v30, %v3571_v61  ;;  %v4282_v61 = vld [vmem:[#allocation4 + $0x36] sm:$0xff] }
 0x555   :  { %5356 = vmatmul.msk.f32.gmra.mxu3 %vm2960_vm1, %v6855_v19 }
 0x556   :  { %5332 = vmatmul.msk.f32.gmra.mxu1 %vm2960_vm1, %v6779_v3 }
 0x557   :  { %5345 = vmatmul.msk.f32.gmra.mxu2 %vm2960_vm1, %v3885_v57 }
 0x558   :  { %v3738_v15 = vpop.f32.mrf.mxu3 }
 0x559   :  { %v6865_v41 = vadd.f32 %v3738_v15, %v3649_v51  ;;  %v4283_v15 = vld [vmem:[#allocation4 + $0x3e] sm:$0xff] }
 0x55a   :  { %v3651_v16 = vpop.f32.mrf.mxu2 }
 0x55b   :  { %v3574_v55 = vpop.f32.mrf.mxu1 }
 0x55c   :  { %v3652_v32 = vadd.f32 %v3651_v16, %v3574_v55  ;;  %v4184_v16 = vld [vmem:[#allocation4 + $0x45] sm:$0xff] }
 0x55d   :  { %5357 = vmatmul.msk.f32.gmra.mxu3 %vm2960_vm1, %v6867_v23 }
 0x55e   :  { %5333 = vmatmul.msk.f32.gmra.mxu1 %vm2960_vm1, %v6786_v9 }
 0x55f   :  { %5346 = vmatmul.msk.f32.gmra.mxu2 %vm2960_vm1, %v3886_v39 }
 0x560   :  { %v3741_v6 = vpop.f32.mrf.mxu3 }
 0x561   :  { %v6874_v22 = vadd.f32 %v3741_v6, %v3652_v32 }
 0x562   :  { %v3654_v20 = vpop.f32.mrf.mxu2 }
 0x563   :  { %v3577_v33 = vpop.f32.mrf.mxu1 }
 0x564   :  { %v3655_v50 = vadd.f32 %v3654_v20, %v3577_v33  ;;  %v4284_v20 = vld [vmem:[#allocation4 + $0x46] sm:$0xff] }
 0x565   :  { %5358 = vmatmul.msk.f32.gmra.mxu3 %vm2960_vm1, %v6876_v44 }
 0x566   :  { %5334 = vmatmul.msk.f32.gmra.mxu1 %vm2960_vm1, %v6793_v43  ;;  %v4279_v43 = vld [vmem:[#allocation4 + $0x1e] sm:$0xff] }
 0x567   :  { %5347 = vmatmul.msk.f32.gmra.mxu2 %vm2960_vm1, %v3887_v21  ;;  %v4185_v21 = vld [vmem:[#allocation4 + $0x4d] sm:$0xff] }
 0x568   :  { %v3744_v38 = vpop.f32.mrf.mxu3 }
 0x569   :  { %v6883_v49 = vadd.f32 %v3744_v38, %v3655_v50 }
 0x56a   :  { %v3657_v56 = vpop.f32.mrf.mxu2 }
 0x56b   :  { %v3580_v3 = vpop.f32.mrf.mxu1 }
 0x56c   :  { %v3658_v1 = vadd.f32 %v3657_v56, %v3580_v3 }
 0x56d   :  { %5359 = vmatmul.msk.f32.gmra.mxu3 %vm2960_vm1, %v6885_v37 }
 0x56e   :  { %5335 = vmatmul.msk.f32.gmra.mxu1 %vm2960_vm1, %v3787_v17  ;;  %v4285_v17 = vld [vmem:[#allocation4 + $0x4e] sm:$0xff] }
 0x56f   :  { %5374 = vmatmul.msk.f32.vlgmr.msrb.gmra.mxu2 %vm2960_vm1, %v4178_v31  ;;  %v4186_v31 = vld [vmem:[#allocation4 + $0x55] sm:$0xff] }
 0x570   :  { %v3747_v34 = vpop.f32.mrf.mxu3 }
 0x571   :  { %v6891_v4 = vadd.f32 %v3747_v34, %v3658_v1 }
 0x572   :  { %v3660_v54 = vpop.f32.mrf.mxu2 }
 0x573   :  { %v3583_v9 = vpop.f32.mrf.mxu1 }
 0x574   :  { %v3661_v13 = vadd.f32 %v3660_v54, %v3583_v9 }
 0x575   :  { %5386 = vmatmul.msk.f32.vlgmr.msrb.gmra.mxu3 %vm2960_vm1, %v4278_v11  ;;  %v4286_v11 = vld [vmem:[#allocation4 + $0x56] sm:$0xff] }
 0x576   :  { %5362 = vmatmul.msk.f32.vlgmr.msrb.gmra.mxu1 %vm2960_vm1, %v6804_v0 }
 0x577   :  { %5375 = vmatmul.msk.f32.gmra.mxu2 %vm2960_vm1, %v4179_v53  ;;  %v4187_v53 = vld [vmem:[#allocation4 + $0x5d] sm:$0xff] }
 0x578   :  { %v3750_v63 = vpop.f32.mrf.mxu3 }
 0x579   :  { %v6897_v28 = vadd.f32 %v3750_v63, %v3661_v13 }
 0x57a   :  { %v3663_v36 = vpop.f32.mrf.mxu2 }
 0x57b   :  { %v3586_v47 = vpop.f32.mrf.mxu1 }
 0x57c   :  { %v3664_v24 = vadd.f32 %v3663_v36, %v3586_v47 }
 0x57d   :  { %5387 = vmatmul.msk.f32.gmra.mxu3 %vm2960_vm1, %v4279_v43  ;;  %v4287_v43 = vld [vmem:[#allocation4 + $0x5e] sm:$0xff] }
 0x57e   :  { %5363 = vmatmul.msk.f32.gmra.mxu1 %vm2960_vm1, %v6811_v14 }
 0x57f   :  { %5376 = vmatmul.msk.f32.gmra.mxu2 %vm2960_vm1, %v4180_v8  ;;  %v4087_v8 = vld [vmem:[#allocation4 + $0x5c] sm:$0xff] }
 0x580   :  { %v3753_v45 = vpop.f32.mrf.mxu3 }
 0x581   :  { %v6903_v29 = vadd.f32 %v3753_v45, %v3664_v24 }
 0x582   :  { %v3666_v0 = vpop.f32.mrf.mxu2 }
 0x583   :  { %v3589_v2 = vpop.f32.mrf.mxu1 }
 0x584   :  { %v3667_v52 = vadd.f32 %v3666_v0, %v3589_v2 }
 0x585   :  { %5388 = vmatmul.msk.f32.gmra.mxu3 %vm2960_vm1, %v4280_v5 }
 0x586   :  { %5364 = vmatmul.msk.f32.gmra.mxu1 %vm2960_vm1, %v6819_v35 }
 0x587   :  { %5377 = vmatmul.msk.f32.gmra.mxu2 %vm2960_vm1, %v4181_v18 }
 0x588   :  { %v3756_v26 = vpop.f32.mrf.mxu3 }
 0x589   :  { %v6909_v7 = vadd.f32 %v3756_v26, %v3667_v52 }
 0x58a   :  { %v3669_v14 = vpop.f32.mrf.mxu2 }
 0x58b   :  { %v3592_v42 = vpop.f32.mrf.mxu1 }
 0x58c   :  { %v3670_v10 = vadd.f32 %v3669_v14, %v3592_v42 }
 0x58d   :  { %5389 = vmatmul.msk.f32.gmra.mxu3 %vm2960_vm1, %v4281_v60 }
 0x58e   :  { %5365 = vmatmul.msk.f32.gmra.mxu1 %vm2960_vm1, %v6826_v27 }
 0x58f   :  { %5378 = vmatmul.msk.f32.gmra.mxu2 %vm2960_vm1, %v4182_v62 }
 0x590   :  { %v3759_v30 = vpop.f32.mrf.mxu3 }
 0x591   :  { %v6915_v35 = vadd.f32 %v3759_v30, %v3670_v10 }
 0x592   :  { %v3672_v58 = vpop.f32.mrf.mxu2 }
 0x593   :  { %v3595_v46 = vpop.f32.mrf.mxu1 }
 0x594   :  { %v3673_v59 = vadd.f32 %v3672_v58, %v3595_v46 }
 0x595   :  { %5390 = vmatmul.msk.f32.gmra.mxu3 %vm2960_vm1, %v4282_v61 }
 0x596   :  { %5366 = vmatmul.msk.f32.gmra.mxu1 %vm2960_vm1, %v6833_v48 }
 0x597   :  { %5379 = vmatmul.msk.f32.gmra.mxu2 %vm2960_vm1, %v4183_v12 }
 0x598   :  { %v3762_v40 = vpop.f32.mrf.mxu3 }
 0x599   :  { %v6921_v27 = vadd.f32 %v3762_v40, %v3673_v59 }
 0x59a   :  { %v3675_v57 = vpop.f32.mrf.mxu2 }
 0x59b   :  { %v3598_v25 = vpop.f32.mrf.mxu1 }
 0x59c   :  { %v3676_v51 = vadd.f32 %v3675_v57, %v3598_v25 }
 0x59d   :  { %5391 = vmatmul.msk.f32.gmra.mxu3 %vm2960_vm1, %v4283_v15 }
 0x59e   :  { %5367 = vmatmul.msk.f32.gmra.mxu1 %vm2960_vm1, %v6855_v19 }
 0x59f   :  { %5380 = vmatmul.msk.f32.gmra.mxu2 %vm2960_vm1, %v4184_v16 }
 0x5a0   :  { %v3765_v55 = vpop.f32.mrf.mxu3 }
 0x5a1   :  { %v6927_v48 = vadd.f32 %v3765_v55, %v3676_v51 }
 0x5a2   :  { %v3938_v39 = vpop.f32.mrf.mxu2 }
 0x5a3   :  { %v3838_v32 = vpop.f32.mrf.mxu1 }
 0x5a4   :  { %v3868_v6 = vadd.f32 %v3838_v32, %v6865_v41 }
 0x5a5   :  { %5392 = vmatmul.msk.f32.gmra.mxu3 %vm2960_vm1, %v4284_v20 }
 0x5a6   :  { %v3968_v33 = vadd.f32 %v3938_v39, %v3868_v6  ;;  %5368 = vmatmul.msk.f32.gmra.mxu1 %vm2960_vm1, %v6867_v23 }
 0x5a7   :  { %5381 = vmatmul.msk.f32.gmra.mxu2 %vm2960_vm1, %v4185_v21 }
 0x5a8   :  { %v4038_v19 = vpop.f32.mrf.mxu3 }
 0x5a9   :  { %v6934_v50 = vadd.f32 %v4038_v19, %v3968_v33 }
 0x5aa   :  { %v3941_v38 = vpop.f32.mrf.mxu2 }
 0x5ab   :  { %v3841_v56 = vpop.f32.mrf.mxu1 }
 0x5ac   :  { %v3869_v3 = vadd.f32 %v3841_v56, %v6874_v22 }
 0x5ad   :  { %5393 = vmatmul.msk.f32.gmra.mxu3 %vm2960_vm1, %v4285_v17 }
 0x5ae   :  { %v3969_v41 = vadd.f32 %v3941_v38, %v3869_v3  ;;  %5369 = vmatmul.msk.f32.gmra.mxu1 %vm2960_vm1, %v6876_v44 }
 0x5af   :  { %5382 = vmatmul.msk.f32.gmra.mxu2 %vm2960_vm1, %v4186_v31 }
 0x5b0   :  { %v4041_v23 = vpop.f32.mrf.mxu3 }
 0x5b1   :  { %v6941_v1 = vadd.f32 %v4041_v23, %v3969_v41 }
 0x5b2   :  { %v3944_v34 = vpop.f32.mrf.mxu2 }
 0x5b3   :  { %v3844_v54 = vpop.f32.mrf.mxu1 }
 0x5b4   :  { %v3870_v9 = vadd.f32 %v3844_v54, %v6883_v49 }
 0x5b5   :  { %5394 = vmatmul.msk.f32.gmra.mxu3 %vm2960_vm1, %v4286_v11 }
 0x5b6   :  { %v3970_v22 = vadd.f32 %v3944_v34, %v3870_v9  ;;  %5370 = vmatmul.msk.f32.gmra.mxu1 %vm2960_vm1, %v6885_v37 }
 0x5b7   :  { %5383 = vmatmul.msk.f32.gmra.mxu2 %vm2960_vm1, %v4187_v53 }
 0x5b8   :  { %v4044_v44 = vpop.f32.mrf.mxu3 }
 0x5b9   :  { %v6948_v13 = vadd.f32 %v4044_v44, %v3970_v22 }
 0x5ba   :  { %v3947_v63 = vpop.f32.mrf.mxu2 }
 0x5bb   :  { %v3847_v36 = vpop.f32.mrf.mxu1 }
 0x5bc   :  { %v3871_v47 = vadd.f32 %v3847_v36, %v6891_v4 }
 0x5bd   :  { %5395 = vmatmul.msk.f32.gmra.mxu3 %vm2960_vm1, %v4287_v43 }
 0x5be   :  { %v3971_v49 = vadd.f32 %v3947_v63, %v3871_v47  ;;  %5371 = vmatmul.msk.f32.gmra.mxu1 %vm2960_vm1, %v4087_v8 }
 0x5c0   :  { %v4047_v24 = vpop.f32.mrf.mxu3 }
 0x5c1   :  { %v6953_v45 = vadd.f32 %v4047_v24, %v3971_v49 }
 0x5c2   :  { %v3950_v37 = vpop.f32.mrf.mxu2 }
 0x5c3   :  { %v3850_v0 = vpop.f32.mrf.mxu1 }
 0x5c4   :  { %v3872_v2 = vadd.f32 %v3850_v0, %v6897_v28 }
 0x5c6   :  { %v3972_v52 = vadd.f32 %v3950_v37, %v3872_v2 }
 0x5c8   :  { %v4050_v5 = vpop.f32.mrf.mxu3 }
 0x5c9   :  { %v6956_v18 = vadd.f32 %v4050_v5, %v3972_v52 }
 0x5ca   :  { %v3953_v26 = vpop.f32.mrf.mxu2 }
 0x5cb   :  { %v3853_v4 = vpop.f32.mrf.mxu1 }
 0x5cc   :  { %v3873_v14 = vadd.f32 %v3853_v4, %v6903_v29 }
 0x5ce   :  { %v3973_v42 = vadd.f32 %v3953_v26, %v3873_v14 }
 0x5d0   :  { %v4053_v10 = vpop.f32.mrf.mxu3 }
 0x5d1   :  { %v6959_v60 = vadd.f32 %v4053_v10, %v3973_v42 }
 0x5d2   :  { %v3956_v62 = vpop.f32.mrf.mxu2 }
 0x5d3   :  { %v3856_v30 = vpop.f32.mrf.mxu1 }
 0x5d4   :  { %v3874_v58 = vadd.f32 %v3856_v30, %v6909_v7 }
 0x5d6   :  { %v3974_v46 = vadd.f32 %v3956_v62, %v3874_v58 }
 0x5d8   :  { %v4056_v59 = vpop.f32.mrf.mxu3 }
 0x5d9   :  { %v6962_v61 = vadd.f32 %v4056_v59, %v3974_v46 }
 0x5da   :  { %v3959_v28 = vpop.f32.mrf.mxu2 }
 0x5db   :  { %v3859_v12 = vpop.f32.mrf.mxu1 }
 0x5dc   :  { %v3875_v40 = vadd.f32 %v3859_v12, %v6915_v35 }
 0x5de   :  { %v3975_v57 = vadd.f32 %v3959_v28, %v3875_v40 }
 0x5e0   :  { %v4059_v25 = vpop.f32.mrf.mxu3 }
 0x5e1   :  { %v6965_v51 = vadd.f32 %v4059_v25, %v3975_v57 }
 0x5e2   :  { %v3962_v29 = vpop.f32.mrf.mxu2 }
 0x5e3   :  { %v3862_v15 = vpop.f32.mrf.mxu1 }
 0x5e4   :  { %v3876_v16 = vadd.f32 %v3862_v15, %v6921_v27  ;;  %v6977_v27 = vld [vmem:[%s7351_s6] ss:$0 sm:$0xff] }
 0x5e6   :  { %v3976_v55 = vadd.f32 %v3962_v29, %v3876_v16 }
 0x5e8   :  { %v4062_v39 = vpop.f32.mrf.mxu3 }
 0x5e9   :  { %v6968_v32 = vadd.f32 %v4062_v39, %v3976_v55 }
 0x5ea   :  { %v3965_v7 = vpop.f32.mrf.mxu2 }
 0x5eb   :  { %v3865_v6 = vpop.f32.mrf.mxu1 }
 0x5ec   :  { %v3877_v20 = vadd.f32 %v3865_v6, %v6927_v48  ;;  %v6982_v48 = vld [vmem:[%s7352_s7] ss:$0 sm:$0xff] }
 0x5ee   :  { %v3977_v33 = vadd.f32 %v3965_v7, %v3877_v20 }
 0x5f0   :  { %v4065_v21 = vpop.f32.mrf.mxu3 }
 0x5f1   :  { %v6971_v19 = vadd.f32 %v4065_v21, %v3977_v33 }
 0x5f2   :  { %v4238_v35 = vpop.f32.mrf.mxu2 }
 0x5f3   :  { %v4138_v38 = vpop.f32.mrf.mxu1 }
 0x5f4   :  { %v4168_v56 = vadd.f32 %v4138_v38, %v6934_v50 }
 0x5f6   :  { %v4268_v3 = vadd.f32 %v4238_v35, %v4168_v56 }
 0x5f8   :  { %v4338_v17 = vpop.f32.mrf.mxu3 }
 0x5f9   :  { %v4368_v41 = vadd.f32 %v4338_v17, %v4268_v3 }
 0x5fa   :  { %v4241_v31 = vpop.f32.mrf.mxu2 }
 0x5fb   :  { %v4141_v23 = vpop.f32.mrf.mxu1  ;;  %v4382_v34 = vmul.f32 %v6977_v27, %v4368_v41 }
 0x5fc   :  { %v4169_v54 = vadd.f32 %v4141_v23, %v6941_v1 }
 0x5fd   :  { %v4396_v50 = vadd.f32 %v6982_v48, %v4382_v34 }
 0x5fe   :  { %v4269_v11 = vadd.f32 %v4241_v31, %v4169_v54 }
 0x5ff   :  { %v4406_v9 = vmax.f32 %v4396_v50, 0.0 }
 0x600   :  { %v4341_v22 = vpop.f32.mrf.mxu3 }
 0x601   :  { %4417 = vst.msk [vmem:[#allocation5] sm:$0xff] %vm4416_vm4, %v4406_v9  ;;  %v4369_v53 = vadd.f32 %v4341_v22, %v4269_v11 }
 0x602   :  { %v4244_v44 = vpop.f32.mrf.mxu2 }
 0x603   :  { %v4144_v63 = vpop.f32.mrf.mxu1  ;;  %v4383_v36 = vmul.f32 %v6977_v27, %v4369_v53 }
 0x604   :  { %v4170_v47 = vadd.f32 %v4144_v63, %v6948_v13 }
 0x605   :  { %v4397_v43 = vadd.f32 %v6982_v48, %v4383_v36 }
 0x606   :  { %v4270_v49 = vadd.f32 %v4244_v44, %v4170_v47 }
 0x607   :  { %v4407_v8 = vmax.f32 %v4397_v43, 0.0 }
 0x608   :  { %v4344_v1 = vpop.f32.mrf.mxu3  ;;  %v4427_v39 = vld [vmem:[#allocation5] sm:$0x1]  ;;  %v4428_v7 = vld [vmem:[#allocation5 + $0x1] sm:$0x1]  ;;  %v4447_v6 = vld [vmem:[#allocation5 + $0x2] sm:$0x1] }
 0x609   :  { %v4370_v24 = vadd.f32 %v4344_v1, %v4270_v49  ;;  %4418 = vst.msk [vmem:[#allocation5 + $0x8] sm:$0xff] %vm4416_vm4, %v4407_v8  ;;  %v4448_v20 = vld [vmem:[#allocation5 + $0x3] sm:$0x1]  ;;  %v4429_v31 = vmax.f32 %v4427_v39, %v4428_v7  ;;  %v4468_v34 = vld [vmem:[#allocation5 + $0x4] sm:$0x1] }
 0x60a   :  { %v4247_v37 = vpop.f32.mrf.mxu2  ;;  %v4449_v23 = vmax.f32 %v4447_v6, %v4448_v20  ;;  %v4469_v54 = vld [vmem:[#allocation5 + $0x5] sm:$0x1]  ;;  %v4489_v8 = vld [vmem:[#allocation5 + $0x6] sm:$0x1]  ;;  %v4490_v49 = vld [vmem:[#allocation5 + $0x7] sm:$0x1] }
 0x60b   :  { %v4147_v0 = vpop.f32.mrf.mxu1  ;;  %v4384_v2 = vmul.f32 %v6977_v27, %v4370_v24  ;;  %v4470_v63 = vmax.f32 %v4468_v34, %v4469_v54 }
 0x60c   :  { %v4171_v52 = vadd.f32 %v4147_v0, %v6953_v45  ;;  %v5398_v0 = vld [vmem:[%s7353_s8 + $0x30] sm:$0xff] }
 0x60d   :  { %v4398_v5 = vadd.f32 %v6982_v48, %v4384_v2  ;;  %v4434_v2 = vld [vmem:[%s7353_s8] sm:$0xff] }
 0x60e   :  { %v4271_v4 = vadd.f32 %v4247_v37, %v4171_v52  ;;  %v4436_v37 = vld [vmem:[%s7353_s8 + $0x10] sm:$0xff] }
 0x60f   :  { %v4408_v26 = vmax.f32 %v4398_v5, 0.0 }
 0x610   :  { %v4347_v14 = vpop.f32.mrf.mxu3  ;;  %v4430_v29 = vld [vmem:[#allocation5 + $0xa] sm:$0x1]  ;;  %v4431_v15 = vld [vmem:[#allocation5 + $0xb] sm:$0x1]  ;;  %v4450_v16 = vld [vmem:[#allocation5 + $0xc] sm:$0x1] }
 0x611   :  { %v4371_v13 = vadd.f32 %v4347_v14, %v4271_v4  ;;  %4419 = vst.msk [vmem:[#allocation5 + $0x10] sm:$0xff] %vm4416_vm4, %v4408_v26  ;;  %v4451_v55 = vld [vmem:[#allocation5 + $0xd] sm:$0x1]  ;;  %v4432_v35 = vmax.f32 %v4430_v29, %v4431_v15  ;;  %v4471_v56 = vld [vmem:[#allocation5 + $0xe] sm:$0x1]  ;;  %v5397_v15 = vld [vmem:[%s7353_s8 + $0x28] sm:$0xff] }
 0x612   :  { %v4250_v42 = vpop.f32.mrf.mxu2  ;;  %v4452_v38 = vmax.f32 %v4450_v16, %v4451_v55  ;;  %v4472_v3 = vld [vmem:[#allocation5 + $0xf] sm:$0x1] }
 0x613   :  { %v4150_v10 = vpop.f32.mrf.mxu1  ;;  %v4385_v62 = vmul.f32 %v6977_v27, %v4371_v13  ;;  %v4473_v9 = vmax.f32 %v4471_v56, %v4472_v3  ;;  %v4433_v53 = vmax.f32 %v4429_v31, %v4432_v35  ;;  %v4437_v16 = vld [vmem:[%s7353_s8 + $0x18] sm:$0xff] }
 0x614   :  { %v4172_v30 = vadd.f32 %v4150_v10, %v6956_v18  ;;  %v4453_v44 = vmax.f32 %v4449_v23, %v4452_v38  ;;  %v5399_v55 = vld [vmem:[%s7353_s8 + $0x38] sm:$0xff] }
 0x615   :  { %v4399_v58 = vadd.f32 %v6982_v48, %v4385_v62  ;;  %v4438_v14 = vperm.slane %v4433_v53, 0  ;;  %v5396_v62 = vld [vmem:[%s7353_s8 + $0x20] sm:$0xff] }
 0x616   :  { %v4272_v59 = vadd.f32 %v4250_v42, %v4172_v30  ;;  %v4459_v13 = vperm.slane %v4453_v44, 0  ;;  %v4435_v30 = vld [vmem:[%s7353_s8 + $0x8] sm:$0xff]  ;;  %v5406_v44 = vld [vmem:[%s7353_s8 + $0x70] sm:$0xff] }
 0x617   :  { %v4409_v46 = vmax.f32 %v4399_v58, 0.0  ;;  %v4491_v58 = vmax.f32 %v4489_v8, %v4490_v49  ;;  %v4440_v3 = vmul.f32 %v4438_v14, %v4435_v30 }
 0x618   :  { %v4350_v28 = vpop.f32.mrf.mxu3  ;;  %v4492_v36 = vld [vmem:[#allocation5 + $0x10] sm:$0x1]  ;;  %v4493_v47 = vld [vmem:[#allocation5 + $0x11] sm:$0x1]  ;;  %v4510_v42 = vld [vmem:[#allocation5 + $0x14] sm:$0x1]  ;;  %v4462_v39 = vmul.f32 %v5398_v0, %v4459_v13  ;;  %v4460_v56 = vmul.f32 %v5396_v62, %v4459_v13 }
 0x619   :  { %4420 = vst.msk [vmem:[#allocation5 + $0x18] sm:$0xff] %vm4416_vm4, %v4409_v46  ;;  %v4372_v45 = vadd.f32 %v4350_v28, %v4272_v59  ;;  %v4494_v52 = vmax.f32 %v4492_v36, %v4493_v47  ;;  %v4511_v46 = vld [vmem:[#allocation5 + $0x15] sm:$0x1]  ;;  %v4531_v6 = vld [vmem:[#allocation5 + $0x16] sm:$0x1]  ;;  %v5401_v36 = vld [vmem:[%s7353_s8 + $0x48] sm:$0xff] }
 0x61a   :  { %v4253_v12 = vpop.f32.mrf.mxu2  ;;  %v4532_v20 = vld [vmem:[#allocation5 + $0x17] sm:$0x1]  ;;  %v4512_v35 = vmax.f32 %v4510_v42, %v4511_v46  ;;  %v5403_v47 = vld [vmem:[%s7353_s8 + $0x58] sm:$0xff]  ;;  %v5410_v46 = vld [vmem:[%s7353_s8 + $0x90] sm:$0xff] }
 0x61b   :  { %v4153_v40 = vpop.f32.mrf.mxu1  ;;  %v4386_v57 = vmul.f32 %v6977_v27, %v4372_v45  ;;  %v4495_v7 = vmax.f32 %v4491_v58, %v4494_v52  ;;  %v4533_v54 = vmax.f32 %v4531_v6, %v4532_v20  ;;  %v5404_v0 = vld [vmem:[%s7353_s8 + $0x60] sm:$0xff] }
 0x61c   :  { %v4173_v25 = vadd.f32 %v4153_v40, %v6959_v60 }
 0x61d   :  { %v4400_v18 = vadd.f32 %v6982_v48, %v4386_v57 }
 0x61e   :  { %v4273_v21 = vadd.f32 %v4253_v12, %v4173_v25 }
 0x61f   :  { %v4410_v33 = vmax.f32 %v4400_v18, 0.0  ;;  %v4441_v18 = vmul.f32 %v4438_v14, %v4436_v37 }
 0x620   :  { %v4353_v17 = vpop.f32.mrf.mxu3  ;;  %v4513_v5 = vld [vmem:[#allocation5 + $0x1e] sm:$0x1]  ;;  %v4514_v26 = vld [vmem:[#allocation5 + $0x1f] sm:$0x1] }
 0x621   :  { %4421 = vst.msk [vmem:[#allocation5 + $0x20] sm:$0xff] %vm4416_vm4, %v4410_v33  ;;  %v4373_v60 = vadd.f32 %v4353_v17, %v4273_v21  ;;  %v4515_v29 = vmax.f32 %v4513_v5, %v4514_v26  ;;  %v5402_v21 = vld [vmem:[%s7353_s8 + $0x50] sm:$0xff]  ;;  %v4461_v17 = vmul.f32 %v5397_v15, %v4459_v13  ;;  %v4466_v8 = vadd.f32 %v4462_v39, %v4441_v18  ;;  %v4574_v15 = vld [vmem:[#allocation5 + $0x1b] sm:$0x1] }
 0x622   :  { %v4256_v41 = vpop.f32.mrf.mxu2  ;;  %v5414_v18 = vld [vmem:[%s7353_s8 + $0xb0] sm:$0xff] }
 0x623   :  { %v4156_v50 = vpop.f32.mrf.mxu1  ;;  %v4387_v11 = vmul.f32 %v6977_v27, %v4373_v60  ;;  %v4442_v60 = vmul.f32 %v4438_v14, %v4437_v16  ;;  %v4516_v34 = vmax.f32 %v4512_v35, %v4515_v29  ;;  %v4465_v5 = vadd.f32 %v4461_v17, %v4440_v3  ;;  %v4573_v29 = vld [vmem:[#allocation5 + $0x1a] sm:$0x1] }
 0x624   :  { %v4174_v22 = vadd.f32 %v4156_v50, %v6962_v61  ;;  %v4474_v61 = vmax.f32 %v4470_v63, %v4473_v9  ;;  %v7044_v63 = vperm.slane %v4495_v7, 0  ;;  %v5409_v3 = vld [vmem:[%s7353_s8 + $0x88] sm:$0xff] }
 0x625   :  { %v4401_v43 = vadd.f32 %v6982_v48, %v4387_v11  ;;  %v5400_v11 = vld [vmem:[%s7353_s8 + $0x40] sm:$0xff] }
 0x626   :  { %v4274_v24 = vadd.f32 %v4256_v41, %v4174_v22  ;;  %v4480_v25 = vperm.slane %v4474_v61, 0  ;;  %v4463_v41 = vmul.f32 %v5399_v55, %v4459_v13  ;;  %v7058_v13 = vperm.slane %v4516_v34, 0  ;;  %v5408_v55 = vld [vmem:[%s7353_s8 + $0x80] sm:$0xff] }
 0x627   :  { %v4411_v1 = vmax.f32 %v4401_v43, 0.0  ;;  %v4504_v58 = vmul.f32 %v5406_v44, %v7044_v63  ;;  %v5407_v44 = vld [vmem:[%s7353_s8 + $0x78] sm:$0xff] }
 0x628   :  { %v4356_v4 = vpop.f32.mrf.mxu3  ;;  %v4534_v45 = vld [vmem:[#allocation5 + $0x20] sm:$0x1]  ;;  %v4535_v12 = vld [vmem:[#allocation5 + $0x21] sm:$0x1]  ;;  %v4555_v50 = vld [vmem:[#allocation5 + $0x22] sm:$0x1]  ;;  %v4483_v53 = vmul.f32 %v5402_v21, %v4480_v25  ;;  %v4481_v52 = vmul.f32 %v5400_v11, %v4480_v25  ;;  %v4467_v26 = vadd.f32 %v4463_v41, %v4442_v60  ;;  %v4482_v62 = vmul.f32 %v5401_v36, %v4480_v25 }
 0x629   :  { %4422 = vst.msk [vmem:[#allocation5 + $0x28] sm:$0xff] %vm4416_vm4, %v4411_v1  ;;  %v4374_v10 = vadd.f32 %v4356_v4, %v4274_v24  ;;  %v4536_v38 = vmax.f32 %v4534_v45, %v4535_v12  ;;  %v4556_v9 = vld [vmem:[#allocation5 + $0x23] sm:$0x1]  ;;  %v4552_v1 = vld [vmem:[#allocation5 + $0x18] sm:$0x1]  ;;  %v4525_v35 = vmul.f32 %v5410_v46, %v7058_v13  ;;  %v4575_v41 = vmax.f32 %v4573_v29, %v4574_v15 }
 0x62a   :  { %v4259_v28 = vpop.f32.mrf.mxu2  ;;  %v4553_v24 = vld [vmem:[#allocation5 + $0x19] sm:$0x1]  ;;  %v4576_v42 = vld [vmem:[#allocation5 + $0x24] sm:$0x1]  ;;  %v4486_v20 = vadd.f32 %v4482_v62, %v4465_v5  ;;  %v4505_v62 = vmul.f32 %v5407_v44, %v7044_v63 }
 0x62b   :  { %v4159_v59 = vpop.f32.mrf.mxu1  ;;  %v4388_v40 = vmul.f32 %v6977_v27, %v4374_v10  ;;  %v4537_v49 = vmax.f32 %v4533_v54, %v4536_v38  ;;  %v4577_v10 = vld [vmem:[#allocation5 + $0x25] sm:$0x1]  ;;  %v5405_v45 = vld [vmem:[%s7353_s8 + $0x68] sm:$0xff]  ;;  %v5412_v38 = vld [vmem:[%s7353_s8 + $0xa0] sm:$0xff]  ;;  %v4523_v54 = vmul.f32 %v5408_v55, %v7058_v13 }
 0x62c   :  { %v4175_v57 = vadd.f32 %v4159_v59, %v6965_v51  ;;  %v4439_v51 = vmul.f32 %v4438_v14, %v4434_v2  ;;  %v4557_v2 = vmax.f32 %v4555_v50, %v4556_v9  ;;  %v4554_v59 = vmax.f32 %v4552_v1, %v4553_v24 }
 0x62d   :  { %v4402_v33 = vadd.f32 %v6982_v48, %v4388_v40  ;;  %v4487_v40 = vadd.f32 %v4483_v53, %v4466_v8  ;;  %v4578_v7 = vmax.f32 %v4576_v42, %v4577_v10  ;;  %v5413_v53 = vld [vmem:[%s7353_s8 + $0xa8] sm:$0xff]  ;;  %v4524_v24 = vmul.f32 %v5409_v3, %v7058_v13 }
 0x62e   :  { %v4275_v23 = vadd.f32 %v4259_v28, %v4175_v57  ;;  %v4464_v37 = vadd.f32 %v4460_v56, %v4439_v51  ;;  %v4502_v28 = vmul.f32 %v5404_v0, %v7044_v63  ;;  %v7069_v57 = vperm.slane %v4537_v49, 0 }
 0x62f   :  { %v4412_v31 = vmax.f32 %v4402_v33, 0.0  ;;  %v4558_v39 = vmax.f32 %v4554_v59, %v4557_v2  ;;  %v4503_v56 = vmul.f32 %v5405_v45, %v7044_v63  ;;  %v4508_v60 = vadd.f32 %v4504_v58, %v4487_v40 }
 0x630   :  { %v4359_v22 = vpop.f32.mrf.mxu3  ;;  %v4485_v16 = vadd.f32 %v4481_v52, %v4464_v37  ;;  %v4594_v6 = vld [vmem:[#allocation5 + $0x28] sm:$0x1]  ;;  %v4546_v9 = vmul.f32 %v5414_v18, %v7069_v57  ;;  %v4544_v1 = vmul.f32 %v5412_v38, %v7069_v57  ;;  %v5418_v52 = vld [vmem:[%s7353_s8 + $0xd0] sm:$0xff]  ;;  %v4545_v10 = vmul.f32 %v5413_v53, %v7069_v57 }
 0x631   :  { %4423 = vst.msk [vmem:[#allocation5 + $0x30] sm:$0xff] %vm4416_vm4, %v4412_v31  ;;  %v4375_v43 = vadd.f32 %v4359_v22, %v4275_v23  ;;  %v5411_v37 = vld [vmem:[%s7353_s8 + $0x98] sm:$0xff]  ;;  %v4529_v2 = vadd.f32 %v4525_v35, %v4508_v60  ;;  %v4507_v42 = vadd.f32 %v4503_v56, %v4486_v20  ;;  %v5426_v20 = vld [vmem:[%s7353_s8 + $0x110] sm:$0xff] }
 0x632   :  { %v4262_v30 = vpop.f32.mrf.mxu2  ;;  %v4506_v34 = vadd.f32 %v4502_v28, %v4485_v16  ;;  %v4526_v59 = vmul.f32 %v5411_v37, %v7058_v13  ;;  %v5420_v13 = vld [vmem:[%s7353_s8 + $0xe0] sm:$0xff] }
 0x633   :  { %v4162_v61 = vpop.f32.mrf.mxu1  ;;  %v4389_v4 = vmul.f32 %v6977_v27, %v4375_v43  ;;  %v4579_v43 = vmax.f32 %v4575_v41, %v4578_v7  ;;  %v4550_v58 = vadd.f32 %v4546_v9, %v4529_v2  ;;  %v4528_v15 = vadd.f32 %v4524_v24, %v4507_v42  ;;  %v5417_v7 = vld [vmem:[%s7353_s8 + $0xc8] sm:$0xff] }
 0x634   :  { %v4176_v14 = vadd.f32 %v4162_v61, %v6968_v32  ;;  %v4484_v32 = vmul.f32 %v5403_v47, %v4480_v25  ;;  %v4595_v25 = vld [vmem:[#allocation5 + $0x29] sm:$0x1]  ;;  %v7096_v47 = vperm.slane %v4558_v39, 0 }
 0x635   :  { %v4403_v12 = vadd.f32 %v6982_v48, %v4389_v4  ;;  %v4596_v11 = vmax.f32 %v4594_v6, %v4595_v25  ;;  %v4616_v4 = vld [vmem:[#allocation5 + $0x2b] sm:$0x1]  ;;  %v4549_v38 = vadd.f32 %v4545_v10, %v4528_v15 }
 0x636   :  { %v7077_v51 = vadd.f32 %v4484_v32, %v4467_v26  ;;  %v4276_v21 = vadd.f32 %v4262_v30, %v4176_v14  ;;  %v4615_v26 = vld [vmem:[#allocation5 + $0x2a] sm:$0x1]  ;;  %v4527_v14 = vadd.f32 %v4523_v54, %v4506_v34  ;;  %v4567_v45 = vmul.f32 %v5418_v52, %v7096_v47  ;;  %v5422_v32 = vld [vmem:[%s7353_s8 + $0xf0] sm:$0xff]  ;;  %v5424_v34 = vld [vmem:[%s7353_s8 + $0x100] sm:$0xff] }
 0x637   :  { %v4413_v33 = vmax.f32 %v4403_v12, 0.0  ;;  %v7119_v12 = vperm.slane %v4579_v43, 0  ;;  %v4617_v39 = vmax.f32 %v4615_v26, %v4616_v4  ;;  %v5415_v6 = vld [vmem:[%s7353_s8 + $0xb8] sm:$0xff] }
 0x638   :  { %v4362_v17 = vpop.f32.mrf.mxu3  ;;  %v4597_v31 = vld [vmem:[#allocation5 + $0x32] sm:$0x1]  ;;  %v4598_v23 = vld [vmem:[#allocation5 + $0x33] sm:$0x1]  ;;  %v4618_v8 = vld [vmem:[#allocation5 + $0x34] sm:$0x1]  ;;  %v4548_v29 = vadd.f32 %v4544_v1, %v4527_v14  ;;  %v4509_v56 = vadd.f32 %v4505_v62, %v7077_v51 }
 0x639   :  { %4424 = vst.msk [vmem:[#allocation5 + $0x38] sm:$0xff] %vm4416_vm4, %v4413_v33  ;;  %v4376_v50 = vadd.f32 %v4362_v17, %v4276_v21  ;;  %v4599_v22 = vmax.f32 %v4597_v31, %v4598_v23  ;;  %v4619_v49 = vld [vmem:[#allocation5 + $0x35] sm:$0x1]  ;;  %v4639_v63 = vld [vmem:[#allocation5 + $0x36] sm:$0x1]  ;;  %v4571_v17 = vadd.f32 %v4567_v45, %v4550_v58  ;;  %v4586_v1 = vmul.f32 %v5420_v13, %v7119_v12  ;;  %v5419_v52 = vld [vmem:[%s7353_s8 + $0xd8] sm:$0xff] }
 0x63a   :  { %v4620_v46 = vmax.f32 %v4618_v8, %v4619_v49  ;;  %v4265_v28 = vpop.f32.mrf.mxu2  ;;  %v4640_v40 = vld [vmem:[#allocation5 + $0x37] sm:$0x1]  ;;  %v4636_v33 = vld [vmem:[#allocation5 + $0x2c] sm:$0x1]  ;;  %v4637_v21 = vld [vmem:[#allocation5 + $0x2d] sm:$0x1]  ;;  %v4530_v9 = vadd.f32 %v4526_v59, %v4509_v56 }
 0x63b   :  { %v4165_v36 = vpop.f32.mrf.mxu1  ;;  %v4390_v0 = vmul.f32 %v6977_v27, %v4376_v50  ;;  %v4600_v5 = vmax.f32 %v4596_v11, %v4599_v22  ;;  %v4641_v41 = vmax.f32 %v4639_v63, %v4640_v40  ;;  %v4566_v50 = vmul.f32 %v5417_v7, %v7096_v47  ;;  %v4658_v43 = vld [vmem:[#allocation5 + $0x2f] sm:$0x1]  ;;  %v5421_v8 = vld [vmem:[%s7353_s8 + $0xe8] sm:$0xff]  ;;  %v5428_v58 = vld [vmem:[%s7353_s8 + $0x120] sm:$0xff] }
 0x63c   :  { %v4177_v61 = vadd.f32 %v4165_v36, %v6971_v19  ;;  %v5416_v19 = vld [vmem:[%s7353_s8 + $0xc0] sm:$0xff]  ;;  %v4621_v60 = vmax.f32 %v4617_v39, %v4620_v46  ;;  %v4547_v11 = vmul.f32 %v5415_v6, %v7069_v57  ;;  %v4588_v22 = vmul.f32 %v5422_v32, %v7119_v12  ;;  %v4657_v36 = vld [vmem:[#allocation5 + $0x2e] sm:$0x1]  ;;  %v5429_v7 = vld [vmem:[%s7353_s8 + $0x128] sm:$0xff] }
 0x63d   :  { %v4404_v30 = vadd.f32 %v6982_v48, %v4390_v0  ;;  %v7121_v18 = vperm.slane %v4600_v5, 0  ;;  %v4565_v35 = vmul.f32 %v5416_v19, %v7096_v47  ;;  %v4638_v44 = vmax.f32 %v4636_v33, %v4637_v21  ;;  %v5430_v5 = vld [vmem:[%s7353_s8 + $0x130] sm:$0xff]  ;;  %v5427_v39 = vld [vmem:[%s7353_s8 + $0x118] sm:$0xff]  ;;  %v5432_v21 = vld [vmem:[%s7353_s8 + $0x140] sm:$0xff] }
 0x63e   :  { %v4277_v55 = vadd.f32 %v4265_v28, %v4177_v61  ;;  %v4570_v37 = vadd.f32 %v4566_v50, %v4549_v38  ;;  %v4592_v0 = vadd.f32 %v4588_v22, %v4571_v17  ;;  %v7155_v61 = vperm.slane %v4621_v60, 0  ;;  %v5433_v60 = vld [vmem:[%s7353_s8 + $0x148] sm:$0xff] }
 0x63f   :  { %v4414_v16 = vmax.f32 %v4404_v30, 0.0  ;;  %v4569_v54 = vadd.f32 %v4565_v35, %v4548_v29  ;;  %v4609_v53 = vmul.f32 %v5426_v20, %v7121_v18  ;;  %v4607_v24 = vmul.f32 %v5424_v34, %v7121_v18  ;;  %v5438_v20 = vld [vmem:[%s7353_s8 + $0x170] sm:$0xff] }
 0x640   :  { %v4365_v25 = vpop.f32.mrf.mxu3  ;;  %v4660_v31 = vld [vmem:[#allocation5 + $0x38] sm:$0x1]  ;;  %v4661_v23 = vld [vmem:[#allocation5 + $0x39] sm:$0x1]  ;;  %v4642_v2 = vmax.f32 %v4638_v44, %v4641_v41  ;;  %v4659_v26 = vmax.f32 %v4657_v36, %v4658_v43  ;;  %v4678_v4 = vld [vmem:[#allocation5 + $0x3c] sm:$0x1]  ;;  %v4587_v10 = vmul.f32 %v5421_v8, %v7119_v12  ;;  %v4551_v62 = vadd.f32 %v4547_v11, %v4530_v9 }
 0x641   :  { %4425 = vst.msk [vmem:[#allocation5 + $0x40] sm:$0xff] %vm4416_vm4, %v4414_v16  ;;  %v4377_v3 = vadd.f32 %v4365_v25, %v4277_v55  ;;  %v4662_v49 = vmax.f32 %v4660_v31, %v4661_v23  ;;  %v4679_v14 = vld [vmem:[#allocation5 + $0x3d] sm:$0x1]  ;;  %v4590_v42 = vadd.f32 %v4586_v1, %v4569_v54  ;;  %v4613_v30 = vadd.f32 %v4609_v53, %v4592_v0  ;;  %v5423_v55 = vld [vmem:[%s7353_s8 + $0xf8] sm:$0xff]  ;;  %v4699_v56 = vld [vmem:[#allocation5 + $0x3e] sm:$0x1] }
 0x642   :  { %v4591_v32 = vadd.f32 %v4587_v10, %v4570_v37  ;;  %v4568_v63 = vmul.f32 %v5419_v52, %v7096_v47  ;;  %v4630_v40 = vmul.f32 %v5430_v5, %v7155_v61  ;;  %v7171_v29 = vperm.slane %v4642_v2, 0  ;;  %v5434_v47 = vld [vmem:[%s7353_s8 + $0x150] sm:$0xff]  ;;  %v5436_v9 = vld [vmem:[%s7353_s8 + $0x160] sm:$0xff]  ;;  %v5437_v53 = vld [vmem:[%s7353_s8 + $0x168] sm:$0xff] }
 0x643   :  { %v4391_v51 = vmul.f32 %v6977_v27, %v4377_v3  ;;  %v5425_v27 = vld [vmem:[%s7353_s8 + $0x108] sm:$0xff]  ;;  %v4663_v19 = vmax.f32 %v4659_v26, %v4662_v49  ;;  %v4611_v45 = vadd.f32 %v4607_v24, %v4590_v42  ;;  %v4680_v15 = vmax.f32 %v4678_v4, %v4679_v14  ;;  %v5442_v34 = vld [vmem:[%s7353_s8 + $0x190] sm:$0xff]  ;;  %v5440_v8 = vld [vmem:[%s7353_s8 + $0x180] sm:$0xff] }
 0x644   :  { %v4608_v46 = vmul.f32 %v5425_v27, %v7121_v18  ;;  %v4628_v13 = vmul.f32 %v5428_v58, %v7155_v61  ;;  %v4572_v6 = vadd.f32 %v4568_v63, %v4551_v62  ;;  %v4634_v25 = vadd.f32 %v4630_v40, %v4613_v30  ;;  %v4700_v3 = vld [vmem:[#allocation5 + $0x3f] sm:$0x1]  ;;  %v5431_v37 = vld [vmem:[%s7353_s8 + $0x138] sm:$0xff] }
 0x645   :  { %v4405_v57 = vadd.f32 %v6982_v48, %v4391_v51  ;;  %v7192_v38 = vperm.slane %v4663_v19, 0  ;;  %v4589_v41 = vmul.f32 %v5423_v55, %v7119_v12  ;;  %v4610_v31 = vmul.f32 %v5427_v39, %v7121_v18  ;;  %v5441_v24 = vld [vmem:[%s7353_s8 + $0x188] sm:$0xff] }
 0x646   :  { %v4612_v35 = vadd.f32 %v4608_v46, %v4591_v32  ;;  %v4632_v17 = vadd.f32 %v4628_v13, %v4611_v45  ;;  %v4651_v23 = vmul.f32 %v5434_v47, %v7171_v29  ;;  %v4629_v11 = vmul.f32 %v5429_v7, %v7155_v61  ;;  %v5444_v47 = vld [vmem:[%s7353_s8 + $0x1a0] sm:$0xff]  ;;  %v5445_v13 = vld [vmem:[%s7353_s8 + $0x1a8] sm:$0xff] }
 0x647   :  { %v4415_v48 = vmax.f32 %v4405_v57, 0.0  ;;  %v4649_v18 = vmul.f32 %v5432_v21, %v7171_v29  ;;  %v4593_v44 = vadd.f32 %v4589_v41, %v4572_v6  ;;  %v4701_v43 = vmax.f32 %v4699_v56, %v4700_v3  ;;  %v5454_v41 = vld [vmem:[%s7353_s8 + $0x1f0] sm:$0xff] }
 0x648   :  { %v4681_v59 = vld [vmem:[#allocation5 + $0x46] sm:$0x1]  ;;  %v4682_v28 = vld [vmem:[#allocation5 + $0x47] sm:$0x1]  ;;  %v4720_v54 = vld [vmem:[#allocation5 + $0x40] sm:$0x1]  ;;  %v4655_v36 = vadd.f32 %v4651_v23, %v4634_v25  ;;  %v4633_v49 = vadd.f32 %v4629_v11, %v4612_v35  ;;  %v4650_v1 = vmul.f32 %v5433_v60, %v7171_v29  ;;  %v4672_v27 = vmul.f32 %v5438_v20, %v7192_v38 }
 0x649   :  { %4426 = vst.msk [vmem:[#allocation5 + $0x48] sm:$0xff] %vm4416_vm4, %v4415_v48  ;;  %v4683_v16 = vmax.f32 %v4681_v59, %v4682_v28  ;;  %v4721_v50 = vld [vmem:[#allocation5 + $0x41] sm:$0x1]  ;;  %v4741_v22 = vld [vmem:[#allocation5 + $0x42] sm:$0x1]  ;;  %v4653_v52 = vadd.f32 %v4649_v18, %v4632_v17  ;;  %v4670_v5 = vmul.f32 %v5436_v9, %v7192_v38  ;;  %v4614_v26 = vadd.f32 %v4610_v31, %v4593_v44  ;;  %v5435_v20 = vld [vmem:[%s7353_s8 + $0x158] sm:$0xff] }
 0x64a   :  { %v4742_v12 = vld [vmem:[#allocation5 + $0x43] sm:$0x1]  ;;  %v4722_v14 = vmax.f32 %v4720_v54, %v4721_v50  ;;  %v4671_v30 = vmul.f32 %v5437_v53, %v7192_v38  ;;  %v4654_v45 = vadd.f32 %v4650_v1, %v4633_v49  ;;  %v4631_v63 = vmul.f32 %v5431_v37, %v7155_v61  ;;  %v5448_v17 = vld [vmem:[%s7353_s8 + $0x1c0] sm:$0xff]  ;;  %v5443_v54 = vld [vmem:[%s7353_s8 + $0x198] sm:$0xff] }
 0x64b   :  { %v4684_v33 = vmax.f32 %v4680_v15, %v4683_v16  ;;  %v4743_v10 = vmax.f32 %v4741_v22, %v4742_v12  ;;  %v4676_v40 = vadd.f32 %v4672_v27, %v4655_v36  ;;  %v5446_v15 = vld [vmem:[%s7353_s8 + $0x1b0] sm:$0xff]  ;;  %v4674_v39 = vadd.f32 %v4670_v5, %v4653_v52  ;;  %v5452_v9 = vld [vmem:[%s7353_s8 + $0x1e0] sm:$0xff]  ;;  %v5449_v11 = vld [vmem:[%s7353_s8 + $0x1c8] sm:$0xff] }
 0x64c   :  { %v5450_v61 = vld [vmem:[%s7353_s8 + $0x1d0] sm:$0xff]  ;;  %v4675_v6 = vadd.f32 %v4671_v30, %v4654_v45  ;;  %v4635_v25 = vadd.f32 %v4631_v63, %v4614_v26  ;;  %v4652_v22 = vmul.f32 %v5435_v20, %v7171_v29  ;;  %v5469_v37 = vld [vmem:[%s7354_s9] ss:$0 sm:$0xff]  ;;  %v5451_v30 = vld [vmem:[%s7353_s8 + $0x1d8] sm:$0xff]  ;;  %v5500_v20 = vmov 0  }
 0x64d   :  { %v7207_v51 = vperm.slane %v4684_v33, 0  ;;  %v5439_v33 = vld [vmem:[%s7353_s8 + $0x178] sm:$0xff]  ;;  %5464 = vset.pattern.permute.xlu1 %v5500_v20  ;;  %5463 = vset.pattern.permute.xlu0 %v5500_v20 }
 0x64e   :  { %v4673_v12 = vmul.f32 %v5439_v33, %v7192_v38  ;;  %v4656_v49 = vadd.f32 %v4652_v22, %v4635_v25  ;;  %v5470_v38 = vld [vmem:[%s7354_s9 + $0x1] ss:$0 sm:$0xff]  ;;  %v5455_v45 = vld [vmem:[%s7353_s8 + $0x1f8] sm:$0xff]  ;;  %5462 = vset.pattern.permute.xlu2 %v5500_v20 }
 0x64f   :  { %v4693_v58 = vmul.f32 %v5442_v34, %v7207_v51  ;;  %v4691_v59 = vmul.f32 %v5440_v8, %v7207_v51  ;;  %v4692_v32 = vmul.f32 %v5441_v24, %v7207_v51  ;;  %v4694_v1 = vmul.f32 %v5443_v54, %v7207_v51  ;;  %v4864_v33 = vld [vmem:[%s7355_s10] sm:$0xff]  ;;  %v4865_v54 = vld [vmem:[%s7355_s10 + $0x8] sm:$0xff] }
 0x650   :  { %v4702_v57 = vld [vmem:[#allocation5 + $0x48] sm:$0x1]  ;;  %v4703_v0 = vld [vmem:[#allocation5 + $0x49] sm:$0x1]  ;;  %v4723_v2 = vld [vmem:[#allocation5 + $0x4a] sm:$0x1] }
 0x651   :  { %v4704_v4 = vmax.f32 %v4702_v57, %v4703_v0  ;;  %v4724_v42 = vld [vmem:[#allocation5 + $0x4b] sm:$0x1]  ;;  %v4744_v62 = vld [vmem:[#allocation5 + $0x4c] sm:$0x1]  ;;  %v4745_v48 = vld [vmem:[#allocation5 + $0x4d] sm:$0x1]  ;;  %v4697_v21 = vadd.f32 %v4693_v58, %v4676_v40  ;;  %v4695_v3 = vadd.f32 %v4691_v59, %v4674_v39  ;;  %v4696_v23 = vadd.f32 %v4692_v32, %v4675_v6 }
 0x652   :  { %v4725_v46 = vmax.f32 %v4723_v2, %v4724_v42  ;;  %v4746_v19 = vmax.f32 %v4744_v62, %v4745_v48  ;;  %v5453_v0 = vld [vmem:[%s7353_s8 + $0x1e8] sm:$0xff]  ;;  %v4677_v2 = vadd.f32 %v4673_v12, %v4656_v49 }
 0x653   :  { %v4705_v28 = vmax.f32 %v4701_v43, %v4704_v4  ;;  %v5447_v43 = vld [vmem:[%s7353_s8 + $0x1b8] sm:$0xff]  ;;  %s4933_s8 = sshll.u32 %s5501_s21, 4  ;;  %s4934_s8 = int_to_ptr.vmem [resolvable:$true] %s4933_s8 }
 0x654   :  { %v4726_v16 = vmax.f32 %v4722_v14, %v4725_v46  ;;  %v4747_v55 = vmax.f32 %v4743_v10, %v4746_v19  ;;  %v4698_v4 = vadd.f32 %v4694_v1, %v4677_v2 }
 0x655   :  { %v4711_v7 = vperm.slane %v4705_v28, 0 }
 0x656   :  { %v4732_v35 = vperm.slane %v4726_v16, 0  ;;  %v4753_v56 = vperm.slane %v4747_v55, 0 }
 0x657   :  { %v4714_v60 = vmul.f32 %v5446_v15, %v4711_v7  ;;  %v4712_v31 = vmul.f32 %v5444_v47, %v4711_v7  ;;  %v4713_v34 = vmul.f32 %v5445_v13, %v4711_v7  ;;  %v4715_v52 = vmul.f32 %v5447_v43, %v4711_v7 }
 0x658   :  { %v4735_v50 = vmul.f32 %v5450_v61, %v4732_v35  ;;  %v4733_v44 = vmul.f32 %v5448_v17, %v4732_v35  ;;  %v4756_v8 = vmul.f32 %v5454_v41, %v4753_v56  ;;  %v4754_v27 = vmul.f32 %v5452_v9, %v4753_v56 }
 0x659   :  { %v4718_v18 = vadd.f32 %v4714_v60, %v4697_v21  ;;  %v4716_v53 = vadd.f32 %v4712_v31, %v4695_v3  ;;  %v4717_v36 = vadd.f32 %v4713_v34, %v4696_v23  ;;  %v4734_v57 = vmul.f32 %v5449_v11, %v4732_v35  ;;  %v4873_v11 = vld [vmem:[%s7356_s11 + $0x8] sm:$0xff] }
 0x65a   :  { %v4755_v62 = vmul.f32 %v5453_v0, %v4753_v56  ;;  %v4719_v48 = vadd.f32 %v4715_v52, %v4698_v4  ;;  %v4736_v28 = vmul.f32 %v5451_v30, %v4732_v35  ;;  %v4757_v16 = vmul.f32 %v5455_v45, %v4753_v56  ;;  %v4872_v35 = vld [vmem:[%s7356_s11] sm:$0xff] }
 0x65b   :  { %v4739_v24 = vadd.f32 %v4735_v50, %v4718_v18  ;;  %v4737_v29 = vadd.f32 %v4733_v44, %v4716_v53  ;;  %v4738_v26 = vadd.f32 %v4734_v57, %v4717_v36  ;;  %v4782_v50 = vld [vmem:[%s7355_s10 + $0x10] sm:$0xff] }
 0x65c   :  { %v4740_v40 = vadd.f32 %v4736_v28, %v4719_v48  ;;  %v4790_v44 = vld [vmem:[%s7356_s11 + $0x10] sm:$0xff] }
 0x65d   :  { %v4760_v5 = vadd.f32 %v4756_v8, %v4739_v24  ;;  %v4758_v51 = vadd.f32 %v4754_v27, %v4737_v29  ;;  %v4759_v59 = vadd.f32 %v4755_v62, %v4738_v26  ;;  %v4867_v27 = vld [vmem:[%s7355_s10 + $0x18] sm:$0xff] }
 0x65e   :  { %v4761_v47 = vadd.f32 %v4757_v16, %v4740_v40 }
 0x65f   :  { %v4766_v14 = vmul.f32 %v5469_v37, %v4760_v5  ;;  %v4848_v42 = vmul.f32 %v5470_v38, %v4758_v51  ;;  %v4764_v10 = vmul.f32 %v5469_v37, %v4758_v51  ;;  %v4850_v32 = vmul.f32 %v5470_v38, %v4760_v5 }
 0x660   :  { %v4849_v63 = vmul.f32 %v5470_v38, %v4759_v59  ;;  %v4765_v15 = vmul.f32 %v5469_v37, %v4759_v59  ;;  %v4851_v7 = vmul.f32 %v5470_v38, %v4761_v47  ;;  %v4767_v61 = vmul.f32 %v5469_v37, %v4761_v47  ;;  %v4875_v38 = vld [vmem:[%s7356_s11 + $0x18] sm:$0xff]  ;;  %v4885_v59 = vld [vmem:[%s7357_s12 + $0x8] sm:$0xff] }
 0x661   :  { %v4774_v58 = vsel %vm4416_vm4, %v4766_v14, 0.0  ;;  %v4852_v46 = vsel %vm4416_vm4, %v4848_v42, 0.0  ;;  %v4768_v19 = vsel %vm4416_vm4, %v4764_v10, 0.0  ;;  %v4858_v55 = vsel %vm4416_vm4, %v4850_v32, 0.0 }
 0x662   :  { %4775 = vadd.xlane.f32.xlu2 %v4774_v58  ;;  %4853 = vadd.xlane.f32.xlu1 %v4852_v46  ;;  %v4855_v39 = vsel %vm4416_vm4, %v4849_v63, 0.0  ;;  %v4771_v13 = vsel %vm4416_vm4, %v4765_v15, 0.0  ;;  %v4861_v6 = vsel %vm4416_vm4, %v4851_v7, 0.0  ;;  %v4777_v25 = vsel %vm4416_vm4, %v4767_v61, 0.0  ;;  %v4800_v58 = vld [vmem:[%s7357_s12] sm:$0xff]  ;;  %v4802_v46 = vld [vmem:[%s7357_s12 + $0x10] sm:$0xff] }
 0x663   :  { %4769 = vadd.xlane.f32.xlu0 %v4768_v19  ;;  %v4803_v63 = vld [vmem:[%s7357_s12 + $0x18] sm:$0xff] }
 0x66a   :  { %4859 = vadd.xlane.f32.xlu2 %v4858_v55  ;;  %4856 = vadd.xlane.f32.xlu1 %v4855_v39 }
 0x66b   :  { %4772 = vadd.xlane.f32.xlu0 %v4771_v13 }
 0x672   :  { %4862 = vadd.xlane.f32.xlu1 %v4861_v6 }
 0x673   :  { %4778 = vadd.xlane.f32.xlu0 %v4777_v25 }
 0x6d5   :  { %v4776_v21 = vpop.xlane.xlu2 %4775  ;;  %v4854_v56 = vpop.xlane.xlu1 %4853 }
 0x6d6   :  { %v4868_v3 = vmul.f32 %v4864_v33, %v4854_v56  ;;  %v4770_v17 = vpop.xlane.xlu0 %4769  ;;  %v4786_v37 = vmul.f32 %v4782_v50, %v4776_v21 }
 0x6d7   :  { %v4784_v60 = vmul.f32 %v4864_v33, %v4770_v17 }
 0x6d8   :  { %v4876_v41 = vadd.f32 %v4872_v35, %v4868_v3  ;;  %v4794_v2 = vadd.f32 %v4790_v44, %v4786_v37 }
 0x6d9   :  { %v4792_v31 = vadd.f32 %v4872_v35, %v4784_v60 }
 0x6da   :  { %v4880_v23 = vmax.f32 %v4876_v41, 0.0  ;;  %v4798_v26 = vmax.f32 %v4794_v2, 0.0 }
 0x6db   :  { %v4796_v34 = vmax.f32 %v4792_v31, 0.0 }
 0x6dc   :  { %4890 = vperm.xlu1 %5464, %v4880_v23  }
 0x6dd   :  { %v4860_v9 = vpop.xlane.xlu2 %4859  ;;  %v4857_v22 = vpop.xlane.xlu1 %4856  ;;  %4806 = vperm.xlu2 %5462, %v4796_v34  }
 0x6de   :  { %v4870_v12 = vmul.f32 %v4860_v9, %v4782_v50  ;;  %v4869_v18 = vmul.f32 %v4865_v54, %v4857_v22  ;;  %v4773_v53 = vpop.xlane.xlu0 %4772 }
 0x6df   :  { %v4785_v36 = vmul.f32 %v4865_v54, %v4773_v53 }
 0x6e0   :  { %v4878_v43 = vadd.f32 %v4870_v12, %v4790_v44  ;;  %v4877_v8 = vadd.f32 %v4873_v11, %v4869_v18  ;;  %v4842_v44 = vld [vmem:[%s7358_s13] sm:$0x1] }
 0x6e1   :  { %v4793_v49 = vadd.f32 %v4873_v11, %v4785_v36 }
 0x6e2   :  { %v4882_v1 = vmax.f32 %v4878_v43, 0.0  ;;  %v4881_v24 = vmax.f32 %v4877_v8, 0.0 }
 0x6e3   :  { %v4797_v29 = vmax.f32 %v4793_v49, 0.0  ;;  %v4925_v49 = vld [vmem:[%s7358_s13] sm:$0x1] }
 0x6e4   :  { %4900 = vperm.xlu1 %5464, %v4882_v1  }
 0x6e5   :  { %4811 = vperm.xlu0 %5463, %v4797_v29   ;;  %v4863_v57 = vpop.xlane.xlu1 %4862  ;;  %4895 = vperm.xlu2 %5462, %v4881_v24  }
 0x6e6   :  { %v4871_v0 = vmul.f32 %v4867_v27, %v4863_v57  ;;  %v4779_v5 = vpop.xlane.xlu0 %4778 }
 0x6e7   :  { %v4787_v4 = vmul.f32 %v4867_v27, %v4779_v5 }
 0x6e8   :  { %v4879_v52 = vadd.f32 %v4875_v38, %v4871_v0 }
 0x6e9   :  { %v4795_v14 = vadd.f32 %v4875_v38, %v4787_v4 }
 0x6ea   :  { %v4883_v51 = vmax.f32 %v4879_v52, 0.0 }
 0x6eb   :  { %v4799_v42 = vmax.f32 %v4795_v14, 0.0 }
 0x6ec   :  { %4905 = vperm.xlu1 %5464, %v4883_v51  }
 0x6ed   :  { %4816 = vperm.xlu2 %5462, %v4798_v26  }
 0x6f5   :  { %4821 = vperm.xlu2 %5462, %v4799_v42  }
 0x737   :  { %v4807_v10 = vpop.permute.xlu2 %4806 }
 0x738   :  { %v4824_v19 = vmul.f32 %v4807_v10, %v4800_v58 }
 0x73a   :  { %v4829_v47 = vsel %vm4828_vm5, %v4824_v19, 0.0 }
 0x73f   :  { %v4896_v62 = vpop.permute.xlu2 %4895 }
 0x740   :  { %v4909_v55 = vmul.f32 %v4896_v62, %v4885_v59 }
 0x742   :  { %v4913_v20 = vsel %vm4828_vm5, %v4909_v55, 0.0 }
 0x747   :  { %v4817_v48 = vpop.permute.xlu2 %4816 }
 0x748   :  { %v4826_v15 = vmul.f32 %v4817_v48, %v4802_v46 }
 0x74a   :  { %v4832_v25 = vsel %vm4828_vm5, %v4826_v15, 0.0 }
 0x74e   :  { %v4891_v30 = vpop.permute.xlu1 %4890 }
 0x74f   :  { %v4908_v45 = vmul.f32 %v4891_v30, %v4800_v58  ;;  %v4822_v40 = vpop.permute.xlu2 %4821 }
 0x750   :  { %v4827_v7 = vmul.f32 %v4822_v40, %v4803_v63 }
 0x751   :  { %v4912_v61 = vsel %vm4828_vm5, %v4908_v45, 0.0 }
 0x752   :  { %v4914_v35 = vadd.f32 %v4913_v20, %v4912_v61  ;;  %v4834_v56 = vsel %vm4828_vm5, %v4827_v7, 0.0 }
 0x756   :  { %v4901_v28 = vpop.permute.xlu1 %4900 }
 0x757   :  { %v4812_v32 = vpop.permute.xlu0 %4811  ;;  %v4910_v39 = vmul.f32 %v4901_v28, %v4802_v46 }
 0x758   :  { %v4825_v16 = vmul.f32 %v4885_v59, %v4812_v32 }
 0x759   :  { %v4915_v33 = vsel %vm4828_vm5, %v4910_v39, 0.0 }
 0x75a   :  { %v4830_v13 = vsel %vm4828_vm5, %v4825_v16, 0.0  ;;  %v4916_v41 = vadd.f32 %v4915_v33, %v4914_v35 }
 0x75b   :  { %v4831_v6 = vadd.f32 %v4830_v13, %v4829_v47 }
 0x75d   :  { %v4833_v21 = vadd.f32 %v4832_v25, %v4831_v6 }
 0x75e   :  { %v4906_v3 = vpop.permute.xlu1 %4905 }
 0x75f   :  { %v4835_v17 = vadd.f32 %v4834_v56, %v4833_v21  ;;  %v4911_v60 = vmul.f32 %v4906_v3, %v4803_v63 }
 0x761   :  { %v4836_v31 = vrot.slane %v4835_v17, 4  ;;  %v4917_v23 = vsel %vm4828_vm5, %v4911_v60, 0.0 }
 0x762   :  { %v4918_v34 = vadd.f32 %v4917_v23, %v4916_v41 }
 0x763   :  { %v4837_v54 = vadd.f32 %v4836_v31, %v4835_v17 }
 0x764   :  { %v4919_v50 = vrot.slane %v4918_v34, 4 }
 0x765   :  { %v4838_v9 = vrot.slane %v4837_v54, 2 }
 0x766   :  { %v4920_v11 = vadd.f32 %v4919_v50, %v4918_v34 }
 0x767   :  { %v4839_v22 = vadd.f32 %v4838_v9, %v4837_v54 }
 0x768   :  { %v4921_v12 = vrot.slane %v4920_v11, 2 }
 0x769   :  { %v4840_v18 = vrot.slane %v4839_v22, 1 }
 0x76a   :  { %v4922_v53 = vadd.f32 %v4921_v12, %v4920_v11 }
 0x76b   :  { %v4841_v36 = vadd.f32 %v4840_v18, %v4839_v22 }
 0x76c   :  { %v4923_v43 = vrot.slane %v4922_v53, 1 }
 0x76d   :  { %v4843_v8 = vadd.f32 %v4842_v44, %v4841_v36 }
 0x76e   :  { %v4924_v1 = vadd.f32 %v4923_v43, %v4922_v53 }
 0x76f   :  { %4845 = vst.msk [vmem:[#allocation6] sm:$0x1] %vm4844_vm6, %v4843_v8 }
 0x770   :  { %v4926_v24 = vadd.f32 %v4925_v49, %v4924_v1 }
 0x772   :  { %4927 = vst.msk [vmem:[#allocation6 + $0x1] sm:$0x1] %vm4844_vm6, %v4926_v24 }
 0x773   :  { %4938 = dma.vmem_to_hbm [thread:$0]  %s4934_s8, 32, %s4936_s23, [#allocation7]  }
 0x774   :  { %5497 = dma.done.wait [#allocation7], 32  }
 0x775   :  { %5498 = vsyncadd [#allocation7], 4294967264 }
 0x776   :  { %4943 = vsyncpa [#allocation7], 1 }

</bundles_post_ra>
